<compile_context>
chip_gen: v7x
topology: tpu7x:2x2x1
jax: 0.10.0
libtpu: 0.0.40
codegen_flags: <defaults>
</compile_context>

<pallas_src>
import jax
import jax.numpy as jnp
from jax.experimental import pallas as pl
from jax.experimental.pallas import tpu as pltpu


# ----------------------------- Pallas kernel ---------------------------------
def _convlayer_kernel(x_ref,
                      w1, b1, w2, b2, w3, b3, w4, b4, w5, b5, w6, b6,
                      o_ref):
    # grid = (B, N // TILE_N); axis 1 is the max-pool (reduction) axis.
    n_step = pl.program_id(1)

    x = x_ref[0]                                           # (TILE_N, 8) bf16

    def layer(h_bf16, w_ref, b_ref):
        # bf16 matmul on the MXU with f32 accumulation; bias + ReLU in f32.
        y = jnp.dot(h_bf16, w_ref[...], preferred_element_type=jnp.float32)
        return jnp.maximum(y + b_ref[...], 0.0)            # f32

    h = layer(x, w1, b1)                                   # (TILE_N,   64) f32
    h = layer(h.astype(jnp.bfloat16), w2, b2)              # (TILE_N,   64)
    h128 = layer(h.astype(jnp.bfloat16), w3, b3)           # (TILE_N,  128)
    h256 = layer(h128.astype(jnp.bfloat16), w4, b4)        # (TILE_N,  256)
    m128 = jnp.max(h128, axis=0, keepdims=True)            # (1, 128)  (early: frees h128)
    h512 = layer(h256.astype(jnp.bfloat16), w5, b5)        # (TILE_N,  512)
    m256 = jnp.max(h256, axis=0, keepdims=True)            # (1, 256)
    h1024 = layer(h512.astype(jnp.bfloat16), w6, b6)       # (TILE_N, 1024)
    m512 = jnp.max(h512, axis=0, keepdims=True)            # (1, 512)
    m1024 = jnp.max(h1024, axis=0, keepdims=True)          # (1, 1024)

    # Single lane-dense (1, 1920) vector; concat order matches
    # torch.cat([x_1024, x_512, x_256, x_128], dim=1).
    m_all = jnp.concatenate([m1024, m512, m256, m128], axis=-1)

    @pl.when(n_step == 0)
    def _():
        o_ref[0] = m_all                                    # first tile: init

    @pl.when(n_step != 0)
    def _():
        o_ref[0] = jnp.maximum(o_ref[0], m_all)             # running max


# ------------------------------- Wrapper --------------------------------------
def convlayer_forward(x, ws, bs, *, tile_n=None):
    """x: (B, N, 3) f32.  ws: bf16 (C_in_padded, C_out) BN-folded weights.
    bs: f32 (1, C_out) BN-folded biases.  Returns (B, 1920, 1) f32."""
    B, N, C = x.shape
    assert C == 3
    if tile_n is None:
        tile_n = N if N <= 2048 else 1024                   # whole-N when it fits
    assert N % tile_n == 0
    n_tiles = N // tile_n

    # Pad xyz -> 8 channels (zeros); W1 rows were padded to match in init_params.
    x_pad = jnp.pad(x, ((0, 0), (0, 0), (0, 5))).astype(jnp.bfloat16)

    in_specs = [pl.BlockSpec((1, tile_n, 8), lambda b, n: (b, n, 0))]
    args = [x_pad]
    for w, bias in zip(ws, bs):
        # Constant index maps -> weights/biases stay resident in VMEM (fetched once).
        in_specs.append(pl.BlockSpec(w.shape, lambda b, n: (0, 0)))
        in_specs.append(pl.BlockSpec(bias.shape, lambda b, n: (0, 0)))
        args.extend([w, bias])

    out = pl.pallas_call(
        _convlayer_kernel,
        out_shape=jax.ShapeDtypeStruct((B, 1, 1920), jnp.float32),
        grid_spec=pltpu.PrefetchScalarGridSpec(
            num_scalar_prefetch=0,
            grid=(B, n_tiles),
            in_specs=in_specs,
            out_specs=pl.BlockSpec((1, 1, 1920), lambda b, n: (b, 0, 0)),
        ),
        compiler_params=pltpu.CompilerParams(
            dimension_semantics=("parallel", "arbitrary")),
    )(*args)
    return out[:, 0, :, None]                               # (B, 1920, 1)


# --------------------- Deterministic parameter construction -------------------
def init_params(key):
    """Conv weights/biases + BN(eval) params, BN folded into (W, b).

    Weights are returned transposed to (C_in, C_out) matmul form and cast to
    bfloat16 (f32 accumulation happens in-kernel).  conv1's (1,3) kernel over
    the xyz axis is a (3, 64) matmul, zero-padded to (8, 64) so the kernel's
    input tile can be 8 channels wide.  Biases stay float32, shape (1, C_out).
    """
    dims = [(3, 64), (64, 64), (64, 128), (128, 256), (256, 512), (512, 1024)]
    eps = 1e-5
    ws, bs = [], []
    for i, (cin, cout) in enumerate(dims):
        k = jax.random.fold_in(key, i)
        kw, kb, kg, kbe, km, kv = jax.random.split(k, 6)
        bound = 1.0 / jnp.sqrt(jnp.float32(cin))
        w     = jax.random.uniform(kw,  (cin, cout), jnp.float32, -bound, bound)
        b     = jax.random.uniform(kb,  (cout,),     jnp.float32, -bound, bound)
        gamma = jax.random.uniform(kg,  (cout,),     jnp.float32, 0.8, 1.2)
        beta  = jax.random.uniform(kbe, (cout,),     jnp.float32, -0.1, 0.1)
        mean  = jax.random.uniform(km,  (cout,),     jnp.float32, -0.1, 0.1)
        var   = jax.random.uniform(kv,  (cout,),     jnp.float32, 0.5, 1.5)
        scale = gamma / jnp.sqrt(var + eps)
        w_folded = w * scale[None, :]
        if i == 0:
            w_folded = jnp.pad(w_folded, ((0, 8 - cin), (0, 0)))   # xyz pad -> 8 rows
        ws.append(w_folded.astype(jnp.bfloat16))
        bs.append(((b - mean) * scale + beta).reshape(1, cout).astype(jnp.float32))
    return ws, bs


# ------------------------------ Reference (plain JAX) -------------------------
def reference(x, ws, bs):
    """Mirrors the kernel arithmetic (bf16 operands, f32 accumulation)."""
    B, N, _ = x.shape
    h = jnp.pad(x, ((0, 0), (0, 0), (0, 5))).reshape(B * N, 8).astype(jnp.bfloat16)
    feats = []
    for w, b in zip(ws, bs):
        y = jnp.dot(h, w, preferred_element_type=jnp.float32) + b
        y = jnp.maximum(y, 0.0)                              # f32
        feats.append(y)
        h = y.astype(jnp.bfloat16)
    pool = lambda f: jnp.max(f.reshape(B, N, -1), axis=1)
    out = jnp.concatenate(
        [pool(feats[5]), pool(feats[4]), pool(feats[3]), pool(feats[2])], axis=1)
    return out[:, :, None]


# ---------------------------------- Main --------------------------------------
if __name__ == "__main__":
    key = jax.random.PRNGKey(0)
    B, N = 2, 256                       # point_scales = 256
    kx, kp = jax.random.split(key)
    x = jax.random.normal(kx, (B, N, 3), dtype=jnp.float32)
    ws, bs = init_params(kp)

    out = convlayer_forward(x, ws, bs)            # tile_n defaults to N (whole tile)
    out = jax.block_until_ready(out)

    ref = jax.block_until_ready(reference(x, ws, bs))
    assert out.shape == (B, 1920, 1), out.shape
    assert jnp.allclose(out, ref, rtol=1e-3, atol=1e-2), \
        float(jnp.max(jnp.abs(out - ref)))
    print("KERNEL_OK")
</pallas_src>

<mosaic_0001>
module attributes {stable_mosaic.version = 11 : i64} {
  func.func @_convlayer_kernel(%arg0: i32, %arg1: i32, %arg2: memref<1x256x8xbf16, #tpu.memory_space<vmem>>, %arg3: memref<8x64xbf16, #tpu.memory_space<vmem>>, %arg4: memref<1x64xf32, #tpu.memory_space<vmem>>, %arg5: memref<64x64xbf16, #tpu.memory_space<vmem>>, %arg6: memref<1x64xf32, #tpu.memory_space<vmem>>, %arg7: memref<64x128xbf16, #tpu.memory_space<vmem>>, %arg8: memref<1x128xf32, #tpu.memory_space<vmem>>, %arg9: memref<128x256xbf16, #tpu.memory_space<vmem>>, %arg10: memref<1x256xf32, #tpu.memory_space<vmem>>, %arg11: memref<256x512xbf16, #tpu.memory_space<vmem>>, %arg12: memref<1x512xf32, #tpu.memory_space<vmem>>, %arg13: memref<512x1024xbf16, #tpu.memory_space<vmem>>, %arg14: memref<1x1024xf32, #tpu.memory_space<vmem>>, %arg15: memref<1x1x1920xf32, #tpu.memory_space<vmem>>) attributes {dimension_semantics = [#tpu.dimension_semantics<parallel>, #tpu.dimension_semantics<arbitrary>], iteration_bounds = array<i64: 2, 1>, scalar_prefetch = 0 : i64, scratch_operands = 0 : i64, tpu.core_type = #tpu.core_type<tc>, window_params = [{transform_indices = @transform_0, window_bounds = array<i64: 1, 256, 8>}, {pipeline_mode = #tpu.pipeline_mode<synchronous>, transform_indices = @transform_1, window_bounds = array<i64: 8, 64>}, {pipeline_mode = #tpu.pipeline_mode<synchronous>, transform_indices = @transform_2, window_bounds = array<i64: 1, 64>}, {pipeline_mode = #tpu.pipeline_mode<synchronous>, transform_indices = @transform_3, window_bounds = array<i64: 64, 64>}, {pipeline_mode = #tpu.pipeline_mode<synchronous>, transform_indices = @transform_4, window_bounds = array<i64: 1, 64>}, {pipeline_mode = #tpu.pipeline_mode<synchronous>, transform_indices = @transform_5, window_bounds = array<i64: 64, 128>}, {pipeline_mode = #tpu.pipeline_mode<synchronous>, transform_indices = @transform_6, window_bounds = array<i64: 1, 128>}, {pipeline_mode = #tpu.pipeline_mode<synchronous>, transform_indices = @transform_7, window_bounds = array<i64: 128, 256>}, {pipeline_mode = #tpu.pipeline_mode<synchronous>, transform_indices = @transform_8, window_bounds = array<i64: 1, 256>}, {pipeline_mode = #tpu.pipeline_mode<synchronous>, transform_indices = @transform_9, window_bounds = array<i64: 256, 512>}, {pipeline_mode = #tpu.pipeline_mode<synchronous>, transform_indices = @transform_10, window_bounds = array<i64: 1, 512>}, {pipeline_mode = #tpu.pipeline_mode<synchronous>, transform_indices = @transform_11, window_bounds = array<i64: 512, 1024>}, {pipeline_mode = #tpu.pipeline_mode<synchronous>, transform_indices = @transform_12, window_bounds = array<i64: 1, 1024>}, {transform_indices = @transform_13, window_bounds = array<i64: 1, 1, 1920>}]} {
    %c0 = arith.constant 0 : index
    %c0_0 = arith.constant 0 : index
    %c0_1 = arith.constant 0 : index
    %0 = vector.load %arg2[%c0, %c0_0, %c0_1] : memref<1x256x8xbf16, #tpu.memory_space<vmem>>, vector<1x256x8xbf16>
    %1 = vector.shape_cast %0 : vector<1x256x8xbf16> to vector<256x8xbf16>
    %c0_2 = arith.constant 0 : index
    %c0_3 = arith.constant 0 : index
    %2 = vector.load %arg3[%c0_2, %c0_3] : memref<8x64xbf16, #tpu.memory_space<vmem>>, vector<8x64xbf16>
    %cst = arith.constant dense<0.000000e+00> : vector<256x64xf32>
    %3 = tpu.matmul %1, %2, %cst {dimension_numbers = #tpu.dot_dimension_numbers<[1], [0], [0], [1], [0, 0, 1, 1], [], []>} : vector<256x8xbf16>, vector<8x64xbf16>, vector<256x64xf32> -> vector<256x64xf32>
    %c0_4 = arith.constant 0 : index
    %c0_5 = arith.constant 0 : index
    %4 = vector.load %arg4[%c0_4, %c0_5] : memref<1x64xf32, #tpu.memory_space<vmem>>, vector<1x64xf32>
    %5 = vector.broadcast %4 : vector<1x64xf32> to vector<256x64xf32>
    %6 = arith.addf %3, %5 : vector<256x64xf32>
    %cst_6 = arith.constant 0.000000e+00 : f32
    %7 = vector.broadcast %cst_6 : f32 to vector<256x64xf32>
    %8 = arith.maximumf %6, %7 : vector<256x64xf32>
    %9 = arith.truncf %8 : vector<256x64xf32> to vector<256x64xbf16>
    %c0_7 = arith.constant 0 : index
    %c0_8 = arith.constant 0 : index
    %10 = vector.load %arg5[%c0_7, %c0_8] : memref<64x64xbf16, #tpu.memory_space<vmem>>, vector<64x64xbf16>
    %cst_9 = arith.constant dense<0.000000e+00> : vector<256x64xf32>
    %11 = tpu.matmul %9, %10, %cst_9 {dimension_numbers = #tpu.dot_dimension_numbers<[1], [0], [0], [1], [0, 0, 1, 1], [], []>} : vector<256x64xbf16>, vector<64x64xbf16>, vector<256x64xf32> -> vector<256x64xf32>
    %c0_10 = arith.constant 0 : index
    %c0_11 = arith.constant 0 : index
    %12 = vector.load %arg6[%c0_10, %c0_11] : memref<1x64xf32, #tpu.memory_space<vmem>>, vector<1x64xf32>
    %13 = vector.broadcast %12 : vector<1x64xf32> to vector<256x64xf32>
    %14 = arith.addf %11, %13 : vector<256x64xf32>
    %cst_12 = arith.constant 0.000000e+00 : f32
    %15 = vector.broadcast %cst_12 : f32 to vector<256x64xf32>
    %16 = arith.maximumf %14, %15 : vector<256x64xf32>
    %17 = arith.truncf %16 : vector<256x64xf32> to vector<256x64xbf16>
    %c0_13 = arith.constant 0 : index
    %c0_14 = arith.constant 0 : index
    %18 = vector.load %arg7[%c0_13, %c0_14] : memref<64x128xbf16, #tpu.memory_space<vmem>>, vector<64x128xbf16>
    %cst_15 = arith.constant dense<0.000000e+00> : vector<256x128xf32>
    %19 = tpu.matmul %17, %18, %cst_15 {dimension_numbers = #tpu.dot_dimension_numbers<[1], [0], [0], [1], [0, 0, 1, 1], [], []>} : vector<256x64xbf16>, vector<64x128xbf16>, vector<256x128xf32> -> vector<256x128xf32>
    %c0_16 = arith.constant 0 : index
    %c0_17 = arith.constant 0 : index
    %20 = vector.load %arg8[%c0_16, %c0_17] : memref<1x128xf32, #tpu.memory_space<vmem>>, vector<1x128xf32>
    %21 = vector.broadcast %20 : vector<1x128xf32> to vector<256x128xf32>
    %22 = arith.addf %19, %21 : vector<256x128xf32>
    %cst_18 = arith.constant 0.000000e+00 : f32
    %23 = vector.broadcast %cst_18 : f32 to vector<256x128xf32>
    %24 = arith.maximumf %22, %23 : vector<256x128xf32>
    %25 = arith.truncf %24 : vector<256x128xf32> to vector<256x128xbf16>
    %c0_19 = arith.constant 0 : index
    %c0_20 = arith.constant 0 : index
    %26 = vector.load %arg9[%c0_19, %c0_20] : memref<128x256xbf16, #tpu.memory_space<vmem>>, vector<128x256xbf16>
    %cst_21 = arith.constant dense<0.000000e+00> : vector<256x256xf32>
    %27 = tpu.matmul %25, %26, %cst_21 {dimension_numbers = #tpu.dot_dimension_numbers<[1], [0], [0], [1], [0, 0, 1, 1], [], []>} : vector<256x128xbf16>, vector<128x256xbf16>, vector<256x256xf32> -> vector<256x256xf32>
    %c0_22 = arith.constant 0 : index
    %c0_23 = arith.constant 0 : index
    %28 = vector.load %arg10[%c0_22, %c0_23] : memref<1x256xf32, #tpu.memory_space<vmem>>, vector<1x256xf32>
    %29 = vector.broadcast %28 : vector<1x256xf32> to vector<256x256xf32>
    %30 = arith.addf %27, %29 : vector<256x256xf32>
    %cst_24 = arith.constant 0.000000e+00 : f32
    %31 = vector.broadcast %cst_24 : f32 to vector<256x256xf32>
    %32 = arith.maximumf %30, %31 : vector<256x256xf32>
    %cst_25 = arith.constant dense<0xFF800000> : vector<128xf32>
    %33 = vector.multi_reduction <maximumf>, %24, %cst_25 [0] : vector<256x128xf32> to vector<128xf32>
    %34 = vector.shape_cast %33 : vector<128xf32> to vector<1x128xf32>
    %35 = arith.truncf %32 : vector<256x256xf32> to vector<256x256xbf16>
    %c0_26 = arith.constant 0 : index
    %c0_27 = arith.constant 0 : index
    %36 = vector.load %arg11[%c0_26, %c0_27] : memref<256x512xbf16, #tpu.memory_space<vmem>>, vector<256x512xbf16>
    %cst_28 = arith.constant dense<0.000000e+00> : vector<256x512xf32>
    %37 = tpu.matmul %35, %36, %cst_28 {dimension_numbers = #tpu.dot_dimension_numbers<[1], [0], [0], [1], [0, 0, 1, 1], [], []>} : vector<256x256xbf16>, vector<256x512xbf16>, vector<256x512xf32> -> vector<256x512xf32>
    %c0_29 = arith.constant 0 : index
    %c0_30 = arith.constant 0 : index
    %38 = vector.load %arg12[%c0_29, %c0_30] : memref<1x512xf32, #tpu.memory_space<vmem>>, vector<1x512xf32>
    %39 = vector.broadcast %38 : vector<1x512xf32> to vector<256x512xf32>
    %40 = arith.addf %37, %39 : vector<256x512xf32>
    %cst_31 = arith.constant 0.000000e+00 : f32
    %41 = vector.broadcast %cst_31 : f32 to vector<256x512xf32>
    %42 = arith.maximumf %40, %41 : vector<256x512xf32>
    %cst_32 = arith.constant dense<0xFF800000> : vector<256xf32>
    %43 = vector.multi_reduction <maximumf>, %32, %cst_32 [0] : vector<256x256xf32> to vector<256xf32>
    %44 = vector.shape_cast %43 : vector<256xf32> to vector<1x256xf32>
    %45 = arith.truncf %42 : vector<256x512xf32> to vector<256x512xbf16>
    %c0_33 = arith.constant 0 : index
    %c0_34 = arith.constant 0 : index
    %46 = vector.load %arg13[%c0_33, %c0_34] : memref<512x1024xbf16, #tpu.memory_space<vmem>>, vector<512x1024xbf16>
    %cst_35 = arith.constant dense<0.000000e+00> : vector<256x1024xf32>
    %47 = tpu.matmul %45, %46, %cst_35 {dimension_numbers = #tpu.dot_dimension_numbers<[1], [0], [0], [1], [0, 0, 1, 1], [], []>} : vector<256x512xbf16>, vector<512x1024xbf16>, vector<256x1024xf32> -> vector<256x1024xf32>
    %c0_36 = arith.constant 0 : index
    %c0_37 = arith.constant 0 : index
    %48 = vector.load %arg14[%c0_36, %c0_37] : memref<1x1024xf32, #tpu.memory_space<vmem>>, vector<1x1024xf32>
    %49 = vector.broadcast %48 : vector<1x1024xf32> to vector<256x1024xf32>
    %50 = arith.addf %47, %49 : vector<256x1024xf32>
    %cst_38 = arith.constant 0.000000e+00 : f32
    %51 = vector.broadcast %cst_38 : f32 to vector<256x1024xf32>
    %52 = arith.maximumf %50, %51 : vector<256x1024xf32>
    %cst_39 = arith.constant dense<0xFF800000> : vector<512xf32>
    %53 = vector.multi_reduction <maximumf>, %42, %cst_39 [0] : vector<256x512xf32> to vector<512xf32>
    %54 = vector.shape_cast %53 : vector<512xf32> to vector<1x512xf32>
    %cst_40 = arith.constant dense<0xFF800000> : vector<1024xf32>
    %55 = vector.multi_reduction <maximumf>, %52, %cst_40 [0] : vector<256x1024xf32> to vector<1024xf32>
    %56 = vector.shape_cast %55 : vector<1024xf32> to vector<1x1024xf32>
    %57 = tpu.concatenate %56, %54, %44, %34 in 1 : vector<1x1024xf32>, vector<1x512xf32>, vector<1x256xf32>, vector<1x128xf32> -> vector<1x1920xf32>
    %c0_i32 = arith.constant 0 : i32
    %58 = arith.cmpi eq, %arg1, %c0_i32 : i32
    %59 = arith.extui %58 : i1 to i32
    %c0_i32_41 = arith.constant 0 : i32
    %60 = arith.cmpi ne, %59, %c0_i32_41 : i32
    scf.if %60 {
      %c0_44 = arith.constant 0 : index
      %c0_45 = arith.constant 0 : index
      %c0_46 = arith.constant 0 : index
      %64 = vector.load %arg15[%c0_44, %c0_45, %c0_46] : memref<1x1x1920xf32, #tpu.memory_space<vmem>>, vector<1x1x1920xf32>
      %65 = vector.shape_cast %64 : vector<1x1x1920xf32> to vector<1x1920xf32>
      %66 = vector.shape_cast %57 : vector<1x1920xf32> to vector<1x1x1920xf32>
      tpu.vector_store %arg15[%c0_44, %c0_45, %c0_46], %66 {strides = array<i32>} : memref<1x1x1920xf32, #tpu.memory_space<vmem>>, vector<1x1x1920xf32>,
    } else {
    }
    %c0_i32_42 = arith.constant 0 : i32
    %61 = arith.cmpi ne, %arg1, %c0_i32_42 : i32
    %62 = arith.extui %61 : i1 to i32
    %c0_i32_43 = arith.constant 0 : i32
    %63 = arith.cmpi ne, %62, %c0_i32_43 : i32
    scf.if %63 {
      %c0_44 = arith.constant 0 : index
      %c0_45 = arith.constant 0 : index
      %c0_46 = arith.constant 0 : index
      %64 = vector.load %arg15[%c0_44, %c0_45, %c0_46] : memref<1x1x1920xf32, #tpu.memory_space<vmem>>, vector<1x1x1920xf32>
      %65 = vector.shape_cast %64 : vector<1x1x1920xf32> to vector<1x1920xf32>
      %66 = arith.maximumf %65, %57 : vector<1x1920xf32>
      %c0_47 = arith.constant 0 : index
      %c0_48 = arith.constant 0 : index
      %c0_49 = arith.constant 0 : index
      %67 = vector.load %arg15[%c0_47, %c0_48, %c0_49] : memref<1x1x1920xf32, #tpu.memory_space<vmem>>, vector<1x1x1920xf32>
      %68 = vector.shape_cast %67 : vector<1x1x1920xf32> to vector<1x1920xf32>
      %69 = vector.shape_cast %66 : vector<1x1920xf32> to vector<1x1x1920xf32>
      tpu.vector_store %arg15[%c0_47, %c0_48, %c0_49], %69 {strides = array<i32>} : memref<1x1x1920xf32, #tpu.memory_space<vmem>>, vector<1x1x1920xf32>,
    } else {
    }
    return
  }
  func.func @transform_0(%arg0: i32, %arg1: i32) -> (i32, i32, i32) {
    %c0_i32 = arith.constant 0 : i32
    %c0_i32_0 = arith.constant 0 : i32
    return %arg0, %arg1, %c0_i32 : i32, i32, i32
  }
  func.func @transform_1(%arg0: i32, %arg1: i32) -> (i32, i32) {
    %c0_i32 = arith.constant 0 : i32
    %c0_i32_0 = arith.constant 0 : i32
    %c0_i32_1 = arith.constant 0 : i32
    return %c0_i32, %c0_i32_0 : i32, i32
  }
  func.func @transform_2(%arg0: i32, %arg1: i32) -> (i32, i32) {
    %c0_i32 = arith.constant 0 : i32
    %c0_i32_0 = arith.constant 0 : i32
    %c0_i32_1 = arith.constant 0 : i32
    return %c0_i32, %c0_i32_0 : i32, i32
  }
  func.func @transform_3(%arg0: i32, %arg1: i32) -> (i32, i32) {
    %c0_i32 = arith.constant 0 : i32
    %c0_i32_0 = arith.constant 0 : i32
    %c0_i32_1 = arith.constant 0 : i32
    return %c0_i32, %c0_i32_0 : i32, i32
  }
  func.func @transform_4(%arg0: i32, %arg1: i32) -> (i32, i32) {
    %c0_i32 = arith.constant 0 : i32
    %c0_i32_0 = arith.constant 0 : i32
    %c0_i32_1 = arith.constant 0 : i32
    return %c0_i32, %c0_i32_0 : i32, i32
  }
  func.func @transform_5(%arg0: i32, %arg1: i32) -> (i32, i32) {
    %c0_i32 = arith.constant 0 : i32
    %c0_i32_0 = arith.constant 0 : i32
    %c0_i32_1 = arith.constant 0 : i32
    return %c0_i32, %c0_i32_0 : i32, i32
  }
  func.func @transform_6(%arg0: i32, %arg1: i32) -> (i32, i32) {
    %c0_i32 = arith.constant 0 : i32
    %c0_i32_0 = arith.constant 0 : i32
    %c0_i32_1 = arith.constant 0 : i32
    return %c0_i32, %c0_i32_0 : i32, i32
  }
  func.func @transform_7(%arg0: i32, %arg1: i32) -> (i32, i32) {
    %c0_i32 = arith.constant 0 : i32
    %c0_i32_0 = arith.constant 0 : i32
    %c0_i32_1 = arith.constant 0 : i32
    return %c0_i32, %c0_i32_0 : i32, i32
  }
  func.func @transform_8(%arg0: i32, %arg1: i32) -> (i32, i32) {
    %c0_i32 = arith.constant 0 : i32
    %c0_i32_0 = arith.constant 0 : i32
    %c0_i32_1 = arith.constant 0 : i32
    return %c0_i32, %c0_i32_0 : i32, i32
  }
  func.func @transform_9(%arg0: i32, %arg1: i32) -> (i32, i32) {
    %c0_i32 = arith.constant 0 : i32
    %c0_i32_0 = arith.constant 0 : i32
    %c0_i32_1 = arith.constant 0 : i32
    return %c0_i32, %c0_i32_0 : i32, i32
  }
  func.func @transform_10(%arg0: i32, %arg1: i32) -> (i32, i32) {
    %c0_i32 = arith.constant 0 : i32
    %c0_i32_0 = arith.constant 0 : i32
    %c0_i32_1 = arith.constant 0 : i32
    return %c0_i32, %c0_i32_0 : i32, i32
  }
  func.func @transform_11(%arg0: i32, %arg1: i32) -> (i32, i32) {
    %c0_i32 = arith.constant 0 : i32
    %c0_i32_0 = arith.constant 0 : i32
    %c0_i32_1 = arith.constant 0 : i32
    return %c0_i32, %c0_i32_0 : i32, i32
  }
  func.func @transform_12(%arg0: i32, %arg1: i32) -> (i32, i32) {
    %c0_i32 = arith.constant 0 : i32
    %c0_i32_0 = arith.constant 0 : i32
    %c0_i32_1 = arith.constant 0 : i32
    return %c0_i32, %c0_i32_0 : i32, i32
  }
  func.func @transform_13(%arg0: i32, %arg1: i32) -> (i32, i32, i32) {
    %c0_i32 = arith.constant 0 : i32
    %c0_i32_0 = arith.constant 0 : i32
    %c0_i32_1 = arith.constant 0 : i32
    return %arg0, %c0_i32, %c0_i32_0 : i32, i32, i32
  }
}

</mosaic_0001>

<bundles_post_ra>
// kernel: tpu_custom_call.1
= control target key start
LH: loop header
LB: loop body
LE: loop exit
PB: predicated region body
PF: predicated region fallthrough
CT: control target
= control target key end

     0   :  { %s10632_s0 = inlined_call_operand.vmem [shape: bf16[2,256,8], index: 0, kind: input, shape index: {}]   ;;  %s10633_s1 = inlined_call_operand.vmem [shape: bf16[8,64], index: 1, kind: input, shape index: {}]   ;;  %s10634_s2 = inlined_call_operand.vmem [shape: f32[1,64], index: 2, kind: input, shape index: {}]   ;;  %s10635_s3 = inlined_call_operand.vmem [shape: bf16[64,64], index: 3, kind: input, shape index: {}]   ;;  %s10636_s4 = inlined_call_operand.vmem [shape: f32[1,64], index: 4, kind: input, shape index: {}]   ;;  %s10637_s5 = inlined_call_operand.vmem [shape: bf16[64,128], index: 5, kind: input, shape index: {}]   ;;  %s10638_s6 = inlined_call_operand.vmem [shape: f32[1,128], index: 6, kind: input, shape index: {}]   ;;  %s10639_s7 = inlined_call_operand.vmem [shape: bf16[128,256], index: 7, kind: input, shape index: {}]   ;;  %s10640_s8 = inlined_call_operand.vmem [shape: f32[1,256], index: 8, kind: input, shape index: {}]   ;;  %s10641_s9 = inlined_call_operand.hbm [shape: bf16[256,512], index: 9, kind: input, shape index: {}]   ;;  %s10642_s10 = inlined_call_operand.vmem [shape: f32[1,512], index: 10, kind: input, shape index: {}]   ;;  %s10643_s11 = inlined_call_operand.hbm [shape: bf16[512,1024], index: 11, kind: input, shape index: {}]   ;;  %s10644_s12 = inlined_call_operand.vmem [shape: f32[1,1024], index: 12, kind: input, shape index: {}]   ;;  %s10645_s13 = inlined_call_operand.hbm [shape: f32[2,1,1920], index: 13, kind: output, shape index: {}]  }
   0x1   :  { %10768 = sst [smem:[#allocation57_spill]] %s10645_s13 }
   0x2   :  { %18 = vsyncpa [#allocation3], 0 }
   0x3   :  { %19 = vsyncpa [#allocation6], 0 }
   0x4   :  { %20 = vsyncpa [#allocation4], 0 }
   0x5   :  { %22 = vsyncpa [#allocation4 + $0x1], 0  ;;  %s8719_s25 = smov 0   ;;  %s8721_s26 = smov 0  }
   0x6   :  { %s8723_s27 = smov 0   ;;  %s8725_s28 = smov 0  }
   0x7   :  { %s8727_s29 = smov 0   ;;  %s8729_s30 = smov 0  }
   0x8 LB: > { %10769 = sst [smem:[#allocation11_spill]] %s8618_s25  ;;  %s7149_s14 = sadd.s32 4294967295, %s8638_s30   ;;  %s8638_s30 = sphi %s8729_s30, %s28_s30   ;;  %s8634_s29 = sphi %s8727_s29, %s10973_s29   ;;  %s8630_s28 = sphi %s8725_s28, %s10972_s28   ;;  %s8626_s27 = sphi %s8723_s27, %s10971_s27   ;;  %s8622_s26 = sphi %s8721_s26, %s10975_s26   ;;  %s8618_s25 = sphi %s8719_s25, %s10974_s25  }
   0x9   : > { %10770 = sst [smem:[#allocation12_spill]] %s8626_s27  ;;  %s7150_s15 = sadd.s32 4294967294, %s8638_s30  }
   0xa   : > { %10771 = sst [smem:[#allocation13_spill]] %s8634_s29  ;;  %s40_s16 = sadd.s32 1, %s8634_s29 }
   0xb   : > { %10772 = sst [smem:[#allocation14_spill]] %s8638_s30  ;;  %s327_s17 = sadd.s32 1, %s8626_s27 }
   0xc   : > { %p42_p0 = scmp.ge.s32.totalorder %s40_s16, 2  ;;  %p337_p1 = scmp.ne.s32.totalorder %s8626_s27, %s8622_s26 }
   0xd   : > { %p338_p2 = scmp.eq.s32.totalorder %s7149_s14, 1  ;;  %p343_p3 = scmp.ne.s32.totalorder %s8622_s26, %s8618_s25 }
   0xe   : > { %s10977_s16 = smov (%p42_p0, %s40_s16), 0  ;;  %p344_p5 = scmp.eq.s32.totalorder %s7150_s15, 1 }
   0xf   : > { %10773 = sst [smem:[#allocation15_spill]] %s10977_s16  ;;  %p8759_p4 = por %p338_p2, %p337_p1 }
  0x10   : > { %s324_s19 = ssub.s32 %s8634_s29, %s10977_s16  ;;  %p7151_p6 = scmp.ge.s32.totalorder %s8638_s30, 1 }
  0x11   : > { %s10774_s18 = scalar_select %p8759_p4, 1, 0 }
  0x12   : > { %p325_p7 = scmp.eq.s32.totalorder %s324_s19, 0  ;;  %p8766_p8 = por %p344_p5, %p343_p3 }
  0x13   : > { %10775 = sst [smem:[#allocation16_spill]] %s10774_s18  ;;  %p351_p9 = scmp.lt.s32.totalorder %s8638_s30, 3 }
  0x14   : > { %s10776_s20 = scalar_select %p8766_p8, 1, 0 }
  0x15   : > { %s8772_s21 = scalar_select %p325_p7, %s8626_s27, %s327_s17  }
  0x16   : > { %10777 = sst [smem:[#allocation17_spill]] %s10776_s20  ;;  %p8774_p10 = pnand %p7151_p6, %p351_p9 }
  0x17   : > { %10778 = sst [smem:[#allocation18_spill]] %s8772_s21  ;;  %p8778_p11 = scmp.eq.s32.totalorder %s7149_s14, 0 }
  0x18   : > { %s10779_s22 = scalar_select %p8774_p10, 1, 0 }
  0x19   : > { %s10780_s23 = scalar_select %p8778_p11, 1, 0 }
  0x1a   : > { %p8279_p12 = pneg %p8774_p10  ;;  %s8640_s24 = smov [#allocation2]  }
  0x1b   : > { %s387_s15 = sshll.u32 %s8640_s24, 4  ;;  %s8641_s17 = smov [#allocation5]   ;;  %s388_s15 = int_to_ptr.vmem [resolvable:$true] %s387_s15 }
  0x1c   : > { %p8786_p13 = pnand %p8778_p11, %p8279_p12  ;;  %s403_s16 = sshll.u32 %s8641_s17, 4  ;;  %s8790_s16 = int_to_ptr.vmem [resolvable:$true] %s403_s16 }
  0x1d   : > { %s8496_s21 = scalar_lea.hbm %s10641_s9, 8192 }
  0x1e   : > { %p8497_p0 = scmp.ne.s32.totalorder %s10641_s9, %s8496_s21  ;;  %p8498_p1 = pneg %p8786_p13 }
  0x1f   : > { %p8503_p5 = scmp.lt.u32.totalorder %s8496_s21, %s10641_s9 }
  0x20   : > { %p8499_p2 = pnand %p8498_p1, %p8497_p0 }
  0x22   : > { %p8500_p3 = pneg %p8499_p2 }
  0x24   : > { %p8505_p6 = pnand %p8503_p5, %p8500_p3 }
  0x26   : > { %8508 = shalt.err (!%p8505_p6)
}
  0x27   : > { %s8509_s17 = scalar_lea.vmem %s388_s15, 8192  ;;  %p8517_p8 = scmp.lt.s32.totalorder %s388_s15, %s388_s15 }
  0x28   : > { %p8510_p7 = scmp.ne.s32.totalorder %s388_s15, %s8509_s17  ;;  %p8518_p4 = scmp.lt.s32.totalorder %s8509_s17, %s8509_s17 }
  0x2a   : > { %p8512_p9 = pnand %p8510_p7, %p8498_p1  ;;  %p8519_p11 = por %p8518_p4, %p8517_p8 }
  0x2c   : > { %p8513_p12 = pneg %p8512_p9 }
  0x2e   : > { %p8520_p10 = pnand %p8519_p11, %p8513_p12 }
  0x30   : > { %8523 = shalt.err (!%p8520_p10)
}
  0x31   : > { %s8642_s27 = smov 256   ;;  %s8643_s29 = smov 16  }
  0x32   : > { %8282 = dma.hbm_to_vmem [thread:$0]  (!%p8786_p13), %s10641_s9, 8192, %s388_s15, [#allocation3], %s8642_s27, %s8642_s27, %s8643_s29  }
  0x33   : > { %s8524_s24 = scalar_lea.hbm %s10643_s11, 32768 }
  0x34   : > { %p8525_p0 = scmp.ne.s32.totalorder %s10643_s11, %s8524_s24  ;;  %p8531_p10 = scmp.lt.u32.totalorder %s8524_s24, %s10643_s11 }
  0x36   : > { %p8527_p4 = pnand %p8525_p0, %p8498_p1 }
  0x38   : > { %p8528_p8 = pneg %p8527_p4 }
  0x3a   : > { %p8533_p11 = pnand %p8531_p10, %p8528_p8 }
  0x3c   : > { %8536 = shalt.err (!%p8533_p11)
}
  0x3d   : > { %s8537_s15 = scalar_lea.vmem %s8790_s16, 32768  ;;  %p8545_p6 = scmp.lt.s32.totalorder %s8790_s16, %s8790_s16 }
  0x3e   : > { %p8538_p2 = scmp.ne.s32.totalorder %s8790_s16, %s8537_s15  ;;  %p8546_p7 = scmp.lt.s32.totalorder %s8537_s15, %s8537_s15 }
  0x40   : > { %p8540_p3 = pnand %p8538_p2, %p8498_p1  ;;  %p8547_p9 = por %p8546_p7, %p8545_p6 }
  0x42   : > { %p8541_p5 = pneg %p8540_p3 }
  0x44   : > { %p8548_p12 = pnand %p8547_p9, %p8541_p5 }
  0x46   : > { %8551 = shalt.err (!%p8548_p12)
}
  0x47   : > { %s8644_s13 = smov 512   ;;  %s8645_s30 = smov 32  }
  0x48   : > { %8285 = dma.hbm_to_vmem [thread:$0]  (!%p8786_p13), %s10643_s11, 32768, %s8790_s16, [#allocation6], %s8644_s13, %s8644_s13, %s8645_s30  }
  0x49   : > { %p10782_p0 = scmp.ne.s32.totalorder %s10779_s22, 0 }
  0x4b   : > { %435 = sbr.rel (%p10782_p0) target bundleno = 1979 (0x7bb), region = 72 }
  0x52   : > { %p10783_p1 = scmp.ne.s32.totalorder %s10780_s23, 0 }
  0x54   : > { %8605 = dma.done.wait (%p10783_p1), [#allocation3], 8192  }
  0x55   : > { %8607 = vsyncadd (%p10783_p1), [#allocation3], 4294959104 }
  0x56   : > { %8609 = dma.done.wait (%p10783_p1), [#allocation6], 32768  }
  0x57   : > { %8611 = vsyncadd (%p10783_p1), [#allocation6], 4294934528  ;;  %p488_p4 = scmp.lt.s32.totalorder %s8630_s28, 1  ;;  %vm667_vm0 = vcmask 1043456   ;;  %vm618_vm1 = vcmask 64512   ;;  %v8367_v9 = vld [vmem:[%s10635_s3] sm:$0xff]  }
  0x58   : > { %v530_v0 = vld [vmem:[%s10633_s1] sm:$0xf]  ;;  %v8368_v10 = vld [vmem:[%s10635_s3 + $0x8] sm:$0xff]   ;;  %7746 = vmatprep.subr.bf16.mxu1 %v8367_v9  ;;  %v8369_v11 = vld [vmem:[%s10635_s3 + $0x10] sm:$0xff]   ;;  %vm919_vm2 = vcmask 523264   ;;  %s10962_s14 = sld [smem:[#allocation16_spill]] }
  0x59   : > { %s489_s19 = scalar_select %p488_p4, %s8630_s28, 1  ;;  %8266 = vmatprep.subr.msk.bf16.mxu0 %vm667_vm0, %v530_v0  ;;  %v669_v1 = vsel %vm667_vm0, %v530_v0, 0  ;;  %7750 = vmatpush3.bf16.msra.mxu1 %v8367_v9  ;;  %v8370_v13 = vld [vmem:[%s10635_s3 + $0x18] sm:$0xff]   ;;  %v8371_v22 = vld [vmem:[%s10637_s5] sm:$0xff]   ;;  %v8372_v41 = vld [vmem:[%s10637_s5 + $0x8] sm:$0xff]  }
  0x5a   : > { %7633 = vmatpush3.bf16.msra.mxu0 %v669_v1  ;;  %7747 = vmatprep.subr.bf16.mxu1 %v8368_v10  ;;  %v8909_v23 = vld [vmem:[%s10634_s2] ss:$0 sm:$0xff]  ;;  %v8373_v50 = vld [vmem:[%s10637_s5 + $0x10] sm:$0xff]   ;;  %s8268_s24 = smul.u32 240, %s8630_s28  ;;  %s10963_s30 = sld [smem:[#allocation57_spill]] }
  0x5b   : > { %s7574_s16 = sshll.u32 %s489_s19, 7  ;;  %7666 = vmatprep.subr.bf16.mxu0 %v8367_v9 }
  0x5c   : > { %s8854_s25 = scalar_lea.vmem %s10632_s0, %s7574_s16  ;;  %s484_s16 = sand.u32 1, %s8622_s26  }
  0x5d   : > { %v8351_v2 = vld [vmem:[%s8854_s25] sm:$0xff]   ;;  %v8352_v3 = vld [vmem:[%s8854_s25 + $0x8] sm:$0xff]   ;;  %v8353_v4 = vld [vmem:[%s8854_s25 + $0x10] sm:$0xff]   ;;  %7751 = vmatpush3.bf16.msra.mxu1 %v8368_v10  ;;  %s8267_s22 = smul.u32 15, %s484_s16  ;;  %s7040_s28 = scalar_lea.sflag [#allocation4], %s484_s16 }
  0x5e   : > { %7634 = vmatprep.mubr.msk.bf16.mxu0 %vm618_vm1, %v8351_v2  ;;  %v8354_v5 = vld [vmem:[%s8854_s25 + $0x18] sm:$0xff]   ;;  %v8355_v6 = vld [vmem:[%s8854_s25 + $0x20] sm:$0xff]   ;;  %v8356_v7 = vld [vmem:[%s8854_s25 + $0x28] sm:$0xff]   ;;  %7748 = vmatprep.subr.bf16.mxu1 %v8369_v11  ;;  %p10965_p8 = scmp.ne.s32.totalorder %s10962_s14, 0 }
  0x5f   : > { %7635 = vmatmul.mubr.msk.bf16.vlgmr.msra.gmra.mrb[0].mxu0 %vm618_vm1, %v8352_v3  ;;  %v8357_v8 = vld [vmem:[%s8854_s25 + $0x30] sm:$0xff]   ;;  %v8358_v12 = vld [vmem:[%s8854_s25 + $0x38] sm:$0xff]   ;;  %v8359_v14 = vld [vmem:[%s8854_s25 + $0x40] sm:$0xff]   ;;  %s10079_s29 = scalar_lea.vmem [#allocation7], %s8267_s22  ;;  %s8648_s22 = smov [#allocation7]  }
  0x60   : > { %7638 = vmatprep.mubr.msk.bf16.mxu0 %vm618_vm1, %v8353_v4  ;;  %7667 = vmatpush3.bf16.msra.mxu0 %v8367_v9  ;;  %v8360_v15 = vld [vmem:[%s8854_s25 + $0x48] sm:$0xff]   ;;  %v8361_v16 = vld [vmem:[%s8854_s25 + $0x50] sm:$0xff]   ;;  %v8362_v17 = vld [vmem:[%s8854_s25 + $0x58] sm:$0xff]   ;;  %s7054_s17 = sshll.u32 %s10079_s29, 4  ;;  %s10964_s18 = smov %s10963_s30  ;;  %s10584_s17 = int_to_ptr.vmem [resolvable:$true] %s7054_s17 }
  0x61   : > { %7668 = vmatprep.subr.bf16.mxu0 %v8368_v10  ;;  %7752 = vmatpush3.bf16.msra.mxu1 %v8369_v11  ;;  %v8363_v18 = vld [vmem:[%s8854_s25 + $0x60] sm:$0xff]   ;;  %v8364_v19 = vld [vmem:[%s8854_s25 + $0x68] sm:$0xff]   ;;  %v8365_v20 = vld [vmem:[%s8854_s25 + $0x70] sm:$0xff]   ;;  %s10582_s27 = scalar_lea.hbm %s10963_s30, %s8268_s24  ;;  %s8552_s19 = scalar_lea.vmem %s10584_s17, 240 }
  0x62   : > { %7749 = vmatprep.subr.bf16.mxu1 %v8370_v13  ;;  %v8366_v21 = vld [vmem:[%s8854_s25 + $0x78] sm:$0xff]   ;;  %p8553_p13 = scmp.ne.s32.totalorder %s10584_s17, %s8552_s19  ;;  %s8556_s25 = sshll.u32 %s8648_s22, 4  ;;  %s8557_s25 = int_to_ptr.vmem [resolvable:$false] %s8556_s25 }
  0x63   : > { %s8558_s23 = scalar_lea.vmem %s8557_s25, 480  ;;  %p8559_p2 = scmp.lt.s32.totalorder %s10584_s17, %s8557_s25 }
  0x64   : > { %7669 = vmatpush3.bf16.msra.mxu0 %v8368_v10  ;;  %p8554_p10 = pnand %p8553_p13, %p10965_p8  ;;  %p8560_p3 = scmp.lt.s32.totalorder %s8558_s23, %s8552_s19 }
  0x65   : > { %7670 = vmatprep.subr.bf16.mxu0 %v8369_v11  ;;  %7753 = vmatpush3.bf16.msra.mxu1 %v8370_v13 }
  0x66   : > { %p8555_p11 = pneg %p8554_p10  ;;  %p8561_p5 = por %p8560_p3, %p8559_p2 }
  0x67   : > { %7639 = vmatmul.mubr.msk.bf16.gmra.mrb[4].mxu0 %vm618_vm1, %v8354_v5 }
  0x68   : > { %7642 = vmatprep.mubr.msk.bf16.mxu0 %vm618_vm1, %v8355_v6  ;;  %7671 = vmatpush3.bf16.msra.mxu0 %v8369_v11  ;;  %p8562_p6 = pnand %p8561_p5, %p8555_p11 }
  0x69   : > { %7672 = vmatprep.subr.bf16.mxu0 %v8370_v13 }
  0x6c   : > { %7673 = vmatpush3.bf16.msra.mxu0 %v8370_v13 }
  0x6d   : > { %7706 = vmatprep.subr.bf16.mxu0 %v8371_v22 }
  0x6f   : > { %7643 = vmatmul.mubr.msk.bf16.gmra.mrb[8].mxu0 %vm618_vm1, %v8356_v7 }
  0x70   : > { %7646 = vmatprep.mubr.msk.bf16.mxu0 %vm618_vm1, %v8357_v8 }
  0x77   : > { %7647 = vmatmul.mubr.msk.bf16.gmra.mrb[12].mxu0 %vm618_vm1, %v8358_v12 }
  0x78   : > { %7650 = vmatprep.mubr.msk.bf16.mxu0 %vm618_vm1, %v8359_v14 }
  0x7f   : > { %7651 = vmatmul.mubr.msk.bf16.gmra.mrb[16].mxu0 %vm618_vm1, %v8360_v15 }
  0x80   : > { %7654 = vmatprep.mubr.msk.bf16.mxu0 %vm618_vm1, %v8361_v16 }
  0x87   : > { %7655 = vmatmul.mubr.msk.bf16.gmra.mrb[20].mxu0 %vm618_vm1, %v8362_v17 }
  0x88   : > { %7658 = vmatprep.mubr.msk.bf16.mxu0 %vm618_vm1, %v8363_v18 }
  0x8f   : > { %7659 = vmatmul.mubr.msk.bf16.gmra.mrb[24].mxu0 %vm618_vm1, %v8364_v19 }
  0x90   : > { %7662 = vmatprep.mubr.msk.bf16.mxu0 %vm618_vm1, %v8365_v20 }
  0x97   : > { %7663 = vmatmul.mubr.msk.bf16.gmra.mrb[28].mxu0 %vm618_vm1, %v8366_v21 }
 0x132   : > { %v7636_v24 = vpop.f32.mrb[0].mxu0 }
 0x133   : > { %v714_v25 = vadd.f32 %v7636_v24, %v8909_v23  ;;  %v705_v26 = vpop.f32.mrb[1].mxu0 }
 0x134   : > { %v706_v27 = vadd.f32 %v8909_v23, %v705_v26  ;;  %v7637_v28 = vpop.f32.mrb[2].mxu0 }
 0x135   : > { %v717_v29 = vadd.f32 %v7637_v28, %v8909_v23  ;;  %v708_v30 = vpop.f32.mrb[3].mxu0  ;;  %v834_v32 = vmax.f32 %v714_v25, 0.0 }
 0x136   : > { %v709_v31 = vadd.f32 %v8909_v23, %v708_v30  ;;  %v832_v34 = vmax.f32 %v706_v27, 0.0 }
 0x137   : > { %v835_v33 = vmax.f32 %v717_v29, 0.0 }
 0x138   : > { %v833_v35 = vmax.f32 %v709_v31, 0.0 }
 0x139   : > { %v865_v36 = vpack.c.bf16 %v835_v33, %v834_v32 }
 0x13a   : > { %v7640_v37 = vpop.f32.mrb[4].mxu0  ;;  %v864_v38 = vpack.c.bf16 %v833_v35, %v832_v34 }
 0x13b   : > { %v730_v39 = vadd.f32 %v7640_v37, %v8909_v23  ;;  %v721_v40 = vpop.f32.mrb[5].mxu0 }
 0x13c   : > { %v722_v42 = vadd.f32 %v8909_v23, %v721_v40  ;;  %v7641_v43 = vpop.f32.mrb[6].mxu0  ;;  %7674 = vmatprep.mubr.msk.bf16.mxu0 %vm919_vm2, %v864_v38 }
 0x13d   : > { %v838_v44 = vmax.f32 %v730_v39, 0.0  ;;  %v733_v45 = vadd.f32 %v7641_v43, %v8909_v23  ;;  %v724_v46 = vpop.f32.mrb[7].mxu0  ;;  %7675 = vmatmul.mubr.msk.bf16.vlgmr.msra.gmra.mrb[32].mxu0 %vm919_vm2, %v865_v36 }
 0x13e   : > { %v836_v47 = vmax.f32 %v722_v42, 0.0  ;;  %v725_v48 = vadd.f32 %v8909_v23, %v724_v46  ;;  %7707 = vmatpush3.bf16.msra.mxu0 %v8371_v22 }
 0x13f   : > { %v839_v49 = vmax.f32 %v733_v45, 0.0  ;;  %7708 = vmatprep.subr.bf16.mxu0 %v8372_v41 }
 0x140   : > { %v837_v51 = vmax.f32 %v725_v48, 0.0 }
 0x141   : > { %v867_v52 = vpack.c.bf16 %v839_v49, %v838_v44 }
 0x142   : > { %v7644_v53 = vpop.f32.mrb[8].mxu0  ;;  %v866_v54 = vpack.c.bf16 %v837_v51, %v836_v47  ;;  %7709 = vmatpush3.bf16.msra.mxu0 %v8372_v41 }
 0x143   : > { %v746_v55 = vadd.f32 %v7644_v53, %v8909_v23  ;;  %v737_v56 = vpop.f32.mrb[9].mxu0  ;;  %7710 = vmatprep.subr.bf16.mxu0 %v8373_v50 }
 0x144   : > { %v738_v57 = vadd.f32 %v8909_v23, %v737_v56  ;;  %v7645_v58 = vpop.f32.mrb[10].mxu0  ;;  %7678 = vmatprep.mubr.msk.bf16.mxu0 %vm919_vm2, %v866_v54 }
 0x145   : > { %v842_v59 = vmax.f32 %v746_v55, 0.0  ;;  %v749_v60 = vadd.f32 %v7645_v58, %v8909_v23  ;;  %v740_v61 = vpop.f32.mrb[11].mxu0  ;;  %7679 = vmatmul.mubr.msk.bf16.gmra.mrb[36].mxu0 %vm919_vm2, %v867_v52 }
 0x146   : > { %v840_v62 = vmax.f32 %v738_v57, 0.0  ;;  %v741_v63 = vadd.f32 %v8909_v23, %v740_v61  ;;  %7711 = vmatpush3.bf16.msra.mxu0 %v8373_v50 }
 0x147   : > { %v843_v0 = vmax.f32 %v749_v60, 0.0 }
 0x148   : > { %v841_v1 = vmax.f32 %v741_v63, 0.0 }
 0x149   : > { %v869_v2 = vpack.c.bf16 %v843_v0, %v842_v59 }
 0x14a   : > { %v7648_v3 = vpop.f32.mrb[12].mxu0  ;;  %v868_v4 = vpack.c.bf16 %v841_v1, %v840_v62 }
 0x14b   : > { %v762_v5 = vadd.f32 %v7648_v3, %v8909_v23  ;;  %v753_v6 = vpop.f32.mrb[13].mxu0 }
 0x14c   : > { %v754_v7 = vadd.f32 %v8909_v23, %v753_v6  ;;  %v7649_v8 = vpop.f32.mrb[14].mxu0  ;;  %7682 = vmatprep.mubr.msk.bf16.mxu0 %vm919_vm2, %v868_v4 }
 0x14d   : > { %v846_v9 = vmax.f32 %v762_v5, 0.0  ;;  %v765_v10 = vadd.f32 %v7649_v8, %v8909_v23  ;;  %v756_v11 = vpop.f32.mrb[15].mxu0  ;;  %7683 = vmatmul.mubr.msk.bf16.gmra.mrb[40].mxu0 %vm919_vm2, %v869_v2 }
 0x14e   : > { %v844_v12 = vmax.f32 %v754_v7, 0.0  ;;  %v757_v13 = vadd.f32 %v8909_v23, %v756_v11  ;;  %v8374_v11 = vld [vmem:[%s10637_s5 + $0x18] sm:$0xff]  }
 0x14f   : > { %v847_v14 = vmax.f32 %v765_v10, 0.0  ;;  %7712 = vmatprep.subr.bf16.mxu0 %v8374_v11 }
 0x150   : > { %v845_v15 = vmax.f32 %v757_v13, 0.0  ;;  %7713 = vmatpush3.bf16.msra.mxu0 %v8374_v11  ;;  %v8380_v13 = vld [vmem:[%s10639_s7 + $0x14] ss:$8 sps:$4 sm:$0xff]  }
 0x151   : > { %v871_v16 = vpack.c.bf16 %v847_v14, %v846_v9  ;;  %v8378_v14 = vld [vmem:[%s10639_s7 + $0x10] ss:$8 sps:$4 sm:$0xff]  }
 0x152   : > { %v7652_v17 = vpop.f32.mrb[16].mxu0  ;;  %v870_v18 = vpack.c.bf16 %v845_v15, %v844_v12  ;;  %v8375_v12 = vld [vmem:[%s10639_s7] ss:$8 sps:$4 sm:$0xff]   ;;  %v8383_v15 = vld [vmem:[%s10639_s7 + $0x24] ss:$8 sps:$4 sm:$0xff]  }
 0x153   : > { %v778_v19 = vadd.f32 %v7652_v17, %v8909_v23  ;;  %v769_v20 = vpop.f32.mrb[17].mxu0  ;;  %v8386_v17 = vld [vmem:[%s10639_s7 + $0x34] ss:$8 sps:$4 sm:$0xff]  }
 0x154   : > { %v770_v21 = vadd.f32 %v8909_v23, %v769_v20  ;;  %v7653_v22 = vpop.f32.mrb[18].mxu0  ;;  %7686 = vmatprep.mubr.msk.bf16.mxu0 %vm919_vm2, %v870_v18  ;;  %v8384_v18 = vld [vmem:[%s10639_s7 + $0x30] ss:$8 sps:$4 sm:$0xff]   ;;  %v8387_v20 = vld [vmem:[%s10639_s7 + $0x40] ss:$8 sps:$4 sm:$0xff]  }
 0x155   : > { %v850_v24 = vmax.f32 %v778_v19, 0.0  ;;  %v781_v25 = vadd.f32 %v7653_v22, %v8909_v23  ;;  %v772_v26 = vpop.f32.mrb[19].mxu0  ;;  %7687 = vmatmul.mubr.msk.bf16.gmra.mrb[44].mxu0 %vm919_vm2, %v871_v16  ;;  %v8381_v16 = vld [vmem:[%s10639_s7 + $0x20] ss:$8 sps:$4 sm:$0xff]   ;;  %v8389_v19 = vld [vmem:[%s10639_s7 + $0x44] ss:$8 sps:$4 sm:$0xff]  }
 0x156   : > { %v848_v27 = vmax.f32 %v770_v21, 0.0  ;;  %v773_v28 = vadd.f32 %v8909_v23, %v772_v26  ;;  %v8392_v21 = vld [vmem:[%s10639_s7 + $0x54] ss:$8 sps:$4 sm:$0xff]   ;;  %v8390_v22 = vld [vmem:[%s10639_s7 + $0x50] ss:$8 sps:$4 sm:$0xff]  }
 0x157   : > { %v851_v29 = vmax.f32 %v781_v25, 0.0 }
 0x158   : > { %v849_v30 = vmax.f32 %v773_v28, 0.0 }
 0x159   : > { %v873_v31 = vpack.c.bf16 %v851_v29, %v850_v24  ;;  %v9007_v24 = vld [vmem:[%s10636_s4] ss:$0 sm:$0xff] }
 0x15a   : > { %v7656_v32 = vpop.f32.mrb[20].mxu0  ;;  %v872_v33 = vpack.c.bf16 %v849_v30, %v848_v27 }
 0x15b   : > { %v794_v34 = vadd.f32 %v7656_v32, %v8909_v23  ;;  %v785_v35 = vpop.f32.mrb[21].mxu0 }
 0x15c   : > { %v786_v36 = vadd.f32 %v8909_v23, %v785_v35  ;;  %v7657_v37 = vpop.f32.mrb[22].mxu0  ;;  %7690 = vmatprep.mubr.msk.bf16.mxu1 %vm919_vm2, %v872_v33 }
 0x15d   : > { %v854_v38 = vmax.f32 %v794_v34, 0.0  ;;  %v797_v39 = vadd.f32 %v7657_v37, %v8909_v23  ;;  %v788_v40 = vpop.f32.mrb[23].mxu0  ;;  %7691 = vmatmul.mubr.msk.bf16.vlgmr.msra.gmra.mrb[0].mxu1 %vm919_vm2, %v873_v31 }
 0x15e   : > { %v852_v41 = vmax.f32 %v786_v36, 0.0  ;;  %v789_v42 = vadd.f32 %v8909_v23, %v788_v40 }
 0x15f   : > { %v855_v43 = vmax.f32 %v797_v39, 0.0 }
 0x160   : > { %v853_v44 = vmax.f32 %v789_v42, 0.0 }
 0x161   : > { %v875_v45 = vpack.c.bf16 %v855_v43, %v854_v38 }
 0x162   : > { %v874_v46 = vpack.c.bf16 %v853_v44, %v852_v41  ;;  %v7660_v47 = vpop.f32.mrb[24].mxu0 }
 0x163   : > { %v810_v48 = vadd.f32 %v7660_v47, %v8909_v23  ;;  %v801_v49 = vpop.f32.mrb[25].mxu0 }
 0x164   : > { %v802_v50 = vadd.f32 %v8909_v23, %v801_v49  ;;  %v7661_v51 = vpop.f32.mrb[26].mxu0  ;;  %7694 = vmatprep.mubr.msk.bf16.mxu1 %vm919_vm2, %v874_v46 }
 0x165   : > { %v858_v52 = vmax.f32 %v810_v48, 0.0  ;;  %v813_v53 = vadd.f32 %v7661_v51, %v8909_v23  ;;  %v804_v54 = vpop.f32.mrb[27].mxu0  ;;  %7695 = vmatmul.mubr.msk.bf16.gmra.mrb[4].mxu1 %vm919_vm2, %v875_v45 }
 0x166   : > { %v856_v55 = vmax.f32 %v802_v50, 0.0  ;;  %v805_v56 = vadd.f32 %v8909_v23, %v804_v54 }
 0x167   : > { %v859_v57 = vmax.f32 %v813_v53, 0.0 }
 0x168   : > { %v857_v58 = vmax.f32 %v805_v56, 0.0 }
 0x169   : > { %v877_v59 = vpack.c.bf16 %v859_v57, %v858_v52 }
 0x16a   : > { %v876_v60 = vpack.c.bf16 %v857_v58, %v856_v55  ;;  %v7664_v61 = vpop.f32.mrb[28].mxu0 }
 0x16b   : > { %v826_v62 = vadd.f32 %v7664_v61, %v8909_v23  ;;  %v817_v63 = vpop.f32.mrb[29].mxu0 }
 0x16c   : > { %v818_v0 = vadd.f32 %v8909_v23, %v817_v63  ;;  %v7665_v1 = vpop.f32.mrb[30].mxu0  ;;  %7698 = vmatprep.mubr.msk.bf16.mxu1 %vm919_vm2, %v876_v60 }
 0x16d   : > { %v862_v2 = vmax.f32 %v826_v62, 0.0  ;;  %v829_v3 = vadd.f32 %v7665_v1, %v8909_v23  ;;  %v820_v4 = vpop.f32.mrb[31].mxu0  ;;  %7699 = vmatmul.mubr.msk.bf16.gmra.mrb[8].mxu1 %vm919_vm2, %v877_v59 }
 0x16e   : > { %v860_v5 = vmax.f32 %v818_v0, 0.0  ;;  %v821_v6 = vadd.f32 %v8909_v23, %v820_v4  ;;  %v8377_v23 = vld [vmem:[%s10639_s7 + $0x4] ss:$8 sps:$4 sm:$0xff]  }
 0x16f   : > { %v863_v7 = vmax.f32 %v829_v3, 0.0  ;;  %1581 = vmatprep.subr.bf16.mxu1 %v8377_v23 }
 0x170   : > { %v861_v8 = vmax.f32 %v821_v6, 0.0  ;;  %1582 = vmatpush1.bf16.msra.mxu1 %v8375_v12 }
 0x171   : > { %v879_v9 = vpack.c.bf16 %v863_v7, %v862_v2  ;;  %1583 = vmatprep.subr.bf16.mxu1 %v8380_v13 }
 0x172   : > { %v878_v10 = vpack.c.bf16 %v861_v8, %v860_v5 }
 0x174   : > { %7702 = vmatprep.mubr.msk.bf16.mxu1 %vm919_vm2, %v878_v10  ;;  %1584 = vmatpush1.bf16.msra.mxu1 %v8378_v14 }
 0x175   : > { %7703 = vmatmul.mubr.msk.bf16.gmra.mrb[12].mxu1 %vm919_vm2, %v879_v9  ;;  %1585 = vmatprep.subr.bf16.mxu1 %v8383_v15 }
 0x178   : > { %1586 = vmatpush1.bf16.msra.mxu1 %v8381_v16 }
 0x179   : > { %1587 = vmatprep.subr.bf16.mxu1 %v8386_v17 }
 0x17c   : > { %1588 = vmatpush1.bf16.msra.mxu1 %v8384_v18 }
 0x17d   : > { %1589 = vmatprep.subr.bf16.mxu1 %v8389_v19 }
 0x180   : > { %1590 = vmatpush1.bf16.msra.mxu1 %v8387_v20 }
 0x181   : > { %1591 = vmatprep.subr.bf16.mxu1 %v8392_v21 }
 0x184   : > { %1592 = vmatpush1.bf16.msra.mxu1 %v8390_v22 }
 0x210   : > { %v7676_v25 = vpop.f32.mrb[32].mxu0 }
 0x211   : > { %v1011_v26 = vadd.f32 %v7676_v25, %v9007_v24  ;;  %v1002_v27 = vpop.f32.mrb[33].mxu0 }
 0x212   : > { %v1003_v28 = vadd.f32 %v9007_v24, %v1002_v27  ;;  %v7677_v29 = vpop.f32.mrb[34].mxu0 }
 0x213   : > { %v1014_v30 = vadd.f32 %v7677_v29, %v9007_v24  ;;  %v1005_v31 = vpop.f32.mrb[35].mxu0  ;;  %v1131_v33 = vmax.f32 %v1011_v26, 0.0 }
 0x214   : > { %v1006_v32 = vadd.f32 %v9007_v24, %v1005_v31  ;;  %v1129_v35 = vmax.f32 %v1003_v28, 0.0 }
 0x215   : > { %v1132_v34 = vmax.f32 %v1014_v30, 0.0 }
 0x216   : > { %v1130_v36 = vmax.f32 %v1006_v32, 0.0 }
 0x217   : > { %v1162_v37 = vpack.c.bf16 %v1132_v34, %v1131_v33 }
 0x218   : > { %v1161_v38 = vpack.c.bf16 %v1130_v36, %v1129_v35  ;;  %v7680_v39 = vpop.f32.mrb[36].mxu0 }
 0x219   : > { %v1027_v40 = vadd.f32 %v7680_v39, %v9007_v24  ;;  %v1018_v41 = vpop.f32.mrb[37].mxu0 }
 0x21a   : > { %v1019_v42 = vadd.f32 %v9007_v24, %v1018_v41  ;;  %v7681_v43 = vpop.f32.mrb[38].mxu0  ;;  %7714 = vmatprep.mubr.msk.bf16.mxu0 %vm919_vm2, %v1161_v38 }
 0x21b   : > { %v1135_v44 = vmax.f32 %v1027_v40, 0.0  ;;  %v1030_v45 = vadd.f32 %v7681_v43, %v9007_v24  ;;  %v1021_v46 = vpop.f32.mrb[39].mxu0  ;;  %7715 = vmatmul.mubr.msk.bf16.vlgmr.msra.gmra.mrb[48].mxu0 %vm919_vm2, %v1162_v37 }
 0x21c   : > { %v1133_v47 = vmax.f32 %v1019_v42, 0.0  ;;  %v1022_v48 = vadd.f32 %v9007_v24, %v1021_v46 }
 0x21d   : > { %v1136_v49 = vmax.f32 %v1030_v45, 0.0 }
 0x21e   : > { %v1134_v50 = vmax.f32 %v1022_v48, 0.0 }
 0x21f   : > { %v1164_v51 = vpack.c.bf16 %v1136_v49, %v1135_v44 }
 0x220   : > { %v1163_v52 = vpack.c.bf16 %v1134_v50, %v1133_v47  ;;  %v7684_v53 = vpop.f32.mrb[40].mxu0 }
 0x221   : > { %v1043_v54 = vadd.f32 %v7684_v53, %v9007_v24  ;;  %v1034_v55 = vpop.f32.mrb[41].mxu0 }
 0x222   : > { %v1035_v56 = vadd.f32 %v9007_v24, %v1034_v55  ;;  %v7685_v57 = vpop.f32.mrb[42].mxu0  ;;  %7718 = vmatprep.mubr.msk.bf16.mxu0 %vm919_vm2, %v1163_v52 }
 0x223   : > { %v1139_v58 = vmax.f32 %v1043_v54, 0.0  ;;  %v1046_v59 = vadd.f32 %v7685_v57, %v9007_v24  ;;  %v1037_v60 = vpop.f32.mrb[43].mxu0  ;;  %7719 = vmatmul.mubr.msk.bf16.gmra.mrb[52].mxu0 %vm919_vm2, %v1164_v51 }
 0x224   : > { %v1137_v61 = vmax.f32 %v1035_v56, 0.0  ;;  %v1038_v62 = vadd.f32 %v9007_v24, %v1037_v60 }
 0x225   : > { %v1140_v63 = vmax.f32 %v1046_v59, 0.0 }
 0x226   : > { %v1138_v0 = vmax.f32 %v1038_v62, 0.0 }
 0x227   : > { %v1166_v1 = vpack.c.bf16 %v1140_v63, %v1139_v58 }
 0x228   : > { %v1165_v2 = vpack.c.bf16 %v1138_v0, %v1137_v61  ;;  %v7688_v3 = vpop.f32.mrb[44].mxu0 }
 0x229   : > { %v1059_v4 = vadd.f32 %v7688_v3, %v9007_v24  ;;  %v1050_v5 = vpop.f32.mrb[45].mxu0 }
 0x22a   : > { %v1051_v6 = vadd.f32 %v9007_v24, %v1050_v5  ;;  %v7689_v7 = vpop.f32.mrb[46].mxu0  ;;  %7722 = vmatprep.mubr.msk.bf16.mxu0 %vm919_vm2, %v1165_v2 }
 0x22b   : > { %v1143_v8 = vmax.f32 %v1059_v4, 0.0  ;;  %v1062_v9 = vadd.f32 %v7689_v7, %v9007_v24  ;;  %v1053_v10 = vpop.f32.mrb[47].mxu0  ;;  %7723 = vmatmul.mubr.msk.bf16.gmra.mrb[56].mxu0 %vm919_vm2, %v1166_v1 }
 0x22c   : > { %v1141_v11 = vmax.f32 %v1051_v6, 0.0  ;;  %v1054_v12 = vadd.f32 %v9007_v24, %v1053_v10  ;;  %v8395_v10 = vld [vmem:[%s10639_s7 + $0x64] ss:$8 sps:$4 sm:$0xff]  }
 0x22d   : > { %v1144_v23 = vmax.f32 %v1062_v9, 0.0  ;;  %1593 = vmatprep.subr.bf16.mxu1 %v8395_v10  ;;  %v8420_v10 = vld [vmem:[#allocation2 + $0x68] ss:$16 sps:$4 sm:$0xff]  }
 0x22e   : > { %v1142_v13 = vmax.f32 %v1054_v12, 0.0  ;;  %v8396_v12 = vld [vmem:[%s10639_s7 + $0x70] ss:$8 sps:$4 sm:$0xff]  }
 0x22f   : > { %v1168_v14 = vpack.c.bf16 %v1144_v23, %v1143_v8  ;;  %v8646_v23 = vmov 0  }
 0x230   : > { %v1167_v15 = vpack.c.bf16 %v1142_v13, %v1141_v11  ;;  %v7692_v16 = vpop.f32.mrb[0].mxu1  ;;  %v8393_v11 = vld [vmem:[%s10639_s7 + $0x60] ss:$8 sps:$4 sm:$0xff]   ;;  %1613 = vmatprep.mubr.bf16.mxu1 %v8646_v23 }
 0x231   : > { %v1075_v17 = vadd.f32 %v7692_v16, %v9007_v24  ;;  %v1066_v18 = vpop.f32.mrb[1].mxu1  ;;  %1594 = vmatpush1.bf16.msra.mxu1 %v8393_v11  ;;  %v9073_v13 = vld [vmem:[%s10638_s6] ss:$0 sm:$0xff] }
 0x232   : > { %v1067_v19 = vadd.f32 %v9007_v24, %v1066_v18  ;;  %v7693_v20 = vpop.f32.mrb[2].mxu1  ;;  %7726 = vmatprep.mubr.msk.bf16.mxu0 %vm919_vm2, %v1167_v15 }
 0x233   : > { %v1147_v21 = vmax.f32 %v1075_v17, 0.0  ;;  %v1078_v22 = vadd.f32 %v7693_v20, %v9007_v24  ;;  %v1069_v25 = vpop.f32.mrb[3].mxu1  ;;  %7727 = vmatmul.mubr.msk.bf16.gmra.mrb[60].mxu0 %vm919_vm2, %v1168_v14  ;;  %v8401_v20 = vld [vmem:[#allocation2 + $0x4] ss:$16 sps:$4 sm:$0xff]  }
 0x234   : > { %v1145_v26 = vmax.f32 %v1067_v19, 0.0  ;;  %v1070_v27 = vadd.f32 %v9007_v24, %v1069_v25  ;;  %v8399_v19 = vld [vmem:[#allocation2] ss:$16 sps:$4 sm:$0xff]   ;;  %v8404_v25 = vld [vmem:[#allocation2 + $0xc] ss:$16 sps:$4 sm:$0xff]   ;;  %2313 = vmatprep.subr.bf16.mxu0 %v8401_v20 }
 0x235   : > { %v1148_v28 = vmax.f32 %v1078_v22, 0.0  ;;  %2314 = vmatpush1.bf16.msra.mxu0 %v8399_v19  ;;  %v8437_v19 = vld [vmem:[#allocation2 + $0xc4] ss:$16 sps:$4 sm:$0xff]  }
 0x236   : > { %v1146_v29 = vmax.f32 %v1070_v27, 0.0  ;;  %v8407_v27 = vld [vmem:[#allocation2 + $0x24] ss:$16 sps:$4 sm:$0xff]  }
 0x237   : > { %v1170_v30 = vpack.c.bf16 %v1148_v28, %v1147_v21  ;;  %2315 = vmatprep.subr.bf16.mxu0 %v8407_v27 }
 0x238   : > { %v7696_v31 = vpop.f32.mrb[4].mxu1  ;;  %v1169_v32 = vpack.c.bf16 %v1146_v29, %v1145_v26 }
 0x239   : > { %v1091_v33 = vadd.f32 %v7696_v31, %v9007_v24  ;;  %v1082_v34 = vpop.f32.mrb[5].mxu1 }
 0x23a   : > { %v1083_v35 = vadd.f32 %v9007_v24, %v1082_v34  ;;  %v7697_v36 = vpop.f32.mrb[6].mxu1  ;;  %7730 = vmatprep.mubr.msk.bf16.mxu0 %vm919_vm2, %v1169_v32 }
 0x23b   : > { %v1151_v37 = vmax.f32 %v1091_v33, 0.0  ;;  %v1094_v38 = vadd.f32 %v7697_v36, %v9007_v24  ;;  %v1085_v39 = vpop.f32.mrb[7].mxu1  ;;  %7731 = vmatmul.mubr.msk.bf16.gmra.mrb[64].mxu0 %vm919_vm2, %v1170_v30  ;;  %v8405_v30 = vld [vmem:[#allocation2 + $0x20] ss:$16 sps:$4 sm:$0xff]   ;;  %v8413_v33 = vld [vmem:[#allocation2 + $0x44] ss:$16 sps:$4 sm:$0xff]  }
 0x23c   : > { %v1149_v40 = vmax.f32 %v1083_v35, 0.0  ;;  %v1086_v41 = vadd.f32 %v9007_v24, %v1085_v39  ;;  %v8402_v35 = vld [vmem:[#allocation2 + $0x8] ss:$16 sps:$4 sm:$0xff]   ;;  %2316 = vmatpush1.bf16.msra.mxu0 %v8405_v30 }
 0x23d   : > { %v1152_v42 = vmax.f32 %v1094_v38, 0.0  ;;  %v8410_v38 = vld [vmem:[#allocation2 + $0x2c] ss:$16 sps:$4 sm:$0xff]   ;;  %2317 = vmatprep.subr.bf16.mxu0 %v8413_v33 }
 0x23e   : > { %v1150_v43 = vmax.f32 %v1086_v41, 0.0  ;;  %v8411_v41 = vld [vmem:[#allocation2 + $0x40] ss:$16 sps:$4 sm:$0xff]  }
 0x23f   : > { %v1172_v44 = vpack.c.bf16 %v1152_v42, %v1151_v37 }
 0x240   : > { %v7700_v45 = vpop.f32.mrb[8].mxu1  ;;  %v1171_v46 = vpack.c.bf16 %v1150_v43, %v1149_v40  ;;  %2318 = vmatpush1.bf16.msra.mxu0 %v8411_v41  ;;  %v8440_v41 = vld [vmem:[#allocation2 + $0xcc] ss:$16 sps:$4 sm:$0xff]  }
 0x241   : > { %v1107_v47 = vadd.f32 %v7700_v45, %v9007_v24  ;;  %v1098_v48 = vpop.f32.mrb[9].mxu1 }
 0x242   : > { %v1099_v49 = vadd.f32 %v9007_v24, %v1098_v48  ;;  %v7701_v50 = vpop.f32.mrb[10].mxu1  ;;  %7734 = vmatprep.mubr.msk.bf16.mxu0 %vm919_vm2, %v1171_v46  ;;  %v8408_v48 = vld [vmem:[#allocation2 + $0x28] ss:$16 sps:$4 sm:$0xff]  }
 0x243   : > { %v1155_v51 = vmax.f32 %v1107_v47, 0.0  ;;  %v1110_v52 = vadd.f32 %v7701_v50, %v9007_v24  ;;  %v1101_v53 = vpop.f32.mrb[11].mxu1  ;;  %7735 = vmatmul.mubr.msk.bf16.gmra.mrb[68].mxu0 %vm919_vm2, %v1172_v44  ;;  %v8419_v44 = vld [vmem:[#allocation2 + $0x64] ss:$16 sps:$4 sm:$0xff]  }
 0x244   : > { %v1153_v54 = vmax.f32 %v1099_v49, 0.0  ;;  %v1102_v55 = vadd.f32 %v9007_v24, %v1101_v53  ;;  %2319 = vmatprep.subr.bf16.mxu0 %v8419_v44  ;;  %v8441_v44 = vld [vmem:[#allocation2 + $0xe0] ss:$16 sps:$4 sm:$0xff]  }
 0x245   : > { %v1156_v56 = vmax.f32 %v1110_v52, 0.0 }
 0x246   : > { %v1154_v57 = vmax.f32 %v1102_v55, 0.0 }
 0x247   : > { %v1174_v58 = vpack.c.bf16 %v1156_v56, %v1155_v51  ;;  %v8416_v51 = vld [vmem:[#allocation2 + $0x4c] ss:$16 sps:$4 sm:$0xff]  }
 0x248   : > { %v7704_v59 = vpop.f32.mrb[12].mxu1  ;;  %v1173_v60 = vpack.c.bf16 %v1154_v57, %v1153_v54  ;;  %v8417_v54 = vld [vmem:[#allocation2 + $0x60] ss:$16 sps:$4 sm:$0xff]   ;;  %v8425_v57 = vld [vmem:[#allocation2 + $0x84] ss:$16 sps:$4 sm:$0xff]  }
 0x249   : > { %v1123_v61 = vadd.f32 %v7704_v59, %v9007_v24  ;;  %v1114_v62 = vpop.f32.mrb[13].mxu1  ;;  %2320 = vmatpush1.bf16.msra.mxu0 %v8417_v54  ;;  %v8446_v54 = vld [vmem:[#allocation2 + $0xec] ss:$16 sps:$4 sm:$0xff]  }
 0x24a   : > { %v1115_v63 = vadd.f32 %v9007_v24, %v1114_v62  ;;  %v7705_v0 = vpop.f32.mrb[14].mxu1  ;;  %7738 = vmatprep.mubr.msk.bf16.mxu0 %vm919_vm2, %v1173_v60  ;;  %v8414_v60 = vld [vmem:[#allocation2 + $0x48] ss:$16 sps:$4 sm:$0xff]   ;;  %2321 = vmatprep.subr.bf16.mxu0 %v8425_v57  ;;  %v8447_v57 = vld [vmem:[#allocation2 + $0x100] ss:$16 sps:$4 sm:$0xff]  }
 0x24b   : > { %v1159_v1 = vmax.f32 %v1123_v61, 0.0  ;;  %v1126_v2 = vadd.f32 %v7705_v0, %v9007_v24  ;;  %v1117_v3 = vpop.f32.mrb[15].mxu1  ;;  %7739 = vmatmul.mubr.msk.bf16.gmra.mrb[72].mxu0 %vm919_vm2, %v1174_v58  ;;  %v8422_v0 = vld [vmem:[#allocation2 + $0x6c] ss:$16 sps:$4 sm:$0xff]  }
 0x24c   : > { %v1157_v4 = vmax.f32 %v1115_v63, 0.0  ;;  %v1118_v5 = vadd.f32 %v9007_v24, %v1117_v3  ;;  %v8398_v24 = vld [vmem:[%s10639_s7 + $0x74] ss:$8 sps:$4 sm:$0xff]   ;;  %v8423_v3 = vld [vmem:[#allocation2 + $0x80] ss:$16 sps:$4 sm:$0xff]  }
 0x24d   : > { %v1160_v6 = vmax.f32 %v1126_v2, 0.0  ;;  %1595 = vmatprep.subr.bf16.mxu1 %v8398_v24  ;;  %2322 = vmatpush1.bf16.msra.mxu0 %v8423_v3 }
 0x24e   : > { %v1158_v7 = vmax.f32 %v1118_v5, 0.0  ;;  %1596 = vmatpush1.bf16.msra.mxu1 %v8396_v12  ;;  %v8428_v12 = vld [vmem:[#allocation2 + $0x8c] ss:$16 sps:$4 sm:$0xff]  }
 0x24f   : > { %v1176_v8 = vpack.c.bf16 %v1160_v6, %v1159_v1  ;;  %2506 = vmatprep.subr.bf16.mxu1 %v8404_v25  ;;  %v8431_v6 = vld [vmem:[#allocation2 + $0xa4] ss:$16 sps:$4 sm:$0xff]  }
 0x250   : > { %v1175_v9 = vpack.c.bf16 %v1158_v7, %v1157_v4  ;;  %2323 = vmatprep.subr.bf16.mxu0 %v8431_v6 }
 0x252   : > { %7742 = vmatprep.mubr.msk.bf16.mxu0 %vm919_vm2, %v1175_v9 }
 0x253   : > { %7743 = vmatmul.mubr.msk.bf16.gmra.mrb[76].mxu0 %vm919_vm2, %v1176_v8 }
 0x2ee   : > { %v7716_v14 = vpop.f32.mrb[48].mxu0 }
 0x2ef   : > { %v1307_v15 = vadd.f32 %v7716_v14, %v9073_v13  ;;  %v1298_v16 = vpop.f32.mrb[49].mxu0 }
 0x2f0   : > { %v1299_v17 = vadd.f32 %v9073_v13, %v1298_v16  ;;  %v7717_v18 = vpop.f32.mrb[50].mxu0  ;;  %v8429_v16 = vld [vmem:[#allocation2 + $0xa0] ss:$16 sps:$4 sm:$0xff]  }
 0x2f1   : > { %v1310_v21 = vadd.f32 %v7717_v18, %v9073_v13  ;;  %v1301_v22 = vpop.f32.mrb[51].mxu0  ;;  %v1427_v28 = vmax.f32 %v1307_v15, 0.0  ;;  %2324 = vmatpush1.bf16.msra.mxu0 %v8429_v16  ;;  %v8458_v16 = vld [vmem:[#allocation2 + $0x12c] ss:$16 sps:$4 sm:$0xff]  }
 0x2f2   : > { %v1302_v26 = vadd.f32 %v9073_v13, %v1301_v22  ;;  %v1425_v31 = vmax.f32 %v1299_v17, 0.0  ;;  %v8426_v22 = vld [vmem:[#allocation2 + $0x88] ss:$16 sps:$4 sm:$0xff]   ;;  %2325 = vmatprep.subr.bf16.mxu0 %v8437_v19  ;;  %v8459_v19 = vld [vmem:[#allocation2 + $0x140] ss:$16 sps:$4 sm:$0xff]  }
 0x2f3   : > { %v1428_v29 = vmax.f32 %v1310_v21, 0.0 }
 0x2f4   : > { %v1426_v32 = vmax.f32 %v1302_v26, 0.0 }
 0x2f5   : > { %v1458_v34 = vpack.c.bf16 %v1428_v29, %v1427_v28 }
 0x2f6   : > { %v1457_v36 = vpack.c.bf16 %v1426_v32, %v1425_v31  ;;  %v7720_v37 = vpop.f32.mrb[52].mxu0 }
 0x2f7   : > { %v1323_v39 = vadd.f32 %v7720_v37, %v9073_v13  ;;  %v1314_v40 = vpop.f32.mrb[53].mxu0 }
 0x2f8   : > { %v1315_v42 = vadd.f32 %v9073_v13, %v1314_v40  ;;  %v7721_v43 = vpop.f32.mrb[54].mxu0  ;;  %1614 = vmatmul.mubr.bf16.vlgmr.msra.gmra.mrb[16].mxu1 %v1457_v36 }
 0x2f9   : > { %v1431_v45 = vmax.f32 %v1323_v39, 0.0  ;;  %v1326_v46 = vadd.f32 %v7721_v43, %v9073_v13  ;;  %v1317_v47 = vpop.f32.mrb[55].mxu0  ;;  %1623 = vmatprep.mubr.bf16.mxu1 %v8646_v23  ;;  %2507 = vmatpush1.bf16.msra.mxu1 %v8402_v35 }
 0x2fa   : > { %v1429_v49 = vmax.f32 %v1315_v42, 0.0  ;;  %v1318_v50 = vadd.f32 %v9073_v13, %v1317_v47  ;;  %2508 = vmatprep.subr.bf16.mxu1 %v8410_v38  ;;  %v8432_v38 = vld [vmem:[#allocation2 + $0xa8] ss:$16 sps:$4 sm:$0xff]   ;;  %v8449_v47 = vld [vmem:[#allocation2 + $0x104] ss:$16 sps:$4 sm:$0xff]  }
 0x2fb   : > { %v1840_v52 = vmax.f32 %v1427_v28, %v1431_v45  ;;  %v1432_v53 = vmax.f32 %v1326_v46, 0.0  ;;  %v8434_v28 = vld [vmem:[#allocation2 + $0xac] ss:$16 sps:$4 sm:$0xff]  }
 0x2fc   : > { %v1838_v55 = vmax.f32 %v1425_v31, %v1429_v49  ;;  %v1430_v56 = vmax.f32 %v1318_v50, 0.0  ;;  %v8435_v31 = vld [vmem:[#allocation2 + $0xc0] ss:$16 sps:$4 sm:$0xff]   ;;  %v8438_v50 = vld [vmem:[#allocation2 + $0xc8] ss:$16 sps:$4 sm:$0xff]  }
 0x2fd   : > { %v9084_v58 = vpack.c.bf16 %v1432_v53, %v1431_v45  ;;  %v1841_v59 = vmax.f32 %v1428_v29, %v1432_v53  ;;  %2509 = vmatpush1.bf16.msra.mxu1 %v8408_v48  ;;  %2326 = vmatpush1.bf16.msra.mxu0 %v8435_v31 }
 0x2fe   : > { %v1459_v61 = vpack.c.bf16 %v1430_v56, %v1429_v49  ;;  %v1839_v62 = vmax.f32 %v1426_v32, %v1430_v56  ;;  %v7724_v63 = vpop.f32.mrb[56].mxu0  ;;  %2510 = vmatprep.subr.bf16.mxu1 %v8416_v51 }
 0x2ff   : > { %v1339_v1 = vadd.f32 %v7724_v63, %v9073_v13  ;;  %v1330_v2 = vpop.f32.mrb[57].mxu0 }
 0x300   : > { %v1331_v4 = vadd.f32 %v9073_v13, %v1330_v2  ;;  %v7725_v5 = vpop.f32.mrb[58].mxu0  ;;  %1624 = vmatmul.mubr.bf16.gmra.mrb[20].mxu1 %v1458_v34  ;;  %v8443_v34 = vld [vmem:[#allocation2 + $0xe4] ss:$16 sps:$4 sm:$0xff]  }
 0x301   : > { %v1435_v7 = vmax.f32 %v1339_v1, 0.0  ;;  %v1342_v8 = vadd.f32 %v7725_v5, %v9073_v13  ;;  %v1333_v9 = vpop.f32.mrb[59].mxu0  ;;  %1633 = vmatprep.mubr.bf16.mxu1 %v8646_v23  ;;  %2511 = vmatpush1.bf16.msra.mxu1 %v8414_v60  ;;  %v8444_v1 = vld [vmem:[#allocation2 + $0xe8] ss:$16 sps:$4 sm:$0xff]  }
 0x302   : > { %v1433_v11 = vmax.f32 %v1331_v4, 0.0  ;;  %v1334_v24 = vadd.f32 %v9073_v13, %v1333_v9  ;;  %2512 = vmatprep.subr.bf16.mxu1 %v8422_v0  ;;  %2327 = vmatprep.subr.bf16.mxu0 %v8443_v34  ;;  %v8452_v4 = vld [vmem:[#allocation2 + $0x10c] ss:$16 sps:$4 sm:$0xff]   ;;  %v8461_v9 = vld [vmem:[#allocation2 + $0x144] ss:$16 sps:$4 sm:$0xff]  }
 0x303   : > { %v1844_v14 = vmax.f32 %v1840_v52, %v1435_v7  ;;  %v1436_v15 = vmax.f32 %v1342_v8, 0.0  ;;  %2328 = vmatpush1.bf16.msra.mxu0 %v8441_v44 }
 0x304   : > { %v1842_v17 = vmax.f32 %v1838_v55, %v1433_v11  ;;  %v1434_v18 = vmax.f32 %v1334_v24, 0.0  ;;  %2329 = vmatprep.subr.bf16.mxu0 %v8449_v47  ;;  %v8450_v24 = vld [vmem:[#allocation2 + $0x108] ss:$16 sps:$4 sm:$0xff]  }
 0x305   : > { %v9091_v20 = vpack.c.bf16 %v1436_v15, %v1435_v7  ;;  %v1845_v21 = vmax.f32 %v1841_v59, %v1436_v15  ;;  %2513 = vmatpush1.bf16.msra.mxu1 %v8420_v10  ;;  %v8453_v7 = vld [vmem:[#allocation2 + $0x120] ss:$16 sps:$4 sm:$0xff]  }
 0x306   : > { %v9093_v25 = vpack.c.bf16 %v1434_v18, %v1433_v11  ;;  %v1843_v26 = vmax.f32 %v1839_v62, %v1434_v18  ;;  %v7728_v27 = vpop.f32.mrb[60].mxu0  ;;  %2514 = vmatprep.subr.bf16.mxu1 %v8428_v12 }
 0x307   : > { %v1355_v29 = vadd.f32 %v7728_v27, %v9073_v13  ;;  %v1346_v30 = vpop.f32.mrb[61].mxu0  ;;  %2330 = vmatpush1.bf16.msra.mxu0 %v8447_v57  ;;  %v8468_v57 = vld [vmem:[#allocation2 + $0x168] ss:$16 sps:$4 sm:$0xff]  }
 0x308   : > { %v1347_v32 = vadd.f32 %v9073_v13, %v1346_v30  ;;  %v7729_v33 = vpop.f32.mrb[62].mxu0  ;;  %1634 = vmatmul.mubr.bf16.gmra.mrb[24].mxu1 %v1459_v61  ;;  %v8455_v61 = vld [vmem:[#allocation2 + $0x124] ss:$16 sps:$4 sm:$0xff]   ;;  %v8456_v30 = vld [vmem:[#allocation2 + $0x128] ss:$16 sps:$4 sm:$0xff]  }
 0x309   : > { %v1439_v35 = vmax.f32 %v1355_v29, 0.0  ;;  %v1358_v36 = vadd.f32 %v7729_v33, %v9073_v13  ;;  %v1349_v37 = vpop.f32.mrb[63].mxu0  ;;  %1643 = vmatprep.mubr.bf16.mxu1 %v8646_v23  ;;  %2515 = vmatpush1.bf16.msra.mxu1 %v8426_v22  ;;  %v8464_v33 = vld [vmem:[#allocation2 + $0x14c] ss:$16 sps:$4 sm:$0xff]  }
 0x30a   : > { %v1437_v39 = vmax.f32 %v1347_v32, 0.0  ;;  %v1350_v40 = vadd.f32 %v9073_v13, %v1349_v37  ;;  %2516 = vmatprep.subr.bf16.mxu1 %v8434_v28  ;;  %2331 = vmatprep.subr.bf16.mxu0 %v8455_v61  ;;  %v8476_v61 = vld [vmem:[#allocation2 + $0x18c] ss:$16 sps:$4 sm:$0xff]  }
 0x30b   : > { %v1848_v42 = vmax.f32 %v1844_v14, %v1439_v35  ;;  %v1440_v43 = vmax.f32 %v1358_v36, 0.0  ;;  %2332 = vmatpush1.bf16.msra.mxu0 %v8453_v7  ;;  %v8465_v36 = vld [vmem:[#allocation2 + $0x160] ss:$16 sps:$4 sm:$0xff]  }
 0x30c   : > { %v1846_v45 = vmax.f32 %v1842_v17, %v1437_v39  ;;  %v1438_v46 = vmax.f32 %v1350_v40, 0.0  ;;  %2333 = vmatprep.subr.bf16.mxu0 %v8461_v9 }
 0x30d   : > { %v9100_v48 = vpack.c.bf16 %v1440_v43, %v1439_v35  ;;  %v1849_v49 = vmax.f32 %v1845_v21, %v1440_v43  ;;  %2517 = vmatpush1.bf16.msra.mxu1 %v8432_v38  ;;  %v8473_v38 = vld [vmem:[#allocation2 + $0x184] ss:$16 sps:$4 sm:$0xff]  }
 0x30e   : > { %v9102_v51 = vpack.c.bf16 %v1438_v46, %v1437_v39  ;;  %v1847_v52 = vmax.f32 %v1843_v26, %v1438_v46  ;;  %v7732_v53 = vpop.f32.mrb[64].mxu0  ;;  %2518 = vmatprep.subr.bf16.mxu1 %v8440_v41  ;;  %v8467_v26 = vld [vmem:[#allocation2 + $0x164] ss:$16 sps:$4 sm:$0xff]   ;;  %v8462_v41 = vld [vmem:[#allocation2 + $0x148] ss:$16 sps:$4 sm:$0xff]  }
 0x30f   : > { %v1371_v55 = vadd.f32 %v7732_v53, %v9073_v13  ;;  %v1362_v56 = vpop.f32.mrb[65].mxu0  ;;  %2334 = vmatpush1.bf16.msra.mxu0 %v8459_v19  ;;  %v8479_v53 = vld [vmem:[#allocation2 + $0x1a4] ss:$16 sps:$4 sm:$0xff]  }
 0x310   : > { %v1363_v59 = vadd.f32 %v9073_v13, %v1362_v56  ;;  %v7733_v60 = vpop.f32.mrb[66].mxu0  ;;  %1644 = vmatmul.mubr.bf16.gmra.mrb[28].mxu1 %v9084_v58  ;;  %2335 = vmatprep.subr.bf16.mxu0 %v8467_v26 }
 0x311   : > { %v1443_v62 = vmax.f32 %v1371_v55, 0.0  ;;  %v1374_v63 = vadd.f32 %v7733_v60, %v9073_v13  ;;  %v1365_v0 = vpop.f32.mrb[67].mxu0  ;;  %1653 = vmatprep.mubr.bf16.mxu1 %v8646_v23  ;;  %2519 = vmatpush1.bf16.msra.mxu1 %v8438_v50 }
 0x312   : > { %v1441_v2 = vmax.f32 %v1363_v59, 0.0  ;;  %v1366_v3 = vadd.f32 %v9073_v13, %v1365_v0  ;;  %2520 = vmatprep.subr.bf16.mxu1 %v8446_v54  ;;  %v8477_v0 = vld [vmem:[#allocation2 + $0x1a0] ss:$16 sps:$4 sm:$0xff]  }
 0x313   : > { %v1852_v5 = vmax.f32 %v1848_v42, %v1443_v62  ;;  %v1444_v6 = vmax.f32 %v1374_v63, 0.0  ;;  %2336 = vmatpush1.bf16.msra.mxu0 %v8465_v36  ;;  %v8494_v36 = vld [vmem:[#allocation2 + $0x1ec] ss:$16 sps:$4 sm:$0xff]  }
 0x314   : > { %v1850_v58 = vmax.f32 %v1846_v45, %v1441_v2  ;;  %v1442_v8 = vmax.f32 %v1366_v3, 0.0  ;;  %v8470_v45 = vld [vmem:[#allocation2 + $0x16c] ss:$16 sps:$4 sm:$0xff]   ;;  %2337 = vmatprep.subr.bf16.mxu0 %v8473_v38  ;;  %v2969_v38 = vld [vmem:[#allocation5 + $0x20] sm:$0xff] }
 0x315   : > { %v9110_v10 = vpack.c.bf16 %v1444_v6, %v1443_v62  ;;  %v1853_v11 = vmax.f32 %v1849_v49, %v1444_v6  ;;  %2521 = vmatpush1.bf16.msra.mxu1 %v8444_v1  ;;  %v8471_v49 = vld [vmem:[#allocation2 + $0x180] ss:$16 sps:$4 sm:$0xff]  }
 0x316   : > { %v9112_v12 = vpack.c.bf16 %v1442_v8, %v1441_v2  ;;  %v1851_v14 = vmax.f32 %v1847_v52, %v1442_v8  ;;  %v7736_v15 = vpop.f32.mrb[68].mxu0  ;;  %2522 = vmatprep.subr.bf16.mxu1 %v8452_v4  ;;  %v8474_v4 = vld [vmem:[#allocation2 + $0x188] ss:$16 sps:$4 sm:$0xff]  }
 0x317   : > { %v1387_v17 = vadd.f32 %v7736_v15, %v9073_v13  ;;  %v1378_v18 = vpop.f32.mrb[69].mxu0  ;;  %2338 = vmatpush1.bf16.msra.mxu0 %v8471_v49 }
 0x318   : > { %v1379_v21 = vadd.f32 %v9073_v13, %v1378_v18  ;;  %v7737_v22 = vpop.f32.mrb[70].mxu0  ;;  %1654 = vmatmul.mubr.bf16.gmra.mrb[32].mxu1 %v9093_v25  ;;  %2339 = vmatprep.subr.bf16.mxu0 %v8479_v53 }
 0x319   : > { %v1447_v27 = vmax.f32 %v1387_v17, 0.0  ;;  %v1390_v28 = vadd.f32 %v7737_v22, %v9073_v13  ;;  %v1381_v29 = vpop.f32.mrb[71].mxu0  ;;  %1663 = vmatprep.mubr.bf16.mxu1 %v8646_v23  ;;  %2523 = vmatpush1.bf16.msra.mxu1 %v8450_v24  ;;  %v8480_v17 = vld [vmem:[#allocation2 + $0x1a8] ss:$16 sps:$4 sm:$0xff]  }
 0x31a   : > { %v1445_v31 = vmax.f32 %v1379_v21, 0.0  ;;  %v1382_v32 = vadd.f32 %v9073_v13, %v1381_v29  ;;  %2524 = vmatprep.subr.bf16.mxu1 %v8458_v16 }
 0x31b   : > { %v1856_v34 = vmax.f32 %v1852_v5, %v1447_v27  ;;  %v1448_v35 = vmax.f32 %v1390_v28, 0.0  ;;  %2340 = vmatpush1.bf16.msra.mxu0 %v8477_v0 }
 0x31c   : > { %v1854_v25 = vmax.f32 %v1850_v58, %v1445_v31  ;;  %v1446_v37 = vmax.f32 %v1382_v32, 0.0  ;;  %v8482_v58 = vld [vmem:[#allocation2 + $0x1ac] ss:$16 sps:$4 sm:$0xff]  }
 0x31d   : > { %v9120_v39 = vpack.c.bf16 %v1448_v35, %v1447_v27  ;;  %v1857_v40 = vmax.f32 %v1853_v11, %v1448_v35  ;;  %2525 = vmatpush1.bf16.msra.mxu1 %v8456_v30  ;;  %v8483_v35 = vld [vmem:[#allocation2 + $0x1c0] ss:$16 sps:$4 sm:$0xff]  }
 0x31e   : > { %v9122_v42 = vpack.c.bf16 %v1446_v37, %v1445_v31  ;;  %v1855_v43 = vmax.f32 %v1851_v14, %v1446_v37  ;;  %v7740_v44 = vpop.f32.mrb[72].mxu0  ;;  %2526 = vmatprep.subr.bf16.mxu1 %v8464_v33  ;;  %v2965_v37 = vld [vmem:[#allocation5] sm:$0xff] }
 0x31f   : > { %v1403_v46 = vadd.f32 %v7740_v44, %v9073_v13  ;;  %v1394_v47 = vpop.f32.mrb[73].mxu0 }
 0x320   : > { %v1395_v50 = vadd.f32 %v9073_v13, %v1394_v47  ;;  %v7741_v52 = vpop.f32.mrb[74].mxu0  ;;  %1664 = vmatmul.mubr.bf16.gmra.mrb[36].mxu1 %v9091_v20 }
 0x321   : > { %v1451_v54 = vmax.f32 %v1403_v46, 0.0  ;;  %v1406_v55 = vadd.f32 %v7741_v52, %v9073_v13  ;;  %v1397_v56 = vpop.f32.mrb[75].mxu0  ;;  %1673 = vmatprep.mubr.bf16.mxu1 %v8646_v23  ;;  %2527 = vmatpush1.bf16.msra.mxu1 %v8462_v41  ;;  %v2970_v41 = vld [vmem:[#allocation5 + $0x28] sm:$0xff] }
 0x322   : > { %v1449_v59 = vmax.f32 %v1395_v50, 0.0  ;;  %v1398_v60 = vadd.f32 %v9073_v13, %v1397_v56  ;;  %2528 = vmatprep.subr.bf16.mxu1 %v8470_v45 }
 0x323   : > { %v1860_v62 = vmax.f32 %v1856_v34, %v1451_v54  ;;  %v1452_v63 = vmax.f32 %v1406_v55, 0.0  ;;  %v8488_v34 = vld [vmem:[#allocation2 + $0x1cc] ss:$16 sps:$4 sm:$0xff]  }
 0x324   : > { %v1858_v20 = vmax.f32 %v1854_v25, %v1449_v59  ;;  %v1450_v1 = vmax.f32 %v1398_v60, 0.0  ;;  %v8492_v25 = vld [vmem:[#allocation2 + $0x1e8] ss:$16 sps:$4 sm:$0xff]  }
 0x325   : > { %v9130_v2 = vpack.c.bf16 %v1452_v63, %v1451_v54  ;;  %v1861_v3 = vmax.f32 %v1857_v40, %v1452_v63  ;;  %2529 = vmatpush1.bf16.msra.mxu1 %v8468_v57  ;;  %v7316_v40 = vcombine.high %v2965_v37, %v2969_v38 }
 0x326   : > { %v1469_v5 = vpack.c.bf16 %v1450_v1, %v1449_v59  ;;  %v1859_v6 = vmax.f32 %v1855_v43, %v1450_v1  ;;  %v7744_v7 = vpop.f32.mrb[76].mxu0  ;;  %2530 = vmatprep.subr.bf16.mxu1 %v8476_v61  ;;  %v10662_v43 = vlaneseq  ;;  %v2974_v1 = vld [vmem:[#allocation5 + $0x48] sm:$0xff] }
 0x327   : > { %v1419_v8 = vadd.f32 %v7744_v7, %v9073_v13  ;;  %v1410_v9 = vpop.f32.mrb[77].mxu0 }
 0x328   : > { %v1411_v11 = vadd.f32 %v9073_v13, %v1410_v9  ;;  %v7745_v24 = vpop.f32.mrb[78].mxu0  ;;  %1674 = vmatmul.mubr.bf16.gmra.mrb[40].mxu1 %v9102_v51  ;;  %v9155_v44 = vshrl.u32 %v10662_v43, 7  ;;  %v9410_v43 = vld [vmem:[#allocation5 + $0x688] sm:$0xff] }
 0x329   : > { %v1455_v14 = vmax.f32 %v1419_v8, 0.0  ;;  %v1422_v15 = vadd.f32 %v7745_v24, %v9073_v13  ;;  %v1413_v16 = vpop.f32.mrb[79].mxu0  ;;  %1683 = vmatprep.mubr.bf16.mxu1 %v8646_v23  ;;  %2531 = vmatpush1.bf16.msra.mxu1 %v8474_v4  ;;  %v2981_v24 = vld [vmem:[#allocation5 + $0x80] sm:$0xff]  ;;  %10798 = vst [vmem:[#allocation33_spill] sm:$0xff] %v9410_v43 }
 0x32a   : > { %v1453_v18 = vmax.f32 %v1411_v11, 0.0  ;;  %v1414_v19 = vadd.f32 %v9073_v13, %v1413_v16  ;;  %2532 = vmatprep.subr.bf16.mxu1 %v8482_v58  ;;  %v8485_v13 = vld [vmem:[#allocation2 + $0x1c4] ss:$16 sps:$4 sm:$0xff]   ;;  %10784 = vst [vmem:[#allocation19_spill] sm:$0xff] %v9155_v44  ;;  %v9158_v45 = vsub.s32 0, %v9155_v44  ;;  %v9164_v46 = vsub.s32 1, %v9155_v44 }
 0x32b   : > { %v1864_v21 = vmax.f32 %v1860_v62, %v1455_v14  ;;  %v1456_v22 = vmax.f32 %v1422_v15, 0.0  ;;  %2341 = vmatprep.subr.bf16.mxu0 %v8485_v13  ;;  %v2973_v62 = vld [vmem:[#allocation5 + $0x40] sm:$0xff] }
 0x32c   : > { %v1862_v26 = vmax.f32 %v1858_v20, %v1453_v18  ;;  %v1454_v27 = vmax.f32 %v1414_v19, 0.0  ;;  %2342 = vmatpush1.bf16.msra.mxu0 %v8483_v35  ;;  %10785 = vst [vmem:[#allocation20_spill] sm:$0xff] %v9158_v45  ;;  %10786 = vst [vmem:[#allocation21_spill] sm:$0xff] %v9164_v46  ;;  %v2977_v20 = vld [vmem:[#allocation5 + $0x60] sm:$0xff] }
 0x32d   : > { %v1472_v28 = vpack.c.bf16 %v1456_v22, %v1455_v14  ;;  %v1865_v29 = vmax.f32 %v1861_v3, %v1456_v22  ;;  %2533 = vmatpush1.bf16.msra.mxu1 %v8480_v17  ;;  %v7324_v9 = vcombine.high %v2973_v62, %v2977_v20  ;;  %v2985_v16 = vld [vmem:[#allocation5 + $0xa0] sm:$0xff]  ;;  %v2982_v17 = vld [vmem:[#allocation5 + $0x88] sm:$0xff] }
 0x32e   : > { %v1471_v51 = vpack.c.bf16 %v1454_v27, %v1453_v18  ;;  %v1863_v30 = vmax.f32 %v1859_v6, %v1454_v27  ;;  %2534 = vmatprep.subr.bf16.mxu1 %v8488_v34  ;;  %v7315_v6 = vcombine.low %v2965_v37, %v2969_v38  ;;  %v2986_v18 = vld [vmem:[#allocation5 + $0xa8] sm:$0xff] }
 0x32f   : > { %v1867_v31 = vmax.f32 %v1864_v21, %v1865_v29  ;;  %v7333_v37 = vcombine.low %v2982_v17, %v2986_v18 }
 0x330   : > { %v1866_v32 = vmax.f32 %v1862_v26, %v1863_v30  ;;  %1684 = vmatmul.mubr.bf16.gmra.mrb[44].mxu1 %v9100_v48  ;;  %v8486_v48 = vld [vmem:[#allocation2 + $0x1c8] ss:$16 sps:$4 sm:$0xff]  }
 0x331   : > { %1693 = vmatprep.mubr.bf16.mxu1 %v8646_v23  ;;  %2535 = vmatpush1.bf16.msra.mxu1 %v8486_v48 }
 0x332   : > { %v9140_v33 = vmax.f32 %v1866_v32, %v1867_v31  ;;  %2536 = vmatprep.subr.bf16.mxu1 %v8494_v36  ;;  %v7332_v31 = vcombine.high %v2981_v24, %v2985_v16  ;;  %v7334_v32 = vcombine.high %v2982_v17, %v2986_v18  ;;  %v3010_v17 = vld [vmem:[#allocation5 + $0x168] sm:$0xff] }
 0x335   : > { %2537 = vmatpush1.bf16.msra.mxu1 %v8492_v25 }
 0x338   : > { %1694 = vmatmul.mubr.bf16.gmra.mrb[48].mxu1 %v9112_v12  ;;  %v8491_v12 = vld [vmem:[#allocation2 + $0x1e4] ss:$16 sps:$4 sm:$0xff]  }
 0x339   : > { %1703 = vmatprep.mubr.bf16.mxu1 %v8646_v23  ;;  %2343 = vmatprep.subr.bf16.mxu0 %v8491_v12  ;;  %v7331_v12 = vcombine.low %v2981_v24, %v2985_v16  ;;  %v3006_v16 = vld [vmem:[#allocation5 + $0x148] sm:$0xff] }
 0x340   : > { %1704 = vmatmul.mubr.bf16.gmra.mrb[52].mxu1 %v9110_v10  ;;  %v8489_v10 = vld [vmem:[#allocation2 + $0x1e0] ss:$16 sps:$4 sm:$0xff]  }
 0x341   : > { %1713 = vmatprep.mubr.bf16.mxu1 %v8646_v23  ;;  %2344 = vmatpush1.bf16.msra.mxu0 %v8489_v10 }
 0x342   : > { %4543 = vmatprep.subr.bf16.mxu0 %v7316_v40 }
 0x348   : > { %1714 = vmatmul.mubr.bf16.gmra.mrb[56].mxu1 %v9122_v42 }
 0x349   : > { %1723 = vmatprep.mubr.bf16.mxu1 %v8646_v23 }
 0x350   : > { %1724 = vmatmul.mubr.bf16.gmra.mrb[60].mxu1 %v9120_v39  ;;  %v2966_v39 = vld [vmem:[#allocation5 + $0x8] sm:$0xff] }
 0x351   : > { %1733 = vmatprep.mubr.bf16.mxu1 %v8646_v23  ;;  %v7318_v42 = vcombine.high %v2966_v39, %v2970_v41  ;;  %v7317_v7 = vcombine.low %v2966_v39, %v2970_v41 }
 0x353   : > { %4929 = vmatprep.subr.bf16.mxu1 %v7318_v42 }
 0x358   : > { %1734 = vmatmul.mubr.bf16.gmra.mrb[64].mxu1 %v1469_v5 }
 0x359   : > { %1743 = vmatprep.mubr.bf16.mxu1 %v8646_v23 }
 0x360   : > { %1744 = vmatmul.mubr.bf16.gmra.mrb[68].mxu1 %v9130_v2  ;;  %v2978_v2 = vld [vmem:[#allocation5 + $0x68] sm:$0xff] }
 0x361   : > { %1753 = vmatprep.mubr.bf16.mxu1 %v8646_v23  ;;  %v7326_v11 = vcombine.high %v2974_v1, %v2978_v2  ;;  %v7325_v29 = vcombine.low %v2974_v1, %v2978_v2 }
 0x368   : > { %1754 = vmatmul.mubr.bf16.gmra.mrb[72].mxu1 %v1471_v51 }
 0x369   : > { %1763 = vmatprep.mubr.bf16.mxu1 %v8646_v23  ;;  %v1489_v23 = vld [vmem:[%s10640_s8] sm:$0x3] }
 0x36a   : > { %v9167_v47 = vrot.slane %v1489_v23, %v9158_v45  ;;  %v9170_v49 = vrot.slane %v1489_v23, %v9164_v46 }
 0x370   : > { %1764 = vmatmul.mubr.bf16.gmra.mrb[76].mxu1 %v1472_v28  ;;  %v7323_v28 = vcombine.low %v2973_v62, %v2977_v20  ;;  %v2994_v62 = vld [vmem:[#allocation5 + $0xe8] sm:$0xff] }
 0x3cb   : > { %v1615_v50 = vpop.f32.mrb[16].mxu1 }
 0x3cc   : > { %v1616_v52 = vadd.f32 %v1615_v50, %v9167_v47  ;;  %v1617_v53 = vpop.f32.mrb[17].mxu1 }
 0x3cd   : > { %v1618_v54 = vadd.f32 %v1617_v53, %v9170_v49  ;;  %v1619_v55 = vpop.f32.mrb[18].mxu1 }
 0x3ce   : > { %v1620_v56 = vadd.f32 %v1619_v55, %v9167_v47  ;;  %v1621_v57 = vpop.f32.mrb[19].mxu1  ;;  %v1774_v60 = vmax.f32 %v1616_v52, 0.0  ;;  %v2993_v55 = vld [vmem:[#allocation5 + $0xe0] sm:$0xff] }
 0x3cf   : > { %v1622_v59 = vadd.f32 %v1621_v57, %v9170_v49  ;;  %v1775_v63 = vmax.f32 %v1618_v54, 0.0  ;;  %v2989_v54 = vld [vmem:[#allocation5 + $0xc0] sm:$0xff] }
 0x3d0   : > { %v1776_v61 = vmax.f32 %v1620_v56, 0.0  ;;  %v2990_v56 = vld [vmem:[#allocation5 + $0xc8] sm:$0xff] }
 0x3d1   : > { %v1777_v0 = vmax.f32 %v1622_v59, 0.0  ;;  %v7341_v2 = vcombine.low %v2990_v56, %v2994_v62 }
 0x3d2   : > { %v1875_v3 = vpack.c.bf16 %v1776_v61, %v1774_v60 }
 0x3d3   : > { %v1876_v4 = vpack.c.bf16 %v1777_v0, %v1775_v63  ;;  %v1625_v5 = vpop.f32.mrb[20].mxu1 }
 0x3d4   : > { %v1626_v58 = vadd.f32 %v1625_v5, %v9167_v47  ;;  %v1627_v8 = vpop.f32.mrb[21].mxu1  ;;  %v3002_v5 = vld [vmem:[#allocation5 + $0x128] sm:$0xff] }
 0x3d5   : > { %v1628_v14 = vadd.f32 %v1627_v8, %v9170_v49  ;;  %v1629_v15 = vpop.f32.mrb[22].mxu1  ;;  %2345 = vmatprep.mubr.bf16.mxu0 %v1876_v4  ;;  %2538 = vmatprep.mubr.bf16.mxu1 %v1876_v4  ;;  %v2998_v4 = vld [vmem:[#allocation5 + $0x108] sm:$0xff]  ;;  %v3005_v8 = vld [vmem:[#allocation5 + $0x140] sm:$0xff] }
 0x3d6   : > { %v1778_v19 = vmax.f32 %v1626_v58, 0.0  ;;  %v1630_v21 = vadd.f32 %v1629_v15, %v9167_v47  ;;  %v1631_v22 = vpop.f32.mrb[23].mxu1  ;;  %2346 = vmatmul.mubr.bf16.vlgmr.msra.gmra.mrb[80].mxu0 %v1875_v3  ;;  %2539 = vmatmul.mubr.bf16.vlgmr.msra.gmra.mrb[80].mxu1 %v1875_v3  ;;  %v7342_v3 = vcombine.high %v2990_v56, %v2994_v62 }
 0x3d7   : > { %v1779_v26 = vmax.f32 %v1628_v14, 0.0  ;;  %v1632_v27 = vadd.f32 %v1631_v22, %v9170_v49  ;;  %4544 = vmatpush1.bf16.msra.mxu0 %v7315_v6  ;;  %4930 = vmatpush1.bf16.msra.mxu1 %v7317_v7  ;;  %v7350_v22 = vcombine.high %v2998_v4, %v3002_v5 }
 0x3d8   : > { %v2827_v51 = vmax.f32 %v1774_v60, %v1778_v19  ;;  %v1780_v30 = vmax.f32 %v1630_v21, 0.0  ;;  %4545 = vmatprep.subr.bf16.mxu0 %v7324_v9  ;;  %4931 = vmatprep.subr.bf16.mxu1 %v7326_v11  ;;  %v7339_v60 = vcombine.low %v2989_v54, %v2993_v55  ;;  %v3009_v9 = vld [vmem:[#allocation5 + $0x160] sm:$0xff]  ;;  %v7349_v21 = vcombine.low %v2998_v4, %v3002_v5 }
 0x3d9   : > { %v2864_v13 = vmax.f32 %v1775_v63, %v1779_v26  ;;  %v1781_v34 = vmax.f32 %v1632_v27, 0.0  ;;  %v2997_v63 = vld [vmem:[#allocation5 + $0x100] sm:$0xff] }
 0x3da   : > { %v1877_v35 = vpack.c.bf16 %v1780_v30, %v1778_v19  ;;  %v2828_v48 = vmax.f32 %v1776_v61, %v1780_v30  ;;  %v7340_v61 = vcombine.high %v2989_v54, %v2993_v55 }
 0x3db   : > { %v1878_v36 = vpack.c.bf16 %v1781_v34, %v1779_v26  ;;  %v2865_v10 = vmax.f32 %v1777_v0, %v1781_v34  ;;  %v1635_v25 = vpop.f32.mrb[24].mxu1  ;;  %4546 = vmatpush1.bf16.msra.mxu0 %v7323_v28  ;;  %4932 = vmatpush1.bf16.msra.mxu1 %v7325_v29  ;;  %v3001_v0 = vld [vmem:[#allocation5 + $0x120] sm:$0xff]  ;;  %v7356_v28 = vcombine.high %v3005_v8, %v3009_v9 }
 0x3dc   : > { %v1636_v38 = vadd.f32 %v1635_v25, %v9167_v47  ;;  %v1637_v39 = vpop.f32.mrb[25].mxu1  ;;  %4547 = vmatprep.subr.bf16.mxu0 %v7332_v31  ;;  %4933 = vmatprep.subr.bf16.mxu1 %v7334_v32  ;;  %v7348_v58 = vcombine.high %v2997_v63, %v3001_v0  ;;  %v7347_v15 = vcombine.low %v2997_v63, %v3001_v0  ;;  %v3013_v29 = vld [vmem:[#allocation5 + $0x180] sm:$0xff] }
 0x3dd   : > { %v1638_v40 = vadd.f32 %v1637_v39, %v9170_v49  ;;  %v1639_v41 = vpop.f32.mrb[26].mxu1  ;;  %2355 = vmatprep.mubr.bf16.mxu0 %v1878_v36  ;;  %2548 = vmatprep.mubr.bf16.mxu1 %v1878_v36 }
 0x3de   : > { %v1782_v42 = vmax.f32 %v1636_v38, 0.0  ;;  %v1640_v23 = vadd.f32 %v1639_v41, %v9167_v47  ;;  %v1641_v50 = vpop.f32.mrb[27].mxu1  ;;  %2356 = vmatmul.mubr.bf16.gmra.mrb[84].mxu0 %v1877_v35  ;;  %2549 = vmatmul.mubr.bf16.gmra.mrb[84].mxu1 %v1877_v35  ;;  %v3018_v38 = vld [vmem:[#allocation5 + $0x1a8] sm:$0xff]  ;;  %v3021_v41 = vld [vmem:[#allocation5 + $0x1c0] sm:$0xff] }
 0x3df   : > { %v1783_v52 = vmax.f32 %v1638_v40, 0.0  ;;  %v1642_v53 = vadd.f32 %v1641_v50, %v9170_v49  ;;  %4548 = vmatpush1.bf16.msra.mxu0 %v7331_v12  ;;  %4934 = vmatpush1.bf16.msra.mxu1 %v7333_v37  ;;  %v3014_v37 = vld [vmem:[#allocation5 + $0x188] sm:$0xff] }
 0x3e0   : > { %v2829_v57 = vmax.f32 %v2827_v51, %v1782_v42  ;;  %v1784_v59 = vmax.f32 %v1640_v23, 0.0  ;;  %4549 = vmatprep.subr.bf16.mxu0 %v7340_v61  ;;  %4935 = vmatprep.subr.bf16.mxu1 %v7342_v3  ;;  %v3017_v51 = vld [vmem:[#allocation5 + $0x1a0] sm:$0xff]  ;;  %v7365_v62 = vcombine.low %v3014_v37, %v3018_v38 }
 0x3e1   : > { %v2866_v20 = vmax.f32 %v2864_v13, %v1783_v52  ;;  %v1785_v1 = vmax.f32 %v1642_v53, 0.0  ;;  %v7358_v13 = vcombine.high %v3006_v16, %v3010_v17  ;;  %v7364_v25 = vcombine.high %v3013_v29, %v3017_v51  ;;  %v3026_v53 = vld [vmem:[#allocation5 + $0x1e8] sm:$0xff]  ;;  %v3033_v3 = vld [vmem:[#allocation5 + $0x220] sm:$0xff] }
 0x3e2   : > { %v1879_v6 = vpack.c.bf16 %v1784_v59, %v1782_v42  ;;  %v2830_v7 = vmax.f32 %v2828_v48, %v1784_v59  ;;  %v7355_v48 = vcombine.low %v3005_v8, %v3009_v9  ;;  %v3025_v42 = vld [vmem:[#allocation5 + $0x1e0] sm:$0xff]  ;;  %v7366_v59 = vcombine.high %v3014_v37, %v3018_v38 }
 0x3e3   : > { %v1880_v11 = vpack.c.bf16 %v1785_v1, %v1783_v52  ;;  %v2867_v24 = vmax.f32 %v2865_v10, %v1785_v1  ;;  %v1645_v14 = vpop.f32.mrb[28].mxu1  ;;  %4550 = vmatpush1.bf16.msra.mxu0 %v7339_v60  ;;  %4936 = vmatpush1.bf16.msra.mxu1 %v7341_v2  ;;  %v7357_v10 = vcombine.low %v3006_v16, %v3010_v17  ;;  %v3022_v52 = vld [vmem:[#allocation5 + $0x1c8] sm:$0xff]  ;;  %v3029_v2 = vld [vmem:[#allocation5 + $0x200] sm:$0xff] }
 0x3e4   : > { %v1646_v18 = vadd.f32 %v1645_v14, %v9167_v47  ;;  %v1647_v19 = vpop.f32.mrb[29].mxu1  ;;  %4551 = vmatprep.subr.bf16.mxu0 %v7348_v58  ;;  %4937 = vmatprep.subr.bf16.mxu1 %v7350_v22  ;;  %v7372_v63 = vcombine.high %v3021_v41, %v3025_v42  ;;  %v7374_v1 = vcombine.high %v3022_v52, %v3026_v53  ;;  %v3034_v16 = vld [vmem:[#allocation5 + $0x228] sm:$0xff]  ;;  %v3049_v37 = vld [vmem:[#allocation5 + $0x2a0] sm:$0xff] }
 0x3e5   : > { %v1648_v26 = vadd.f32 %v1647_v19, %v9170_v49  ;;  %v1649_v27 = vpop.f32.mrb[30].mxu1  ;;  %2365 = vmatprep.mubr.bf16.mxu0 %v1880_v11  ;;  %2558 = vmatprep.mubr.bf16.mxu1 %v1880_v11  ;;  %v7371_v8 = vcombine.low %v3021_v41, %v3025_v42  ;;  %v7380_v14 = vcombine.high %v3029_v2, %v3033_v3  ;;  %v3037_v19 = vld [vmem:[#allocation5 + $0x240] sm:$0xff] }
 0x3e6   : > { %v1786_v30 = vmax.f32 %v1646_v18, 0.0  ;;  %v1650_v31 = vadd.f32 %v1649_v27, %v9167_v47  ;;  %v1651_v32 = vpop.f32.mrb[31].mxu1  ;;  %2366 = vmatmul.mubr.bf16.gmra.mrb[88].mxu0 %v1879_v6  ;;  %2559 = vmatmul.mubr.bf16.gmra.mrb[88].mxu1 %v1879_v6  ;;  %v3038_v27 = vld [vmem:[#allocation5 + $0x248] sm:$0xff] }
 0x3e7   : > { %v1787_v34 = vmax.f32 %v1648_v26, 0.0  ;;  %v1652_v35 = vadd.f32 %v1651_v32, %v9170_v49  ;;  %4552 = vmatpush1.bf16.msra.mxu0 %v7347_v15  ;;  %4938 = vmatpush1.bf16.msra.mxu1 %v7349_v21  ;;  %v3030_v15 = vld [vmem:[#allocation5 + $0x208] sm:$0xff]  ;;  %v3041_v21 = vld [vmem:[#allocation5 + $0x260] sm:$0xff] }
 0x3e8   : > { %v2831_v12 = vmax.f32 %v2829_v57, %v1786_v30  ;;  %v1788_v36 = vmax.f32 %v1650_v31, 0.0  ;;  %4553 = vmatprep.subr.bf16.mxu0 %v7356_v28  ;;  %4939 = vmatprep.subr.bf16.mxu1 %v7358_v13  ;;  %v7363_v57 = vcombine.low %v3013_v29, %v3017_v51  ;;  %v3042_v28 = vld [vmem:[#allocation5 + $0x268] sm:$0xff]  ;;  %v7379_v31 = vcombine.low %v3029_v2, %v3033_v3 }
 0x3e9   : > { %v2868_v39 = vmax.f32 %v2866_v20, %v1787_v34  ;;  %v1789_v40 = vmax.f32 %v1652_v35, 0.0  ;;  %v7382_v32 = vcombine.high %v3030_v15, %v3034_v16  ;;  %v7381_v35 = vcombine.low %v3030_v15, %v3034_v16  ;;  %v3065_v15 = vld [vmem:[#allocation5 + $0x320] sm:$0xff] }
 0x3ea   : > { %v1881_v23 = vpack.c.bf16 %v1788_v36, %v1786_v30  ;;  %v2832_v50 = vmax.f32 %v2830_v7, %v1788_v36 }
 0x3eb   : > { %v1882_v54 = vpack.c.bf16 %v1789_v40, %v1787_v34  ;;  %v2869_v55 = vmax.f32 %v2867_v24, %v1789_v40  ;;  %v1655_v56 = vpop.f32.mrb[32].mxu1  ;;  %4554 = vmatpush1.bf16.msra.mxu0 %v7355_v48  ;;  %4940 = vmatpush1.bf16.msra.mxu1 %v7357_v10  ;;  %v7373_v24 = vcombine.low %v3022_v52, %v3026_v53 }
 0x3ec   : > { %v1656_v60 = vadd.f32 %v1655_v56, %v9167_v47  ;;  %v1657_v61 = vpop.f32.mrb[33].mxu1  ;;  %4555 = vmatprep.subr.bf16.mxu0 %v7364_v25  ;;  %4941 = vmatprep.subr.bf16.mxu1 %v7366_v59  ;;  %v7388_v48 = vcombine.high %v3037_v19, %v3041_v21  ;;  %v7390_v10 = vcombine.high %v3038_v27, %v3042_v28  ;;  %v3045_v25 = vld [vmem:[#allocation5 + $0x280] sm:$0xff]  ;;  %v3050_v56 = vld [vmem:[#allocation5 + $0x2a8] sm:$0xff] }
 0x3ed   : > { %v1658_v0 = vadd.f32 %v1657_v61, %v9170_v49  ;;  %v1659_v20 = vpop.f32.mrb[34].mxu1  ;;  %2375 = vmatprep.mubr.bf16.mxu0 %v1882_v54  ;;  %2568 = vmatprep.mubr.bf16.mxu1 %v1882_v54  ;;  %v7389_v53 = vcombine.low %v3038_v27, %v3042_v28  ;;  %v7396_v54 = vcombine.high %v3045_v25, %v3049_v37  ;;  %v3057_v61 = vld [vmem:[#allocation5 + $0x2e0] sm:$0xff] }
 0x3ee   : > { %v1790_v4 = vmax.f32 %v1656_v60, 0.0  ;;  %v1660_v5 = vadd.f32 %v1659_v20, %v9167_v47  ;;  %v1661_v6 = vpop.f32.mrb[35].mxu1  ;;  %2376 = vmatmul.mubr.bf16.gmra.mrb[92].mxu0 %v1881_v23  ;;  %2569 = vmatmul.mubr.bf16.gmra.mrb[92].mxu1 %v1881_v23  ;;  %v7387_v23 = vcombine.low %v3037_v19, %v3041_v21  ;;  %v3053_v60 = vld [vmem:[#allocation5 + $0x2c0] sm:$0xff]  ;;  %v3058_v20 = vld [vmem:[#allocation5 + $0x2e8] sm:$0xff] }
 0x3ef   : > { %v1791_v7 = vmax.f32 %v1658_v0, 0.0  ;;  %v1662_v58 = vadd.f32 %v1661_v6, %v9170_v49  ;;  %4556 = vmatpush1.bf16.msra.mxu0 %v7363_v57  ;;  %4942 = vmatpush1.bf16.msra.mxu1 %v7365_v62  ;;  %v3054_v0 = vld [vmem:[#allocation5 + $0x2c8] sm:$0xff] }
 0x3f0   : > { %v2833_v9 = vmax.f32 %v2831_v12, %v1790_v4  ;;  %v1792_v11 = vmax.f32 %v1660_v5, 0.0  ;;  %4557 = vmatprep.subr.bf16.mxu0 %v7372_v63  ;;  %4943 = vmatprep.subr.bf16.mxu1 %v7374_v1  ;;  %v7405_v28 = vcombine.low %v3054_v0, %v3058_v20 }
 0x3f1   : > { %v2870_v17 = vmax.f32 %v2868_v39, %v1791_v7  ;;  %v1793_v18 = vmax.f32 %v1662_v58, 0.0 }
 0x3f2   : > { %v1883_v22 = vpack.c.bf16 %v1792_v11, %v1790_v4  ;;  %v2834_v26 = vmax.f32 %v2832_v50, %v1792_v11  ;;  %v7395_v4 = vcombine.low %v3045_v25, %v3049_v37 }
 0x3f3   : > { %v1884_v29 = vpack.c.bf16 %v1793_v18, %v1791_v7  ;;  %v2871_v51 = vmax.f32 %v2869_v55, %v1793_v18  ;;  %v1665_v30 = vpop.f32.mrb[36].mxu1  ;;  %4558 = vmatpush1.bf16.msra.mxu0 %v7371_v8  ;;  %4944 = vmatpush1.bf16.msra.mxu1 %v7373_v24  ;;  %v3046_v55 = vld [vmem:[#allocation5 + $0x288] sm:$0xff]  ;;  %v7404_v8 = vcombine.high %v3053_v60, %v3057_v61 }
 0x3f4   : > { %v1666_v13 = vadd.f32 %v1665_v30, %v9167_v47  ;;  %v1667_v34 = vpop.f32.mrb[37].mxu1  ;;  %4559 = vmatprep.subr.bf16.mxu0 %v7380_v14  ;;  %4945 = vmatprep.subr.bf16.mxu1 %v7382_v32  ;;  %v7398_v5 = vcombine.high %v3046_v55, %v3050_v56  ;;  %v7397_v58 = vcombine.low %v3046_v55, %v3050_v56  ;;  %v3061_v14 = vld [vmem:[#allocation5 + $0x300] sm:$0xff]  ;;  %v3066_v30 = vld [vmem:[#allocation5 + $0x328] sm:$0xff] }
 0x3f5   : > { %v1668_v12 = vadd.f32 %v1667_v34, %v9170_v49  ;;  %v1669_v36 = vpop.f32.mrb[38].mxu1  ;;  %2385 = vmatprep.mubr.bf16.mxu0 %v1884_v29  ;;  %2578 = vmatprep.mubr.bf16.mxu1 %v1884_v29  ;;  %v7406_v24 = vcombine.high %v3054_v0, %v3058_v20  ;;  %v7412_v29 = vcombine.high %v3061_v14, %v3065_v15  ;;  %v3073_v34 = vld [vmem:[#allocation5 + $0x360] sm:$0xff] }
 0x3f6   : > { %v1794_v38 = vmax.f32 %v1666_v13, 0.0  ;;  %v1670_v39 = vadd.f32 %v1669_v36, %v9167_v47  ;;  %v1671_v40 = vpop.f32.mrb[39].mxu1  ;;  %2386 = vmatmul.mubr.bf16.gmra.mrb[96].mxu0 %v1883_v22  ;;  %2579 = vmatmul.mubr.bf16.gmra.mrb[96].mxu1 %v1883_v22  ;;  %v7403_v22 = vcombine.low %v3053_v60, %v3057_v61  ;;  %v3069_v13 = vld [vmem:[#allocation5 + $0x340] sm:$0xff]  ;;  %v3074_v36 = vld [vmem:[#allocation5 + $0x368] sm:$0xff] }
 0x3f7   : > { %v1795_v41 = vmax.f32 %v1668_v12, 0.0  ;;  %v1672_v42 = vadd.f32 %v1671_v40, %v9170_v49  ;;  %4560 = vmatpush1.bf16.msra.mxu0 %v7379_v31  ;;  %4946 = vmatpush1.bf16.msra.mxu1 %v7381_v35  ;;  %v3070_v12 = vld [vmem:[#allocation5 + $0x348] sm:$0xff]  ;;  %v3081_v55 = vld [vmem:[#allocation5 + $0x3a0] sm:$0xff] }
 0x3f8   : > { %v2835_v50 = vmax.f32 %v2833_v9, %v1794_v38  ;;  %v1796_v52 = vmax.f32 %v1670_v39, 0.0  ;;  %4561 = vmatprep.subr.bf16.mxu0 %v7388_v48  ;;  %4947 = vmatprep.subr.bf16.mxu1 %v7390_v10  ;;  %v7421_v20 = vcombine.low %v3070_v12, %v3074_v36 }
 0x3f9   : > { %v2872_v57 = vmax.f32 %v2870_v17, %v1795_v41  ;;  %v1797_v59 = vmax.f32 %v1672_v42, 0.0 }
 0x3fa   : > { %v1885_v62 = vpack.c.bf16 %v1796_v52, %v1794_v38  ;;  %v2836_v63 = vmax.f32 %v2834_v26, %v1796_v52  ;;  %v7411_v38 = vcombine.low %v3061_v14, %v3065_v15 }
 0x3fb   : > { %v1886_v1 = vpack.c.bf16 %v1797_v59, %v1795_v41  ;;  %v2873_v2 = vmax.f32 %v2871_v51, %v1797_v59  ;;  %v1675_v3 = vpop.f32.mrb[40].mxu1  ;;  %4562 = vmatpush1.bf16.msra.mxu0 %v7387_v23  ;;  %4948 = vmatpush1.bf16.msra.mxu1 %v7389_v53  ;;  %v3062_v51 = vld [vmem:[#allocation5 + $0x308] sm:$0xff]  ;;  %v7420_v23 = vcombine.high %v3069_v13, %v3073_v34 }
 0x3fc   : > { %v1676_v6 = vadd.f32 %v1675_v3, %v9167_v47  ;;  %v1677_v7 = vpop.f32.mrb[41].mxu1  ;;  %4563 = vmatprep.subr.bf16.mxu0 %v7396_v54  ;;  %4949 = vmatprep.subr.bf16.mxu1 %v7398_v5  ;;  %v7414_v39 = vcombine.high %v3062_v51, %v3066_v30  ;;  %v7413_v42 = vcombine.low %v3062_v51, %v3066_v30  ;;  %v3077_v54 = vld [vmem:[#allocation5 + $0x380] sm:$0xff]  ;;  %v3082_v3 = vld [vmem:[#allocation5 + $0x3a8] sm:$0xff] }
 0x3fd   : > { %v1678_v9 = vadd.f32 %v1677_v7, %v9170_v49  ;;  %v1679_v11 = vpop.f32.mrb[42].mxu1  ;;  %2395 = vmatprep.mubr.bf16.mxu0 %v1886_v1  ;;  %2588 = vmatprep.mubr.bf16.mxu1 %v1886_v1  ;;  %v7422_v53 = vcombine.high %v3070_v12, %v3074_v36  ;;  %v7428_v1 = vcombine.high %v3077_v54, %v3081_v55 }
 0x3fe   : > { %v1798_v16 = vmax.f32 %v1676_v6, 0.0  ;;  %v1680_v17 = vadd.f32 %v1679_v11, %v9167_v47  ;;  %v1681_v18 = vpop.f32.mrb[43].mxu1  ;;  %2396 = vmatmul.mubr.bf16.gmra.mrb[100].mxu0 %v1885_v62  ;;  %2589 = vmatmul.mubr.bf16.gmra.mrb[100].mxu1 %v1885_v62  ;;  %v7419_v62 = vcombine.low %v3069_v13, %v3073_v34  ;;  %v7427_v11 = vcombine.low %v3077_v54, %v3081_v55 }
 0x3ff   : > { %v1799_v19 = vmax.f32 %v1678_v9, 0.0  ;;  %v1682_v21 = vadd.f32 %v1681_v18, %v9170_v49  ;;  %4564 = vmatpush1.bf16.msra.mxu0 %v7395_v4  ;;  %4950 = vmatpush1.bf16.msra.mxu1 %v7397_v58 }
 0x400   : > { %v2837_v26 = vmax.f32 %v2835_v50, %v1798_v16  ;;  %v1800_v27 = vmax.f32 %v1680_v17, 0.0  ;;  %4565 = vmatprep.subr.bf16.mxu0 %v7404_v8  ;;  %4951 = vmatprep.subr.bf16.mxu1 %v7406_v24 }
 0x401   : > { %v2874_v31 = vmax.f32 %v2872_v57, %v1799_v19  ;;  %v1801_v32 = vmax.f32 %v1682_v21, 0.0 }
 0x402   : > { %v1887_v35 = vpack.c.bf16 %v1800_v27, %v1798_v16  ;;  %v2838_v48 = vmax.f32 %v2836_v63, %v1800_v27 }
 0x403   : > { %v1888_v10 = vpack.c.bf16 %v1801_v32, %v1799_v19  ;;  %v2875_v25 = vmax.f32 %v2873_v2, %v1801_v32  ;;  %v1685_v37 = vpop.f32.mrb[44].mxu1  ;;  %4566 = vmatpush1.bf16.msra.mxu0 %v7403_v22  ;;  %4952 = vmatpush1.bf16.msra.mxu1 %v7405_v28  ;;  %v3078_v2 = vld [vmem:[#allocation5 + $0x388] sm:$0xff] }
 0x404   : > { %v1686_v40 = vadd.f32 %v1685_v37, %v9167_v47  ;;  %v1687_v41 = vpop.f32.mrb[45].mxu1  ;;  %4567 = vmatprep.subr.bf16.mxu0 %v7412_v29  ;;  %4953 = vmatprep.subr.bf16.mxu1 %v7414_v39  ;;  %v7430_v24 = vcombine.high %v3078_v2, %v3082_v3  ;;  %v7429_v16 = vcombine.low %v3078_v2, %v3082_v3 }
 0x405   : > { %v1688_v50 = vadd.f32 %v1687_v41, %v9170_v49  ;;  %v1689_v52 = vpop.f32.mrb[46].mxu1  ;;  %2405 = vmatprep.mubr.bf16.mxu0 %v1888_v10  ;;  %2598 = vmatprep.mubr.bf16.mxu1 %v1888_v10 }
 0x406   : > { %v1802_v56 = vmax.f32 %v1686_v40, 0.0  ;;  %v1690_v57 = vadd.f32 %v1689_v52, %v9167_v47  ;;  %v1691_v59 = vpop.f32.mrb[47].mxu1  ;;  %2406 = vmatmul.mubr.bf16.gmra.mrb[104].mxu0 %v1887_v35  ;;  %2599 = vmatmul.mubr.bf16.gmra.mrb[104].mxu1 %v1887_v35 }
 0x407   : > { %v1803_v60 = vmax.f32 %v1688_v50, 0.0  ;;  %v1692_v61 = vadd.f32 %v1691_v59, %v9170_v49  ;;  %4568 = vmatpush1.bf16.msra.mxu0 %v7411_v38  ;;  %4954 = vmatpush1.bf16.msra.mxu1 %v7413_v42 }
 0x408   : > { %v2839_v63 = vmax.f32 %v2837_v26, %v1802_v56  ;;  %v1804_v0 = vmax.f32 %v1690_v57, 0.0  ;;  %4569 = vmatprep.subr.bf16.mxu0 %v7420_v23  ;;  %4955 = vmatprep.subr.bf16.mxu1 %v7422_v53 }
 0x409   : > { %v2876_v4 = vmax.f32 %v2874_v31, %v1803_v60  ;;  %v1805_v5 = vmax.f32 %v1692_v61, 0.0 }
 0x40a   : > { %v1889_v6 = vpack.c.bf16 %v1804_v0, %v1802_v56  ;;  %v2840_v7 = vmax.f32 %v2838_v48, %v1804_v0 }
 0x40b   : > { %v1890_v58 = vpack.c.bf16 %v1805_v5, %v1803_v60  ;;  %v2877_v8 = vmax.f32 %v2875_v25, %v1805_v5  ;;  %v1695_v9 = vpop.f32.mrb[48].mxu1  ;;  %4570 = vmatpush1.bf16.msra.mxu0 %v7419_v62  ;;  %4956 = vmatpush1.bf16.msra.mxu1 %v7421_v20 }
 0x40c   : > { %v1696_v14 = vadd.f32 %v1695_v9, %v9167_v47  ;;  %v1697_v15 = vpop.f32.mrb[49].mxu1  ;;  %4571 = vmatprep.subr.bf16.mxu0 %v7428_v1  ;;  %4957 = vmatprep.subr.bf16.mxu1 %v7430_v24 }
 0x40d   : > { %v1698_v17 = vadd.f32 %v1697_v15, %v9170_v49  ;;  %v1699_v18 = vpop.f32.mrb[50].mxu1  ;;  %2415 = vmatprep.mubr.bf16.mxu0 %v1890_v58  ;;  %2608 = vmatprep.mubr.bf16.mxu1 %v1890_v58 }
 0x40e   : > { %v1806_v19 = vmax.f32 %v1696_v14, 0.0  ;;  %v1700_v21 = vadd.f32 %v1699_v18, %v9167_v47  ;;  %v1701_v22 = vpop.f32.mrb[51].mxu1  ;;  %2416 = vmatmul.mubr.bf16.gmra.mrb[108].mxu0 %v1889_v6  ;;  %2609 = vmatmul.mubr.bf16.gmra.mrb[108].mxu1 %v1889_v6 }
 0x40f   : > { %v1807_v26 = vmax.f32 %v1698_v17, 0.0  ;;  %v1702_v27 = vadd.f32 %v1701_v22, %v9170_v49  ;;  %4572 = vmatpush1.bf16.msra.mxu0 %v7427_v11  ;;  %4958 = vmatpush1.bf16.msra.mxu1 %v7429_v16 }
 0x410   : > { %v2841_v28 = vmax.f32 %v2839_v63, %v1806_v19  ;;  %v1808_v29 = vmax.f32 %v1700_v21, 0.0 }
 0x411   : > { %v2878_v51 = vmax.f32 %v2876_v4, %v1807_v26  ;;  %v1809_v30 = vmax.f32 %v1702_v27, 0.0 }
 0x412   : > { %v1891_v31 = vpack.c.bf16 %v1808_v29, %v1806_v19  ;;  %v2842_v32 = vmax.f32 %v2840_v7, %v1808_v29 }
 0x413   : > { %v1892_v13 = vpack.c.bf16 %v1809_v30, %v1807_v26  ;;  %v2879_v34 = vmax.f32 %v2877_v8, %v1809_v30  ;;  %v1705_v35 = vpop.f32.mrb[52].mxu1 }
 0x414   : > { %v1706_v48 = vadd.f32 %v1705_v35, %v9167_v47  ;;  %v1707_v12 = vpop.f32.mrb[53].mxu1 }
 0x415   : > { %v1708_v36 = vadd.f32 %v1707_v12, %v9170_v49  ;;  %v1709_v10 = vpop.f32.mrb[54].mxu1  ;;  %2425 = vmatprep.mubr.bf16.mxu0 %v1892_v13  ;;  %2618 = vmatprep.mubr.bf16.mxu1 %v1892_v13  ;;  %v3085_v12 = vld [vmem:[#allocation5 + $0x3c0] sm:$0xff] }
 0x416   : > { %v1810_v25 = vmax.f32 %v1706_v48, 0.0  ;;  %v1710_v37 = vadd.f32 %v1709_v10, %v9167_v47  ;;  %v1711_v38 = vpop.f32.mrb[55].mxu1  ;;  %2426 = vmatmul.mubr.bf16.gmra.mrb[112].mxu0 %v1891_v31  ;;  %2619 = vmatmul.mubr.bf16.gmra.mrb[112].mxu1 %v1891_v31  ;;  %v3086_v10 = vld [vmem:[#allocation5 + $0x3c8] sm:$0xff] }
 0x417   : > { %v1811_v39 = vmax.f32 %v1708_v36, 0.0  ;;  %v1712_v40 = vadd.f32 %v1711_v38, %v9170_v49  ;;  %v3089_v36 = vld [vmem:[#allocation5 + $0x3e0] sm:$0xff] }
 0x418   : > { %v2843_v41 = vmax.f32 %v2841_v28, %v1810_v25  ;;  %v1812_v42 = vmax.f32 %v1710_v37, 0.0 }
 0x419   : > { %v2880_v23 = vmax.f32 %v2878_v51, %v1811_v39  ;;  %v1813_v50 = vmax.f32 %v1712_v40, 0.0  ;;  %v3090_v40 = vld [vmem:[#allocation5 + $0x3e8] sm:$0xff] }
 0x41a   : > { %v1893_v52 = vpack.c.bf16 %v1812_v42, %v1810_v25  ;;  %v2844_v53 = vmax.f32 %v2842_v32, %v1812_v42 }
 0x41b   : > { %v1894_v54 = vpack.c.bf16 %v1813_v50, %v1811_v39  ;;  %v2881_v55 = vmax.f32 %v2879_v34, %v1813_v50  ;;  %v1715_v56 = vpop.f32.mrb[56].mxu1  ;;  %v7436_v39 = vcombine.high %v3085_v12, %v3089_v36  ;;  %v7437_v50 = vcombine.low %v3086_v10, %v3090_v40 }
 0x41c   : > { %v1716_v57 = vadd.f32 %v1715_v56, %v9167_v47  ;;  %v1717_v59 = vpop.f32.mrb[57].mxu1 }
 0x41d   : > { %v1718_v60 = vadd.f32 %v1717_v59, %v9170_v49  ;;  %v1719_v61 = vpop.f32.mrb[58].mxu1  ;;  %2435 = vmatprep.mubr.bf16.mxu0 %v1894_v54  ;;  %2628 = vmatprep.mubr.bf16.mxu1 %v1894_v54  ;;  %v7438_v54 = vcombine.high %v3086_v10, %v3090_v40 }
 0x41e   : > { %v1814_v62 = vmax.f32 %v1716_v57, 0.0  ;;  %v1720_v63 = vadd.f32 %v1719_v61, %v9167_v47  ;;  %v1721_v0 = vpop.f32.mrb[59].mxu1  ;;  %2436 = vmatmul.mubr.bf16.gmra.mrb[116].mxu0 %v1893_v52  ;;  %2629 = vmatmul.mubr.bf16.gmra.mrb[116].mxu1 %v1893_v52 }
 0x41f   : > { %v1815_v20 = vmax.f32 %v1718_v60, 0.0  ;;  %v1722_v1 = vadd.f32 %v1721_v0, %v9170_v49  ;;  %4573 = vmatprep.subr.bf16.mxu0 %v7436_v39  ;;  %4959 = vmatprep.subr.bf16.mxu1 %v7438_v54 }
 0x420   : > { %v2845_v2 = vmax.f32 %v2843_v41, %v1814_v62  ;;  %v1816_v3 = vmax.f32 %v1720_v63, 0.0  ;;  %4960 = vmatpush1.bf16.msra.mxu1 %v7437_v50  ;;  %v1869_v50 = vrot.slane %v9140_v33, 4 }
 0x421   : > { %v2882_v4 = vmax.f32 %v2880_v23, %v1815_v20  ;;  %v1817_v5 = vmax.f32 %v1722_v1, 0.0  ;;  %v7435_v23 = vcombine.low %v3085_v12, %v3089_v36 }
 0x422   : > { %v1895_v6 = vpack.c.bf16 %v1816_v3, %v1814_v62  ;;  %v2846_v7 = vmax.f32 %v2844_v53, %v1816_v3 }
 0x423   : > { %v1896_v58 = vpack.c.bf16 %v1817_v5, %v1815_v20  ;;  %v2883_v8 = vmax.f32 %v2881_v55, %v1817_v5  ;;  %v1725_v9 = vpop.f32.mrb[60].mxu1  ;;  %4574 = vmatpush1.bf16.msra.mxu0 %v7435_v23 }
 0x424   : > { %v1726_v11 = vadd.f32 %v1725_v9, %v9167_v47  ;;  %v1727_v24 = vpop.f32.mrb[61].mxu1  ;;  %v9230_v9 = vld [vmem:[#allocation5 + $0x420] sm:$0xff] }
 0x425   : > { %v1728_v14 = vadd.f32 %v1727_v24, %v9170_v49  ;;  %v1729_v15 = vpop.f32.mrb[62].mxu1  ;;  %2445 = vmatprep.mubr.bf16.mxu0 %v1896_v58  ;;  %2638 = vmatprep.mubr.bf16.mxu1 %v1896_v58 }
 0x426   : > { %v1818_v16 = vmax.f32 %v1726_v11, 0.0  ;;  %v1730_v17 = vadd.f32 %v1729_v15, %v9167_v47  ;;  %v1731_v18 = vpop.f32.mrb[63].mxu1  ;;  %2446 = vmatmul.mubr.bf16.gmra.mrb[120].mxu0 %v1895_v6  ;;  %2639 = vmatmul.mubr.bf16.gmra.mrb[120].mxu1 %v1895_v6  ;;  %v9232_v11 = vld [vmem:[#allocation5 + $0x408] sm:$0xff] }
 0x427   : > { %v1819_v19 = vmax.f32 %v1728_v14, 0.0  ;;  %v1732_v21 = vadd.f32 %v1731_v18, %v9170_v49 }
 0x428   : > { %v2847_v22 = vmax.f32 %v2845_v2, %v1818_v16  ;;  %v1820_v26 = vmax.f32 %v1730_v17, 0.0  ;;  %v9238_v17 = vld [vmem:[#allocation5 + $0x428] sm:$0xff] }
 0x429   : > { %v2884_v27 = vmax.f32 %v2882_v4, %v1819_v19  ;;  %v1821_v28 = vmax.f32 %v1732_v21, 0.0 }
 0x42a   : > { %v1897_v29 = vpack.c.bf16 %v1820_v26, %v1818_v16  ;;  %v2848_v51 = vmax.f32 %v2846_v7, %v1820_v26 }
 0x42b   : > { %v1898_v30 = vpack.c.bf16 %v1821_v28, %v1819_v19  ;;  %v2885_v31 = vmax.f32 %v2883_v8, %v1821_v28  ;;  %v1735_v32 = vpop.f32.mrb[64].mxu1  ;;  %v9228_v8 = vld [vmem:[#allocation5 + $0x400] sm:$0xff] }
 0x42c   : > { %v1736_v13 = vadd.f32 %v1735_v32, %v9167_v47  ;;  %v1737_v34 = vpop.f32.mrb[65].mxu1  ;;  %v7444_v16 = vcombine.high %v9228_v8, %v9230_v9 }
 0x42d   : > { %v1738_v35 = vadd.f32 %v1737_v34, %v9170_v49  ;;  %v1739_v48 = vpop.f32.mrb[66].mxu1  ;;  %2455 = vmatprep.mubr.bf16.mxu0 %v1898_v30  ;;  %2648 = vmatprep.mubr.bf16.mxu1 %v1898_v30 }
 0x42e   : > { %v1822_v25 = vmax.f32 %v1736_v13, 0.0  ;;  %v1740_v37 = vadd.f32 %v1739_v48, %v9167_v47  ;;  %v1741_v38 = vpop.f32.mrb[67].mxu1  ;;  %2456 = vmatmul.mubr.bf16.gmra.mrb[124].mxu0 %v1897_v29  ;;  %2649 = vmatmul.mubr.bf16.gmra.mrb[124].mxu1 %v1897_v29 }
 0x42f   : > { %v1823_v41 = vmax.f32 %v1738_v35, 0.0  ;;  %v1742_v42 = vadd.f32 %v1741_v38, %v9170_v49  ;;  %4736 = vmatprep.subr.bf16.mxu0 %v7444_v16 }
 0x430   : > { %v2849_v52 = vmax.f32 %v2847_v22, %v1822_v25  ;;  %v1824_v53 = vmax.f32 %v1740_v37, 0.0  ;;  %v7446_v22 = vcombine.high %v9232_v11, %v9238_v17 }
 0x431   : > { %v2886_v55 = vmax.f32 %v2884_v27, %v1823_v41  ;;  %v1825_v56 = vmax.f32 %v1742_v42, 0.0 }
 0x432   : > { %v1899_v57 = vpack.c.bf16 %v1824_v53, %v1822_v25  ;;  %v2850_v59 = vmax.f32 %v2848_v51, %v1824_v53  ;;  %5122 = vmatprep.subr.bf16.mxu1 %v7446_v22 }
 0x433   : > { %v1900_v60 = vpack.c.bf16 %v1825_v56, %v1823_v41  ;;  %v2887_v61 = vmax.f32 %v2885_v31, %v1825_v56  ;;  %v1745_v62 = vpop.f32.mrb[68].mxu1 }
 0x434   : > { %v1746_v63 = vadd.f32 %v1745_v62, %v9167_v47  ;;  %v1747_v0 = vpop.f32.mrb[69].mxu1  ;;  %v1870_v62 = vmax.f32 %v9140_v33, %v1869_v50  ;;  %v9282_v50 = vld [vmem:[#allocation5 + $0x4c0] sm:$0xff] }
 0x435   : > { %v1748_v20 = vadd.f32 %v1747_v0, %v9170_v49  ;;  %v1749_v1 = vpop.f32.mrb[70].mxu1  ;;  %2465 = vmatprep.mubr.bf16.mxu0 %v1900_v60  ;;  %2658 = vmatprep.mubr.bf16.mxu1 %v1900_v60 }
 0x436   : > { %v1826_v2 = vmax.f32 %v1746_v63, 0.0  ;;  %v1750_v3 = vadd.f32 %v1749_v1, %v9167_v47  ;;  %v1751_v4 = vpop.f32.mrb[71].mxu1  ;;  %2466 = vmatmul.mubr.bf16.gmra.mrb[128].mxu0 %v1899_v57  ;;  %2659 = vmatmul.mubr.bf16.gmra.mrb[128].mxu1 %v1899_v57 }
 0x437   : > { %v1827_v5 = vmax.f32 %v1748_v20, 0.0  ;;  %v1752_v6 = vadd.f32 %v1751_v4, %v9170_v49 }
 0x438   : > { %v2851_v7 = vmax.f32 %v2849_v52, %v1826_v2  ;;  %v1828_v58 = vmax.f32 %v1750_v3, 0.0 }
 0x439   : > { %v2888_v24 = vmax.f32 %v2886_v55, %v1827_v5  ;;  %v1829_v14 = vmax.f32 %v1752_v6, 0.0 }
 0x43a   : > { %v1901_v18 = vpack.c.bf16 %v1828_v58, %v1826_v2  ;;  %v2852_v19 = vmax.f32 %v2850_v59, %v1828_v58 }
 0x43b   : > { %v1902_v26 = vpack.c.bf16 %v1829_v14, %v1827_v5  ;;  %v2889_v27 = vmax.f32 %v2887_v61, %v1829_v14  ;;  %v1755_v28 = vpop.f32.mrb[72].mxu1  ;;  %v1871_v5 = vrot.slane %v1870_v62, 2 }
 0x43c   : > { %v1756_v29 = vadd.f32 %v1755_v28, %v9167_v47  ;;  %v1757_v51 = vpop.f32.mrb[73].mxu1 }
 0x43d   : > { %v1758_v30 = vadd.f32 %v1757_v51, %v9170_v49  ;;  %v1759_v31 = vpop.f32.mrb[74].mxu1  ;;  %2475 = vmatprep.mubr.bf16.mxu0 %v1902_v26  ;;  %2668 = vmatprep.mubr.bf16.mxu1 %v1902_v26  ;;  %v1872_v58 = vmax.f32 %v1870_v62, %v1871_v5  ;;  %v9324_v5 = vld [vmem:[#allocation5 + $0x568] sm:$0xff] }
 0x43e   : > { %v1830_v32 = vmax.f32 %v1756_v29, 0.0  ;;  %v1760_v13 = vadd.f32 %v1759_v31, %v9167_v47  ;;  %v1761_v34 = vpop.f32.mrb[75].mxu1  ;;  %2476 = vmatmul.mubr.bf16.gmra.mrb[132].mxu0 %v1901_v18  ;;  %2669 = vmatmul.mubr.bf16.gmra.mrb[132].mxu1 %v1901_v18 }
 0x43f   : > { %v1831_v35 = vmax.f32 %v1758_v30, 0.0  ;;  %v1762_v48 = vadd.f32 %v1761_v34, %v9170_v49  ;;  %v1873_v22 = vrot.slane %v1872_v58, 1 }
 0x440   : > { %v2853_v12 = vmax.f32 %v2851_v7, %v1830_v32  ;;  %v1832_v36 = vmax.f32 %v1760_v13, 0.0 }
 0x441   : > { %v2890_v10 = vmax.f32 %v2888_v24, %v1831_v35  ;;  %v1833_v25 = vmax.f32 %v1762_v48, 0.0  ;;  %v8647_v24 = vmov 1966171168   ;;  %v1874_v30 = vmax.f32 %v1872_v58, %v1873_v22  ;;  %v9398_v22 = vld [vmem:[#allocation5 + $0x680] sm:$0xff] }
 0x442   : > { %v1903_v37 = vpack.c.bf16 %v1832_v36, %v1830_v32  ;;  %v2854_v38 = vmax.f32 %v2852_v19, %v1832_v36  ;;  %v6811_v14 = vunpack.c.l.s4 %v8647_v24  ;;  %v10661_v36 = vsub.s32 2, %v9155_v44  ;;  %10796 = vst [vmem:[#allocation31_spill] sm:$0xff] %v9398_v22  ;;  %v9448_v24 = vld [vmem:[#allocation5 + $0x720] sm:$0xff] }
 0x443   : > { %v1904_v39 = vpack.c.bf16 %v1833_v25, %v1831_v35  ;;  %v2891_v40 = vmax.f32 %v2889_v27, %v1833_v25  ;;  %v1765_v41 = vpop.f32.mrb[76].mxu1  ;;  %v9267_v25 = vld [vmem:[#allocation5 + $0x460] sm:$0xff]  ;;  %10804 = vst [vmem:[#allocation39_spill] sm:$0xff] %v9448_v24 }
 0x444   : > { %v1766_v42 = vadd.f32 %v1765_v41, %v9167_v47  ;;  %v1767_v23 = vpop.f32.mrb[77].mxu1  ;;  %v6812_v26 = vunpack.c.0.s8 %v6811_v14  ;;  %v9276_v41 = vld [vmem:[#allocation5 + $0x4a0] sm:$0xff]  ;;  %v9338_v14 = vld [vmem:[#allocation5 + $0x588] sm:$0xff] }
 0x445   : > { %v1768_v52 = vadd.f32 %v1767_v23, %v9170_v49  ;;  %v1769_v53 = vpop.f32.mrb[78].mxu1  ;;  %2485 = vmatprep.mubr.bf16.mxu0 %v1904_v39  ;;  %2678 = vmatprep.mubr.bf16.mxu1 %v1904_v39  ;;  %v10660_v39 = vsub.s32 3, %v9155_v44  ;;  %v9280_v23 = vld [vmem:[#allocation5 + $0x4a8] sm:$0xff] }
 0x446   : > { %v1834_v54 = vmax.f32 %v1766_v42, 0.0  ;;  %v1770_v55 = vadd.f32 %v1769_v53, %v9167_v47  ;;  %v1771_v56 = vpop.f32.mrb[79].mxu1  ;;  %2486 = vmatmul.mubr.bf16.gmra.mrb[136].mxu0 %v1903_v37  ;;  %2679 = vmatmul.mubr.bf16.gmra.mrb[136].mxu1 %v1903_v37  ;;  %v9255_v31 = vsub.s32 %v6812_v26, %v9155_v44  ;;  %v9269_v37 = vld [vmem:[#allocation5 + $0x448] sm:$0xff]  ;;  %v9384_v26 = vld [vmem:[#allocation5 + $0x660] sm:$0xff] }
 0x447   : > { %v1835_v57 = vmax.f32 %v1768_v52, 0.0  ;;  %v1772_v59 = vadd.f32 %v1771_v56, %v9170_v49  ;;  %v9278_v42 = vld [vmem:[#allocation5 + $0x488] sm:$0xff]  ;;  %v9284_v52 = vld [vmem:[#allocation5 + $0x4e0] sm:$0xff]  ;;  %10793 = vst [vmem:[#allocation28_spill] sm:$0xff] %v9384_v26 }
 0x448   : > { %v2855_v60 = vmax.f32 %v2853_v12, %v1834_v54  ;;  %v1836_v61 = vmax.f32 %v1770_v55, 0.0  ;;  %10787 = vst [vmem:[#allocation22_spill] sm:$0xff] %v9255_v31  ;;  %v6885_v34 = vrot.slane %v1874_v30, %v9255_v31  ;;  %v1971_v12 = vld [vmem:[%s10642_s10] sm:$0xf]  ;;  %v9286_v53 = vld [vmem:[#allocation5 + $0x4c8] sm:$0xff] }
 0x449   : > { %v2892_v63 = vmax.f32 %v2890_v10, %v1835_v57  ;;  %v1837_v0 = vmax.f32 %v1772_v59, 0.0  ;;  %v9265_v10 = vld [vmem:[#allocation5 + $0x440] sm:$0xff]  ;;  %v9296_v59 = vld [vmem:[#allocation5 + $0x528] sm:$0xff]  ;;  %v9306_v62 = vrot.slane %v1971_v12, %v10661_v36 }
 0x44a   : > { %v1905_v20 = vpack.c.bf16 %v1836_v61, %v1834_v54  ;;  %v2856_v1 = vmax.f32 %v2854_v38, %v1836_v61  ;;  %v9271_v38 = vld [vmem:[#allocation5 + $0x468] sm:$0xff]  ;;  %v9290_v55 = vld [vmem:[#allocation5 + $0x500] sm:$0xff]  ;;  %v9302_v61 = vrot.slane %v1971_v12, %v9164_v46 }
 0x44b   : > { %v1906_v2 = vpack.c.bf16 %v1837_v0, %v1835_v57  ;;  %v2893_v3 = vmax.f32 %v2891_v40, %v1837_v0  ;;  %v9274_v40 = vld [vmem:[#allocation5 + $0x480] sm:$0xff]  ;;  %v9288_v54 = vld [vmem:[#allocation5 + $0x4e8] sm:$0xff] }
 0x44c   : > { %v2857_v4 = vmax.f32 %v2855_v60, %v2856_v1  ;;  %v9292_v56 = vld [vmem:[#allocation5 + $0x520] sm:$0xff]  ;;  %v9294_v57 = vld [vmem:[#allocation5 + $0x508] sm:$0xff]  ;;  %v9299_v60 = vrot.slane %v1971_v12, %v9158_v45  ;;  %v9316_v1 = vrot.slane %v1971_v12, %v10660_v39 }
 0x44d   : > { %v2894_v6 = vmax.f32 %v2892_v63, %v2893_v3  ;;  %2495 = vmatprep.mubr.bf16.mxu0 %v1906_v2  ;;  %2688 = vmatprep.mubr.bf16.mxu1 %v1906_v2  ;;  %v9308_v63 = vld [vmem:[#allocation5 + $0x540] sm:$0xff]  ;;  %v9370_v12 = vld [vmem:[#allocation5 + $0x608] sm:$0xff] }
 0x44e   : > { %v2858_v47 = vrot.slane %v2857_v4, 4  ;;  %2496 = vmatmul.mubr.bf16.gmra.mrb[140].mxu0 %v1905_v20  ;;  %2689 = vmatmul.mubr.bf16.gmra.mrb[140].mxu1 %v1905_v20  ;;  %v9310_v0 = vld [vmem:[#allocation5 + $0x560] sm:$0xff]  ;;  %v9312_v20 = vld [vmem:[#allocation5 + $0x548] sm:$0xff]  ;;  %10790 = vst [vmem:[#allocation25_spill] sm:$0xff] %v9370_v12 }
 0x44f   : > { %v2895_v7 = vrot.slane %v2894_v6, 4  ;;  %v9396_v30 = vld [vmem:[#allocation5 + $0x668] sm:$0xff]  ;;  %v9424_v36 = vld [vmem:[#allocation5 + $0x6e0] sm:$0xff] }
 0x450   : > { %v2859_v49 = vmax.f32 %v2857_v4, %v2858_v47  ;;  %v9328_v47 = vld [vmem:[#allocation5 + $0x5a0] sm:$0xff]  ;;  %10795 = vst [vmem:[#allocation30_spill] sm:$0xff] %v9396_v30  ;;  %10801 = vst [vmem:[#allocation36_spill] sm:$0xff] %v9424_v36  ;;  %v9436_v3 = vld [vmem:[#allocation5 + $0x6e8] sm:$0xff] }
 0x451   : > { %v2896_v33 = vmax.f32 %v2894_v6, %v2895_v7  ;;  %v9326_v6 = vld [vmem:[#allocation5 + $0x580] sm:$0xff]  ;;  %10803 = vst [vmem:[#allocation38_spill] sm:$0xff] %v9436_v3  ;;  %v9456_v7 = vld [vmem:[#allocation5 + $0x708] sm:$0xff] }
 0x452   : > { %v2860_v16 = vrot.slane %v2859_v49, 2  ;;  %v9422_v4 = vld [vmem:[#allocation5 + $0x6c0] sm:$0xff] }
 0x453   : > { %v2897_v18 = vrot.slane %v2896_v33, 2  ;;  %10800 = vst [vmem:[#allocation35_spill] sm:$0xff] %v9422_v4  ;;  %v9446_v46 = vld [vmem:[#allocation5 + $0x700] sm:$0xff] }
 0x454   : > { %v2861_v19 = vmax.f32 %v2859_v49, %v2860_v16  ;;  %v9342_v16 = vld [vmem:[#allocation5 + $0x5c0] sm:$0xff] }
 0x455   : > { %v2898_v27 = vmax.f32 %v2896_v33, %v2897_v18  ;;  %v9340_v33 = vld [vmem:[#allocation5 + $0x5a8] sm:$0xff]  ;;  %v9408_v49 = vld [vmem:[#allocation5 + $0x6a0] sm:$0xff] }
 0x456   : > { %v2862_v28 = vrot.slane %v2861_v19, 1  ;;  %10797 = vst [vmem:[#allocation32_spill] sm:$0xff] %v9408_v49  ;;  %v9412_v18 = vld [vmem:[#allocation5 + $0x6a8] sm:$0xff] }
 0x457   : > { %v2899_v29 = vrot.slane %v2898_v27, 1  ;;  %10799 = vst [vmem:[#allocation34_spill] sm:$0xff] %v9412_v18  ;;  %v9458_v49 = vld [vmem:[#allocation5 + $0x728] sm:$0xff] }
 0x458   : > { %v2863_v51 = vmax.f32 %v2861_v19, %v2862_v28  ;;  %v9354_v28 = vld [vmem:[#allocation5 + $0x5c8] sm:$0xff] }
 0x459   : > { %v2900_v32 = vmax.f32 %v2898_v27, %v2899_v29  ;;  %v9352_v27 = vld [vmem:[#allocation5 + $0x5e0] sm:$0xff]  ;;  %v9356_v29 = vld [vmem:[#allocation5 + $0x5e8] sm:$0xff] }
 0x45a   : > { %v9434_v19 = vld [vmem:[#allocation5 + $0x6c8] sm:$0xff] }
 0x45b   : > { %v6857_v13 = vcombine.low %v2863_v51, %v2900_v32  ;;  %v9380_v32 = vld [vmem:[#allocation5 + $0x628] sm:$0xff]  ;;  %10802 = vst [vmem:[#allocation37_spill] sm:$0xff] %v9434_v19  ;;  %v9478_v19 = vld [vmem:[#allocation5 + $0x740] sm:$0xff] }
 0x45c   : > { %10791 = vst [vmem:[#allocation26_spill] sm:$0xff] %v9380_v32  ;;  %v9394_v51 = vld [vmem:[#allocation5 + $0x648] sm:$0xff] }
 0x45d   : > { %v6878_v35 = vrot.slane %v6857_v13, %v9255_v31  ;;  %v9382_v13 = vld [vmem:[#allocation5 + $0x640] sm:$0xff]  ;;  %10794 = vst [vmem:[#allocation29_spill] sm:$0xff] %v9394_v51 }
 0x45e   : > { %10792 = vst [vmem:[#allocation27_spill] sm:$0xff] %v9382_v13 }
 0x45f   : > { %v9259_v48 = vcombine.low %v6878_v35, %v6885_v34  ;;  %v9366_v34 = vld [vmem:[#allocation5 + $0x600] sm:$0xff] }
 0x460   : > { %v9368_v35 = vld [vmem:[#allocation5 + $0x620] sm:$0xff] }
 0x461   : > { %10788 = vst [vmem:[#allocation23_spill] sm:$0xff] %v9259_v48  ;;  %10789 = vst [vmem:[#allocation24_spill] sm:$0xff] %v9368_v35 }
 0x4a9   : > { %v2347_v39 = vpop.f32.mrb[80].mxu0  ;;  %v2540_v21 = vpop.f32.mrb[80].mxu1 }
 0x4aa   : > { %v2348_v44 = vadd.f32 %v2347_v39, %v9299_v60  ;;  %v2541_v45 = vadd.f32 %v2540_v21, %v9306_v62  ;;  %v2349_v48 = vpop.f32.mrb[81].mxu0  ;;  %v2542_v31 = vpop.f32.mrb[81].mxu1 }
 0x4ab   : > { %v2350_v58 = vadd.f32 %v2349_v48, %v9302_v61  ;;  %v2543_v22 = vadd.f32 %v2542_v31, %v9316_v1  ;;  %v2351_v30 = vpop.f32.mrb[82].mxu0  ;;  %v2544_v39 = vpop.f32.mrb[82].mxu1  ;;  %v9480_v31 = vld [vmem:[#allocation5 + $0x760] sm:$0xff] }
 0x4ac   : > { %v2352_v15 = vadd.f32 %v2351_v30, %v9299_v60  ;;  %v2545_v2 = vadd.f32 %v2544_v39, %v9306_v62  ;;  %v2353_v18 = vpop.f32.mrb[83].mxu0  ;;  %v2546_v43 = vpop.f32.mrb[83].mxu1  ;;  %v2699_v51 = vmax.f32 %v2348_v44, 0.0  ;;  %v2701_v39 = vmax.f32 %v2541_v45, 0.0  ;;  %10805 = vst [vmem:[#allocation40_spill] sm:$0xff] %v9480_v31 }
 0x4ad   : > { %v2354_v48 = vadd.f32 %v2353_v18, %v9302_v61  ;;  %v2547_v13 = vadd.f32 %v2546_v43, %v9316_v1  ;;  %v2700_v32 = vmax.f32 %v2350_v58, 0.0  ;;  %v2702_v12 = vmax.f32 %v2543_v22, 0.0 }
 0x4ae   : > { %v2703_v36 = vmax.f32 %v2352_v15, 0.0  ;;  %v2705_v4 = vmax.f32 %v2545_v2, 0.0 }
 0x4af   : > { %v2704_v26 = vmax.f32 %v2354_v48, 0.0  ;;  %v2706_v3 = vmax.f32 %v2547_v13, 0.0 }
 0x4b0   : > { %v9482_v18 = vpack.c.bf16 %v2703_v36, %v2699_v51  ;;  %v6343_v43 = vmax.f32 %v2699_v51, %v2703_v36  ;;  %v9484_v35 = vpack.c.bf16 %v2705_v4, %v2701_v39  ;;  %v6417_v21 = vmax.f32 %v2701_v39, %v2705_v4 }
 0x4b1   : > { %v9486_v24 = vpack.c.bf16 %v2704_v26, %v2700_v32  ;;  %v6380_v44 = vmax.f32 %v2700_v32, %v2704_v26  ;;  %v9488_v45 = vpack.c.bf16 %v2706_v3, %v2702_v12  ;;  %v6454_v15 = vmax.f32 %v2702_v12, %v2706_v3  ;;  %v2357_v2 = vpop.f32.mrb[84].mxu0  ;;  %v2550_v58 = vpop.f32.mrb[84].mxu1 }
 0x4b2   : > { %10806 = vst [vmem:[#allocation41_spill] sm:$0xff] %v9484_v35  ;;  %v2358_v22 = vadd.f32 %v2357_v2, %v9299_v60  ;;  %v2551_v13 = vadd.f32 %v2550_v58, %v9306_v62  ;;  %v2359_v48 = vpop.f32.mrb[85].mxu0  ;;  %v2552_v30 = vpop.f32.mrb[85].mxu1 }
 0x4b3   : > { %10807 = vst [vmem:[#allocation42_spill] sm:$0xff] %v9486_v24  ;;  %10808 = vst [vmem:[#allocation43_spill] sm:$0xff] %v9488_v45  ;;  %v2360_v51 = vadd.f32 %v2359_v48, %v9302_v61  ;;  %v2553_v26 = vadd.f32 %v2552_v30, %v9316_v1  ;;  %v2361_v32 = vpop.f32.mrb[86].mxu0  ;;  %v2554_v3 = vpop.f32.mrb[86].mxu1  ;;  %4575 = vmatprep.mubr.bf16.mxu0 %v9486_v24  ;;  %4961 = vmatprep.mubr.bf16.mxu1 %v9486_v24 }
 0x4b4   : > { %v2707_v39 = vmax.f32 %v2358_v22, 0.0  ;;  %v2709_v2 = vmax.f32 %v2551_v13, 0.0  ;;  %v2362_v58 = vadd.f32 %v2361_v32, %v9299_v60  ;;  %v2555_v36 = vadd.f32 %v2554_v3, %v9306_v62  ;;  %v2363_v4 = vpop.f32.mrb[87].mxu0  ;;  %v2556_v35 = vpop.f32.mrb[87].mxu1  ;;  %4576 = vmatmul.mubr.bf16.vlgmr.msra.gmra.mrb[144].mxu0 %v9482_v18  ;;  %4962 = vmatmul.mubr.bf16.vlgmr.msra.gmra.mrb[144].mxu1 %v9482_v18 }
 0x4b5   : > { %v2708_v30 = vmax.f32 %v2360_v51, 0.0  ;;  %v2710_v48 = vmax.f32 %v2553_v26, 0.0  ;;  %v2364_v45 = vadd.f32 %v2363_v4, %v9302_v61  ;;  %v2557_v24 = vadd.f32 %v2556_v35, %v9316_v1 }
 0x4b6   : > { %v10809_v22 = vcombine.low %v9228_v8, %v9230_v9  ;;  %v10810_v13 = vcombine.low %v9232_v11, %v9238_v17  ;;  %v6344_v32 = vmax.f32 %v6343_v43, %v2707_v39  ;;  %v6418_v3 = vmax.f32 %v6417_v21, %v2709_v2  ;;  %v9522_v11 = vld [vmem:[#allocation5 + $0x768] sm:$0xff] }
 0x4b7   : > { %v2711_v12 = vmax.f32 %v2362_v58, 0.0  ;;  %v2713_v31 = vmax.f32 %v2555_v36, 0.0  ;;  %v10811_v51 = vcombine.high %v9265_v10, %v9267_v25  ;;  %v10812_v4 = vcombine.high %v9269_v37, %v9271_v38 }
 0x4b8   : > { %4737 = vmatpush1.bf16.msra.mxu0 %v10809_v22  ;;  %5123 = vmatpush1.bf16.msra.mxu1 %v10810_v13  ;;  %v6381_v35 = vmax.f32 %v6380_v44, %v2708_v30  ;;  %v6455_v26 = vmax.f32 %v6454_v15, %v2710_v48  ;;  %v2712_v8 = vmax.f32 %v2364_v45, 0.0  ;;  %v2714_v9 = vmax.f32 %v2557_v24, 0.0  ;;  %v9520_v22 = vld [vmem:[#allocation5 + $0x748] sm:$0xff] }
 0x4b9   : > { %4738 = vmatprep.subr.bf16.mxu0 %v10811_v51  ;;  %5124 = vmatprep.subr.bf16.mxu1 %v10812_v4  ;;  %v9524_v17 = vpack.c.bf16 %v2711_v12, %v2707_v39  ;;  %v6345_v21 = vmax.f32 %v6344_v32, %v2711_v12  ;;  %v9526_v43 = vpack.c.bf16 %v2713_v31, %v2709_v2  ;;  %v2367_v44 = vpop.f32.mrb[88].mxu0  ;;  %v2560_v15 = vpop.f32.mrb[88].mxu1 }
 0x4ba   : > { %v6419_v36 = vmax.f32 %v6418_v3, %v2713_v31  ;;  %v9528_v58 = vpack.c.bf16 %v2712_v8, %v2708_v30  ;;  %v6382_v13 = vmax.f32 %v6381_v35, %v2712_v8  ;;  %v9530_v51 = vpack.c.bf16 %v2714_v9, %v2710_v48  ;;  %v2369_v12 = vpop.f32.mrb[89].mxu0  ;;  %v2562_v2 = vpop.f32.mrb[89].mxu1 }
 0x4bb   : > { %10813 = vst [vmem:[#allocation44_spill] sm:$0xff] %v9524_v17  ;;  %v6456_v4 = vmax.f32 %v6455_v26, %v2714_v9  ;;  %v10815_v24 = vcombine.low %v9265_v10, %v9267_v25  ;;  %v2368_v45 = vadd.f32 %v2367_v44, %v9299_v60  ;;  %v2561_v39 = vadd.f32 %v2560_v15, %v9306_v62  ;;  %v2371_v32 = vpop.f32.mrb[90].mxu0  ;;  %v2564_v3 = vpop.f32.mrb[90].mxu1 }
 0x4bc   : > { %10814 = vst [vmem:[#allocation45_spill] sm:$0xff] %v9528_v58  ;;  %v10816_v31 = vcombine.low %v9269_v37, %v9271_v38  ;;  %v10817_v30 = vcombine.high %v9274_v40, %v9276_v41  ;;  %v2370_v10 = vadd.f32 %v2369_v12, %v9302_v61  ;;  %v2563_v25 = vadd.f32 %v2562_v2, %v9316_v1  ;;  %v2373_v9 = vpop.f32.mrb[91].mxu0  ;;  %v2566_v44 = vpop.f32.mrb[91].mxu1 }
 0x4bd   : > { %4739 = vmatpush1.bf16.msra.mxu0 %v10815_v24  ;;  %4585 = vmatprep.mubr.bf16.mxu0 %v9528_v58  ;;  %v2715_v38 = vmax.f32 %v2368_v45, 0.0  ;;  %v2717_v35 = vmax.f32 %v2561_v39, 0.0  ;;  %v2372_v26 = vadd.f32 %v2371_v32, %v9299_v60  ;;  %v2565_v8 = vadd.f32 %v2564_v3, %v9306_v62 }
 0x4be   : > { %5125 = vmatpush1.bf16.msra.mxu1 %v10816_v31  ;;  %4740 = vmatprep.subr.bf16.mxu0 %v10817_v30  ;;  %v2716_v15 = vmax.f32 %v2370_v10, 0.0  ;;  %v2718_v24 = vmax.f32 %v2563_v25, 0.0  ;;  %v2374_v12 = vadd.f32 %v2373_v9, %v9302_v61  ;;  %v2567_v2 = vadd.f32 %v2566_v44, %v9316_v1 }
 0x4bf   : > { %4971 = vmatprep.mubr.bf16.mxu1 %v9528_v58  ;;  %4586 = vmatmul.mubr.bf16.gmra.mrb[148].mxu0 %v9524_v17  ;;  %v10818_v45 = vcombine.high %v9278_v42, %v9280_v23  ;;  %v10819_v39 = vcombine.low %v9274_v40, %v9276_v41  ;;  %v6346_v31 = vmax.f32 %v6345_v21, %v2715_v38  ;;  %v2719_v32 = vmax.f32 %v2372_v26, 0.0  ;;  %v9572_v41 = vld [vmem:[#allocation5 + $0x10] sm:$0xff] }
 0x4c0   : > { %4972 = vmatmul.mubr.bf16.gmra.mrb[148].mxu1 %v9524_v17  ;;  %v6420_v30 = vmax.f32 %v6419_v36, %v2717_v35  ;;  %v2721_v3 = vmax.f32 %v2565_v8, 0.0  ;;  %v10820_v10 = vcombine.low %v9278_v42, %v9280_v23  ;;  %v10821_v25 = vcombine.high %v9282_v50, %v9284_v52  ;;  %v9574_v21 = vld [vmem:[#allocation5 + $0x30] sm:$0xff]  ;;  %v9580_v8 = vld [vmem:[#allocation5 + $0x780] sm:$0xff] }
 0x4c1   : > { %5126 = vmatprep.subr.bf16.mxu1 %v10818_v45  ;;  %4741 = vmatpush1.bf16.msra.mxu0 %v10819_v39  ;;  %v6383_v9 = vmax.f32 %v6382_v13, %v2716_v15  ;;  %v6457_v44 = vmax.f32 %v6456_v4, %v2718_v24  ;;  %v2720_v48 = vmax.f32 %v2374_v12, 0.0  ;;  %v2722_v45 = vmax.f32 %v2567_v2, 0.0  ;;  %v9582_v13 = vld [vmem:[#allocation5 + $0x7a0] sm:$0xff]  ;;  %v10919_v58 = vld [vmem:[#allocation41_spill] sm:$0xff] }
 0x4c2   : > { %5127 = vmatpush1.bf16.msra.mxu1 %v10820_v10  ;;  %4742 = vmatprep.subr.bf16.mxu0 %v10821_v25  ;;  %v10822_v40 = vcombine.high %v9286_v53, %v9288_v54  ;;  %v9576_v36 = vpack.c.bf16 %v2719_v32, %v2715_v38  ;;  %v6347_v42 = vmax.f32 %v6346_v31, %v2719_v32  ;;  %v2377_v10 = vpop.f32.mrb[92].mxu0  ;;  %v2570_v25 = vpop.f32.mrb[92].mxu1 }
 0x4c3   : > { %v9578_v23 = vpack.c.bf16 %v2721_v3, %v2717_v35  ;;  %v6421_v26 = vmax.f32 %v6420_v30, %v2721_v3  ;;  %v9584_v4 = vpack.c.bf16 %v2720_v48, %v2716_v15  ;;  %v6384_v12 = vmax.f32 %v6383_v9, %v2720_v48  ;;  %v2379_v30 = vpop.f32.mrb[93].mxu0  ;;  %v2572_v32 = vpop.f32.mrb[93].mxu1 }
 0x4c4   : > { %5128 = vmatprep.subr.bf16.mxu1 %v10822_v40  ;;  %10823 = vst [vmem:[#allocation46_spill] sm:$0xff] %v9576_v36  ;;  %v9586_v2 = vpack.c.bf16 %v2722_v45, %v2718_v24  ;;  %v6458_v39 = vmax.f32 %v6457_v44, %v2722_v45  ;;  %v10825_v38 = vcombine.low %v9282_v50, %v9284_v52  ;;  %v2381_v3 = vpop.f32.mrb[94].mxu0  ;;  %v2574_v9 = vpop.f32.mrb[94].mxu1 }
 0x4c5   : > { %10824 = vst [vmem:[#allocation47_spill] sm:$0xff] %v9584_v4  ;;  %v2378_v35 = vadd.f32 %v2377_v10, %v9299_v60  ;;  %v2571_v31 = vadd.f32 %v2570_v25, %v9306_v62  ;;  %v10826_v15 = vcombine.low %v9286_v53, %v9288_v54  ;;  %v10827_v48 = vcombine.high %v9290_v55, %v9292_v56  ;;  %v2383_v10 = vpop.f32.mrb[95].mxu0  ;;  %v2576_v25 = vpop.f32.mrb[95].mxu1 }
 0x4c6   : > { %4743 = vmatpush1.bf16.msra.mxu0 %v10825_v38  ;;  %v2380_v50 = vadd.f32 %v2379_v30, %v9302_v61  ;;  %v2573_v52 = vadd.f32 %v2572_v32, %v9316_v1  ;;  %4595 = vmatprep.mubr.bf16.mxu0 %v9584_v4  ;;  %v2382_v45 = vadd.f32 %v2381_v3, %v9299_v60 }
 0x4c7   : > { %5129 = vmatpush1.bf16.msra.mxu1 %v10826_v15  ;;  %4744 = vmatprep.subr.bf16.mxu0 %v10827_v48  ;;  %v2723_v54 = vmax.f32 %v2378_v35, 0.0  ;;  %v2725_v44 = vmax.f32 %v2571_v31, 0.0  ;;  %v2575_v40 = vadd.f32 %v2574_v9, %v9306_v62  ;;  %v2384_v32 = vadd.f32 %v2383_v10, %v9302_v61 }
 0x4c8   : > { %4981 = vmatprep.mubr.bf16.mxu1 %v9584_v4  ;;  %4596 = vmatmul.mubr.bf16.gmra.mrb[152].mxu0 %v9576_v36  ;;  %v2724_v38 = vmax.f32 %v2380_v50, 0.0  ;;  %v2726_v30 = vmax.f32 %v2573_v52, 0.0  ;;  %v2577_v15 = vadd.f32 %v2576_v25, %v9316_v1  ;;  %v10828_v35 = vcombine.high %v9294_v57, %v9296_v59  ;;  %v10876_v4 = vld [vmem:[#allocation38_spill] sm:$0xff] }
 0x4c9   : > { %4982 = vmatmul.mubr.bf16.gmra.mrb[152].mxu1 %v9576_v36  ;;  %v10829_v31 = vcombine.low %v9290_v55, %v9292_v56  ;;  %v6348_v48 = vmax.f32 %v6347_v42, %v2723_v54  ;;  %v6422_v3 = vmax.f32 %v6421_v26, %v2725_v44  ;;  %v2727_v9 = vmax.f32 %v2382_v45, 0.0  ;;  %v9628_v56 = vld [vmem:[#allocation5 + $0x18] sm:$0xff]  ;;  %v10875_v36 = vld [vmem:[#allocation37_spill] sm:$0xff] }
 0x4ca   : > { %5130 = vmatprep.subr.bf16.mxu1 %v10828_v35  ;;  %v2729_v24 = vmax.f32 %v2575_v40, 0.0  ;;  %v10830_v50 = vcombine.low %v9294_v57, %v9296_v59  ;;  %v10831_v52 = vcombine.high %v9308_v63, %v9310_v0  ;;  %v6385_v10 = vmax.f32 %v6384_v12, %v2724_v38  ;;  %v9630_v42 = vld [vmem:[#allocation5 + $0x38] sm:$0xff] }
 0x4cb   : > { %4745 = vmatpush1.bf16.msra.mxu0 %v10829_v31  ;;  %v6459_v25 = vmax.f32 %v6458_v39, %v2726_v30  ;;  %v2728_v53 = vmax.f32 %v2384_v32, 0.0  ;;  %v2730_v35 = vmax.f32 %v2577_v15, 0.0  ;;  %v10832_v55 = vcombine.high %v9312_v20, %v9324_v5  ;;  %v2387_v15 = vpop.f32.mrb[96].mxu0  ;;  %v2580_v31 = vpop.f32.mrb[96].mxu1 }
 0x4cc   : > { %5131 = vmatpush1.bf16.msra.mxu1 %v10830_v50  ;;  %4746 = vmatprep.subr.bf16.mxu0 %v10831_v52  ;;  %v9632_v26 = vpack.c.bf16 %v2727_v9, %v2723_v54  ;;  %v6349_v57 = vmax.f32 %v6348_v48, %v2727_v9  ;;  %v9634_v59 = vpack.c.bf16 %v2729_v24, %v2725_v44  ;;  %v2389_v48 = vpop.f32.mrb[97].mxu0  ;;  %v2582_v44 = vpop.f32.mrb[97].mxu1 }
 0x4cd   : > { %5132 = vmatprep.subr.bf16.mxu1 %v10832_v55  ;;  %v6423_v45 = vmax.f32 %v6422_v3, %v2729_v24  ;;  %v9636_v40 = vpack.c.bf16 %v2728_v53, %v2724_v38  ;;  %v6386_v12 = vmax.f32 %v6385_v10, %v2728_v53  ;;  %v9638_v39 = vpack.c.bf16 %v2730_v35, %v2726_v30  ;;  %v2391_v30 = vpop.f32.mrb[98].mxu0  ;;  %v2584_v3 = vpop.f32.mrb[98].mxu1 }
 0x4ce   : > { %10833 = vst [vmem:[#allocation48_spill] sm:$0xff] %v9632_v26  ;;  %v6460_v32 = vmax.f32 %v6459_v25, %v2730_v35  ;;  %v10835_v50 = vcombine.low %v9308_v63, %v9310_v0  ;;  %v2388_v52 = vadd.f32 %v2387_v15, %v9299_v60  ;;  %v2581_v54 = vadd.f32 %v2580_v31, %v9306_v62  ;;  %v2393_v35 = vpop.f32.mrb[99].mxu0  ;;  %v2586_v55 = vpop.f32.mrb[99].mxu1 }
 0x4cf   : > { %10834 = vst [vmem:[#allocation49_spill] sm:$0xff] %v9636_v40  ;;  %v10836_v24 = vcombine.low %v9312_v20, %v9324_v5  ;;  %v10837_v53 = vcombine.high %v9326_v6, %v9328_v47  ;;  %v2390_v63 = vadd.f32 %v2389_v48, %v9302_v61  ;;  %v2583_v0 = vadd.f32 %v2582_v44, %v9316_v1 }
 0x4d0   : > { %4747 = vmatpush1.bf16.msra.mxu0 %v10835_v50  ;;  %4605 = vmatprep.mubr.bf16.mxu0 %v9636_v40  ;;  %v2731_v5 = vmax.f32 %v2388_v52, 0.0  ;;  %v2733_v9 = vmax.f32 %v2581_v54, 0.0  ;;  %v2392_v10 = vadd.f32 %v2391_v30, %v9299_v60  ;;  %v2585_v25 = vadd.f32 %v2584_v3, %v9306_v62 }
 0x4d1   : > { %5133 = vmatpush1.bf16.msra.mxu1 %v10836_v24  ;;  %4748 = vmatprep.subr.bf16.mxu0 %v10837_v53  ;;  %v2732_v15 = vmax.f32 %v2390_v63, 0.0  ;;  %v2734_v31 = vmax.f32 %v2583_v0, 0.0  ;;  %v2394_v50 = vadd.f32 %v2393_v35, %v9302_v61  ;;  %v2587_v48 = vadd.f32 %v2586_v55, %v9316_v1 }
 0x4d2   : > { %4991 = vmatprep.mubr.bf16.mxu1 %v9636_v40  ;;  %4606 = vmatmul.mubr.bf16.gmra.mrb[156].mxu0 %v9632_v26  ;;  %v10838_v52 = vcombine.high %v9338_v14, %v9340_v33  ;;  %v10839_v54 = vcombine.low %v9326_v6, %v9328_v47  ;;  %v6350_v44 = vmax.f32 %v6349_v57, %v2731_v5  ;;  %v2735_v53 = vmax.f32 %v2392_v10, 0.0  ;;  %v9680_v47 = vld [vmem:[#allocation5 + $0x788] sm:$0xff] }
 0x4d3   : > { %4992 = vmatmul.mubr.bf16.gmra.mrb[156].mxu1 %v9632_v26  ;;  %v6424_v24 = vmax.f32 %v6423_v45, %v2733_v9  ;;  %v2737_v30 = vmax.f32 %v2585_v25, 0.0  ;;  %v10840_v63 = vcombine.low %v9338_v14, %v9340_v33  ;;  %v10841_v0 = vcombine.high %v9342_v16, %v9352_v27  ;;  %v9682_v57 = vld [vmem:[#allocation5 + $0x7a8] sm:$0xff] }
 0x4d4   : > { %5134 = vmatprep.subr.bf16.mxu1 %v10838_v52  ;;  %4749 = vmatpush1.bf16.msra.mxu0 %v10839_v54  ;;  %v6387_v3 = vmax.f32 %v6386_v12, %v2732_v15  ;;  %v6461_v35 = vmax.f32 %v6460_v32, %v2734_v31  ;;  %v2736_v55 = vmax.f32 %v2394_v50, 0.0  ;;  %v2738_v52 = vmax.f32 %v2587_v48, 0.0  ;;  %v2397_v48 = vpop.f32.mrb[100].mxu0  ;;  %v2590_v54 = vpop.f32.mrb[100].mxu1 }
 0x4d5   : > { %5135 = vmatpush1.bf16.msra.mxu1 %v10840_v63  ;;  %4750 = vmatprep.subr.bf16.mxu0 %v10841_v0  ;;  %v10842_v6 = vcombine.high %v9354_v28, %v9356_v29  ;;  %v9684_v45 = vpack.c.bf16 %v2735_v53, %v2731_v5  ;;  %v6351_v14 = vmax.f32 %v6350_v44, %v2735_v53  ;;  %v2399_v44 = vpop.f32.mrb[101].mxu0 }
 0x4d6   : > { %v9686_v33 = vpack.c.bf16 %v2737_v30, %v2733_v9  ;;  %v6425_v10 = vmax.f32 %v6424_v24, %v2737_v30  ;;  %v9688_v25 = vpack.c.bf16 %v2736_v55, %v2732_v15  ;;  %v6388_v12 = vmax.f32 %v6387_v3, %v2736_v55  ;;  %v2592_v9 = vpop.f32.mrb[101].mxu1  ;;  %v2401_v30 = vpop.f32.mrb[102].mxu0 }
 0x4d7   : > { %5136 = vmatprep.subr.bf16.mxu1 %v10842_v6  ;;  %10843 = vst [vmem:[#allocation50_spill] sm:$0xff] %v9684_v45  ;;  %v9690_v32 = vpack.c.bf16 %v2738_v52, %v2734_v31  ;;  %v6462_v50 = vmax.f32 %v6461_v35, %v2738_v52  ;;  %v10845_v63 = vcombine.low %v9342_v16, %v9352_v27  ;;  %v10847_v31 = vld [vmem:[#allocation24_spill] sm:$0xff]  ;;  %v2594_v3 = vpop.f32.mrb[102].mxu1  ;;  %v2403_v6 = vpop.f32.mrb[103].mxu0 }
 0x4d8   : > { %10844 = vst [vmem:[#allocation51_spill] sm:$0xff] %v9688_v25  ;;  %v2398_v0 = vadd.f32 %v2397_v48, %v9299_v60  ;;  %v2591_v5 = vadd.f32 %v2590_v54, %v9306_v62  ;;  %v10846_v15 = vcombine.low %v9354_v28, %v9356_v29  ;;  %v10848_v24 = vcombine.high %v9366_v34, %v10847_v31  ;;  %v2596_v48 = vpop.f32.mrb[103].mxu1 }
 0x4d9   : > { %4751 = vmatpush1.bf16.msra.mxu0 %v10845_v63  ;;  %v2400_v16 = vadd.f32 %v2399_v44, %v9302_v61  ;;  %v2593_v27 = vadd.f32 %v2592_v9, %v9316_v1  ;;  %4615 = vmatprep.mubr.bf16.mxu0 %v9688_v25  ;;  %v2402_v55 = vadd.f32 %v2401_v30, %v9299_v60 }
 0x4da   : > { %5137 = vmatpush1.bf16.msra.mxu1 %v10846_v15  ;;  %4752 = vmatprep.subr.bf16.mxu0 %v10848_v24  ;;  %v2739_v29 = vmax.f32 %v2398_v0, 0.0  ;;  %v2741_v35 = vmax.f32 %v2591_v5, 0.0  ;;  %v2595_v52 = vadd.f32 %v2594_v3, %v9306_v62  ;;  %v2404_v44 = vadd.f32 %v2403_v6, %v9302_v61  ;;  %v10849_v15 = vld [vmem:[#allocation25_spill] sm:$0xff]  ;;  %v10850_v24 = vld [vmem:[#allocation26_spill] sm:$0xff]  ;;  %v10855_v6 = vld [vmem:[#allocation28_spill] sm:$0xff] }
 0x4db   : > { %5001 = vmatprep.mubr.bf16.mxu1 %v9688_v25  ;;  %4616 = vmatmul.mubr.bf16.gmra.mrb[160].mxu0 %v9684_v45  ;;  %v2740_v54 = vmax.f32 %v2400_v16, 0.0  ;;  %v2742_v63 = vmax.f32 %v2593_v27, 0.0  ;;  %v2597_v9 = vadd.f32 %v2596_v48, %v9316_v1  ;;  %v10851_v0 = vcombine.high %v10849_v15, %v10850_v24  ;;  %v10854_v27 = vld [vmem:[#allocation27_spill] sm:$0xff]  ;;  %v10858_v25 = vld [vmem:[#allocation30_spill] sm:$0xff] }
 0x4dc   : > { %5002 = vmatmul.mubr.bf16.gmra.mrb[160].mxu1 %v9684_v45  ;;  %v10852_v5 = vcombine.low %v9366_v34, %v10847_v31  ;;  %v6352_v30 = vmax.f32 %v6351_v14, %v2739_v29  ;;  %v6426_v3 = vmax.f32 %v6425_v10, %v2741_v35  ;;  %v2743_v38 = vmax.f32 %v2402_v55, 0.0  ;;  %v10857_v45 = vld [vmem:[#allocation29_spill] sm:$0xff]  ;;  %v9732_v14 = vld [vmem:[#allocation5 + $0x7c0] sm:$0xff] }
 0x4dd   : > { %5138 = vmatprep.subr.bf16.mxu1 %v10851_v0  ;;  %v2745_v53 = vmax.f32 %v2595_v52, 0.0  ;;  %v10853_v16 = vcombine.low %v10849_v15, %v10850_v24  ;;  %v10856_v20 = vcombine.high %v10854_v27, %v10855_v6  ;;  %v6389_v48 = vmax.f32 %v6388_v12, %v2740_v54  ;;  %v9734_v10 = vld [vmem:[#allocation5 + $0x7e0] sm:$0xff] }
 0x4de   : > { %4753 = vmatpush1.bf16.msra.mxu0 %v10852_v5  ;;  %v6463_v28 = vmax.f32 %v6462_v50, %v2742_v63  ;;  %v2744_v37 = vmax.f32 %v2404_v44, 0.0  ;;  %v2746_v0 = vmax.f32 %v2597_v9, 0.0  ;;  %v10859_v34 = vcombine.high %v10857_v45, %v10858_v25  ;;  %v2407_v44 = vpop.f32.mrb[104].mxu0  ;;  %v2600_v9 = vpop.f32.mrb[104].mxu1 }
 0x4df   : > { %5139 = vmatpush1.bf16.msra.mxu1 %v10853_v16  ;;  %4754 = vmatprep.subr.bf16.mxu0 %v10856_v20  ;;  %v9736_v31 = vpack.c.bf16 %v2743_v38, %v2739_v29  ;;  %v6353_v55 = vmax.f32 %v6352_v30, %v2743_v38  ;;  %v9738_v52 = vpack.c.bf16 %v2745_v53, %v2741_v35  ;;  %v2409_v38 = vpop.f32.mrb[105].mxu0  ;;  %v2602_v35 = vpop.f32.mrb[105].mxu1 }
 0x4e0   : > { %5140 = vmatprep.subr.bf16.mxu1 %v10859_v34  ;;  %v6427_v15 = vmax.f32 %v6426_v3, %v2745_v53  ;;  %v9740_v24 = vpack.c.bf16 %v2744_v37, %v2740_v54  ;;  %v6390_v20 = vmax.f32 %v6389_v48, %v2744_v37  ;;  %v9742_v12 = vpack.c.bf16 %v2746_v0, %v2742_v63  ;;  %v10864_v37 = vld [vmem:[#allocation31_spill] sm:$0xff]  ;;  %v10865_v54 = vld [vmem:[#allocation32_spill] sm:$0xff] }
 0x4e1   : > { %10860 = vst [vmem:[#allocation24_spill] sm:$0xff] %v9736_v31  ;;  %v6464_v50 = vmax.f32 %v6463_v28, %v2746_v0  ;;  %v10862_v5 = vcombine.low %v10854_v27, %v10855_v6  ;;  %v2408_v16 = vadd.f32 %v2407_v44, %v9299_v60  ;;  %v2601_v29 = vadd.f32 %v2600_v9, %v9306_v62  ;;  %v2411_v27 = vpop.f32.mrb[106].mxu0  ;;  %v2604_v6 = vpop.f32.mrb[106].mxu1 }
 0x4e2   : > { %10861 = vst [vmem:[#allocation25_spill] sm:$0xff] %v9740_v24  ;;  %v10863_v53 = vcombine.low %v10857_v45, %v10858_v25  ;;  %v10866_v63 = vcombine.high %v10864_v37, %v10865_v54  ;;  %v2410_v30 = vadd.f32 %v2409_v38, %v9302_v61  ;;  %v2603_v3 = vadd.f32 %v2602_v35, %v9316_v1  ;;  %v2413_v44 = vpop.f32.mrb[107].mxu0  ;;  %v2606_v9 = vpop.f32.mrb[107].mxu1  ;;  %v10868_v45 = vld [vmem:[#allocation34_spill] sm:$0xff] }
 0x4e3   : > { %4755 = vmatpush1.bf16.msra.mxu0 %v10862_v5  ;;  %4625 = vmatprep.mubr.bf16.mxu0 %v9740_v24  ;;  %v2747_v25 = vmax.f32 %v2408_v16, 0.0  ;;  %v2749_v48 = vmax.f32 %v2601_v29, 0.0  ;;  %v2412_v0 = vadd.f32 %v2411_v27, %v9299_v60  ;;  %v2605_v34 = vadd.f32 %v2604_v6, %v9306_v62 }
 0x4e4   : > { %5141 = vmatpush1.bf16.msra.mxu1 %v10863_v53  ;;  %4756 = vmatprep.subr.bf16.mxu0 %v10866_v63  ;;  %v2748_v5 = vmax.f32 %v2410_v30, 0.0  ;;  %v2750_v38 = vmax.f32 %v2603_v3, 0.0  ;;  %v2414_v35 = vadd.f32 %v2413_v44, %v9302_v61  ;;  %v2607_v53 = vadd.f32 %v2606_v9, %v9316_v1  ;;  %v10867_v63 = vld [vmem:[#allocation33_spill] sm:$0xff]  ;;  %v10872_v3 = vld [vmem:[#allocation35_spill] sm:$0xff]  ;;  %v10873_v44 = vld [vmem:[#allocation36_spill] sm:$0xff] }
 0x4e5   : > { %5011 = vmatprep.mubr.bf16.mxu1 %v9740_v24  ;;  %4626 = vmatmul.mubr.bf16.gmra.mrb[164].mxu0 %v9736_v31  ;;  %v10869_v16 = vcombine.high %v10867_v63, %v10868_v45  ;;  %v10870_v29 = vcombine.low %v10864_v37, %v10865_v54  ;;  %v6354_v27 = vmax.f32 %v6353_v55, %v2747_v25  ;;  %v2751_v28 = vmax.f32 %v2412_v0, 0.0  ;;  %v9784_v55 = vld [vmem:[#allocation5 + $0x7c8] sm:$0xff] }
 0x4e6   : > { %5012 = vmatmul.mubr.bf16.gmra.mrb[164].mxu1 %v9736_v31  ;;  %v6428_v6 = vmax.f32 %v6427_v15, %v2749_v48  ;;  %v2753_v24 = vmax.f32 %v2605_v34, 0.0  ;;  %v10871_v30 = vcombine.low %v10867_v63, %v10868_v45  ;;  %v10874_v31 = vcombine.high %v10872_v3, %v10873_v44  ;;  %v9786_v15 = vld [vmem:[#allocation5 + $0x7e8] sm:$0xff] }
 0x4e7   : > { %5142 = vmatprep.subr.bf16.mxu1 %v10869_v16  ;;  %4757 = vmatpush1.bf16.msra.mxu0 %v10870_v29  ;;  %v6391_v9 = vmax.f32 %v6390_v20, %v2748_v5  ;;  %v6465_v26 = vmax.f32 %v6464_v50, %v2750_v38  ;;  %v2752_v40 = vmax.f32 %v2414_v35, 0.0  ;;  %v2754_v16 = vmax.f32 %v2607_v53, 0.0  ;;  %v2417_v35 = vpop.f32.mrb[108].mxu0  ;;  %v2610_v53 = vpop.f32.mrb[108].mxu1 }
 0x4e8   : > { %5143 = vmatpush1.bf16.msra.mxu1 %v10871_v30  ;;  %4758 = vmatprep.subr.bf16.mxu0 %v10874_v31  ;;  %v10877_v37 = vcombine.high %v10875_v36, %v10876_v4  ;;  %v9788_v54 = vpack.c.bf16 %v2751_v28, %v2747_v25  ;;  %v6355_v45 = vmax.f32 %v6354_v27, %v2751_v28  ;;  %v2419_v28 = vpop.f32.mrb[109].mxu0 }
 0x4e9   : > { %v9790_v0 = vpack.c.bf16 %v2753_v24, %v2749_v48  ;;  %v6429_v34 = vmax.f32 %v6428_v6, %v2753_v24  ;;  %v9792_v63 = vpack.c.bf16 %v2752_v40, %v2748_v5  ;;  %v6392_v31 = vmax.f32 %v6391_v9, %v2752_v40  ;;  %v2612_v48 = vpop.f32.mrb[109].mxu1  ;;  %v10882_v40 = vld [vmem:[#allocation39_spill] sm:$0xff]  ;;  %v2421_v6 = vpop.f32.mrb[110].mxu0 }
 0x4ea   : > { %5144 = vmatprep.subr.bf16.mxu1 %v10877_v37  ;;  %10878 = vst [vmem:[#allocation26_spill] sm:$0xff] %v9788_v54  ;;  %v9794_v20 = vpack.c.bf16 %v2754_v16, %v2750_v38  ;;  %v6466_v50 = vmax.f32 %v6465_v26, %v2754_v16  ;;  %v10880_v29 = vcombine.low %v10872_v3, %v10873_v44  ;;  %v2614_v3 = vpop.f32.mrb[110].mxu1  ;;  %v2423_v37 = vpop.f32.mrb[111].mxu0 }
 0x4eb   : > { %10879 = vst [vmem:[#allocation27_spill] sm:$0xff] %v9792_v63  ;;  %v2418_v30 = vadd.f32 %v2417_v35, %v9299_v60  ;;  %v2611_v25 = vadd.f32 %v2610_v53, %v9306_v62  ;;  %v10881_v24 = vcombine.low %v10875_v36, %v10876_v4  ;;  %v10883_v5 = vcombine.high %v9446_v46, %v10882_v40  ;;  %v2616_v35 = vpop.f32.mrb[111].mxu1 }
 0x4ec   : > { %4759 = vmatpush1.bf16.msra.mxu0 %v10880_v29  ;;  %v2420_v38 = vadd.f32 %v2419_v28, %v9302_v61  ;;  %v2613_v27 = vadd.f32 %v2612_v48, %v9316_v1  ;;  %4635 = vmatprep.mubr.bf16.mxu0 %v9792_v63  ;;  %v2422_v9 = vadd.f32 %v2421_v6, %v9299_v60 }
 0x4ed   : > { %5145 = vmatpush1.bf16.msra.mxu1 %v10881_v24  ;;  %4760 = vmatprep.subr.bf16.mxu0 %v10883_v5  ;;  %v2755_v4 = vmax.f32 %v2418_v30, 0.0  ;;  %v2757_v44 = vmax.f32 %v2611_v25, 0.0  ;;  %v2615_v16 = vadd.f32 %v2614_v3, %v9306_v62  ;;  %v2424_v28 = vadd.f32 %v2423_v37, %v9302_v61 }
 0x4ee   : > { %5021 = vmatprep.mubr.bf16.mxu1 %v9792_v63  ;;  %4636 = vmatmul.mubr.bf16.gmra.mrb[168].mxu0 %v9788_v54  ;;  %v2756_v53 = vmax.f32 %v2420_v38, 0.0  ;;  %v2758_v29 = vmax.f32 %v2613_v27, 0.0  ;;  %v2617_v48 = vadd.f32 %v2616_v35, %v9316_v1  ;;  %v10884_v30 = vcombine.high %v9456_v7, %v9458_v49  ;;  %v10887_v27 = vld [vmem:[#allocation40_spill] sm:$0xff] }
 0x4ef   : > { %5022 = vmatmul.mubr.bf16.gmra.mrb[168].mxu1 %v9788_v54  ;;  %v10885_v25 = vcombine.low %v9446_v46, %v10882_v40  ;;  %v6356_v24 = vmax.f32 %v6355_v45, %v2755_v4  ;;  %v6430_v5 = vmax.f32 %v6429_v34, %v2757_v44  ;;  %v2759_v6 = vmax.f32 %v2422_v9, 0.0 }
 0x4f0   : > { %5146 = vmatprep.subr.bf16.mxu1 %v10884_v30  ;;  %v2761_v3 = vmax.f32 %v2615_v16, 0.0  ;;  %v10886_v38 = vcombine.low %v9456_v7, %v9458_v49  ;;  %v10888_v37 = vcombine.high %v9478_v19, %v10887_v27  ;;  %v6393_v35 = vmax.f32 %v6392_v31, %v2756_v53  ;;  %v2427_v31 = vpop.f32.mrb[112].mxu0 }
 0x4f1   : > { %4761 = vmatpush1.bf16.msra.mxu0 %v10885_v25  ;;  %v6467_v26 = vmax.f32 %v6466_v50, %v2758_v29  ;;  %v2760_v36 = vmax.f32 %v2424_v28, 0.0  ;;  %v2762_v30 = vmax.f32 %v2617_v48, 0.0  ;;  %v10889_v46 = vcombine.high %v9520_v22, %v9522_v11  ;;  %v2620_v50 = vpop.f32.mrb[112].mxu1 }
 0x4f2   : > { %5147 = vmatpush1.bf16.msra.mxu1 %v10886_v38  ;;  %4762 = vmatprep.subr.bf16.mxu0 %v10888_v37  ;;  %v9836_v45 = vpack.c.bf16 %v2759_v6, %v2755_v4  ;;  %v6357_v34 = vmax.f32 %v6356_v24, %v2759_v6  ;;  %v9838_v40 = vpack.c.bf16 %v2761_v3, %v2757_v44  ;;  %v2429_v24 = vpop.f32.mrb[113].mxu0  ;;  %v2622_v44 = vpop.f32.mrb[113].mxu1 }
 0x4f3   : > { %5148 = vmatprep.subr.bf16.mxu1 %v10889_v46  ;;  %v6431_v9 = vmax.f32 %v6430_v5, %v2761_v3  ;;  %v9840_v7 = vpack.c.bf16 %v2760_v36, %v2756_v53  ;;  %v6394_v49 = vmax.f32 %v6393_v35, %v2760_v36  ;;  %v9842_v16 = vpack.c.bf16 %v2762_v30, %v2758_v29  ;;  %v2431_v5 = vpop.f32.mrb[114].mxu0  ;;  %v2624_v6 = vpop.f32.mrb[114].mxu1 }
 0x4f4   : > { %10890 = vst [vmem:[#allocation28_spill] sm:$0xff] %v9836_v45  ;;  %v6468_v25 = vmax.f32 %v6467_v26, %v2762_v30  ;;  %v10892_v28 = vcombine.low %v9478_v19, %v10887_v27  ;;  %v2428_v48 = vadd.f32 %v2427_v31, %v9299_v60  ;;  %v2621_v4 = vadd.f32 %v2620_v50, %v9306_v62  ;;  %v2433_v37 = vpop.f32.mrb[115].mxu0  ;;  %v2626_v35 = vpop.f32.mrb[115].mxu1 }
 0x4f5   : > { %10891 = vst [vmem:[#allocation29_spill] sm:$0xff] %v9840_v7  ;;  %v10893_v53 = vcombine.low %v9520_v22, %v9522_v11  ;;  %v10894_v36 = vcombine.high %v9580_v8, %v9582_v13  ;;  %v7320_v26 = vcombine.high %v9572_v41, %v9574_v21  ;;  %v2430_v19 = vadd.f32 %v2429_v24, %v9302_v61 }
 0x4f6   : > { %4763 = vmatpush1.bf16.msra.mxu0 %v10892_v28  ;;  %v2623_v29 = vadd.f32 %v2622_v44, %v9316_v1  ;;  %4645 = vmatprep.mubr.bf16.mxu0 %v9840_v7  ;;  %v7322_v22 = vcombine.high %v9628_v56, %v9630_v42  ;;  %v2763_v11 = vmax.f32 %v2428_v48, 0.0  ;;  %v2765_v3 = vmax.f32 %v2621_v4, 0.0 }
 0x4f7   : > { %5149 = vmatpush1.bf16.msra.mxu1 %v10893_v53  ;;  %4764 = vmatprep.subr.bf16.mxu0 %v10894_v36  ;;  %v2432_v38 = vadd.f32 %v2431_v5, %v9299_v60  ;;  %v2625_v27 = vadd.f32 %v2624_v6, %v9306_v62  ;;  %v2764_v30 = vmax.f32 %v2430_v19, 0.0  ;;  %v2434_v31 = vadd.f32 %v2433_v37, %v9302_v61 }
 0x4f8   : > { %5031 = vmatprep.mubr.bf16.mxu1 %v9840_v7  ;;  %4646 = vmatmul.mubr.bf16.gmra.mrb[172].mxu0 %v9836_v45  ;;  %v2766_v46 = vmax.f32 %v2623_v29, 0.0  ;;  %v2627_v50 = vadd.f32 %v2626_v35, %v9316_v1  ;;  %v10895_v28 = vcombine.high %v9680_v47, %v9682_v57  ;;  %v10896_v48 = vcombine.low %v9580_v8, %v9582_v13 }
 0x4f9   : > { %5032 = vmatmul.mubr.bf16.gmra.mrb[172].mxu1 %v9836_v45  ;;  %v6358_v4 = vmax.f32 %v6357_v34, %v2763_v11  ;;  %v6432_v24 = vmax.f32 %v6431_v9, %v2765_v3  ;;  %v2767_v44 = vmax.f32 %v2432_v38, 0.0  ;;  %v2769_v53 = vmax.f32 %v2625_v27, 0.0 }
 0x4fa   : > { %5150 = vmatprep.subr.bf16.mxu1 %v10895_v28  ;;  %4765 = vmatpush1.bf16.msra.mxu0 %v10896_v48  ;;  %v10897_v36 = vcombine.low %v9680_v47, %v9682_v57  ;;  %v10898_v19 = vcombine.high %v9732_v14, %v9734_v10  ;;  %v6395_v29 = vmax.f32 %v6394_v49, %v2764_v30  ;;  %v2768_v6 = vmax.f32 %v2434_v31, 0.0  ;;  %v2437_v49 = vpop.f32.mrb[116].mxu0 }
 0x4fb   : > { %v6469_v5 = vmax.f32 %v6468_v25, %v2766_v46  ;;  %v2770_v37 = vmax.f32 %v2627_v50, 0.0  ;;  %v10899_v8 = vcombine.high %v9784_v55, %v9786_v15  ;;  %v9884_v13 = vpack.c.bf16 %v2767_v44, %v2763_v11  ;;  %v2630_v25 = vpop.f32.mrb[116].mxu1  ;;  %v2439_v28 = vpop.f32.mrb[117].mxu0 }
 0x4fc   : > { %5151 = vmatpush1.bf16.msra.mxu1 %v10897_v36  ;;  %4766 = vmatprep.subr.bf16.mxu0 %v10898_v19  ;;  %v6359_v34 = vmax.f32 %v6358_v4, %v2767_v44  ;;  %v9886_v9 = vpack.c.bf16 %v2769_v53, %v2765_v3  ;;  %v6433_v38 = vmax.f32 %v6432_v24, %v2769_v53  ;;  %v2632_v3 = vpop.f32.mrb[117].mxu1  ;;  %v2441_v4 = vpop.f32.mrb[118].mxu0 }
 0x4fd   : > { %5152 = vmatprep.subr.bf16.mxu1 %v10899_v8  ;;  %10900 = vst [vmem:[#allocation30_spill] sm:$0xff] %v9884_v13  ;;  %v9888_v47 = vpack.c.bf16 %v2768_v6, %v2764_v30  ;;  %v6396_v57 = vmax.f32 %v6395_v29, %v2768_v6  ;;  %v9890_v27 = vpack.c.bf16 %v2770_v37, %v2766_v46  ;;  %v2634_v24 = vpop.f32.mrb[118].mxu1  ;;  %v2443_v36 = vpop.f32.mrb[119].mxu0 }
 0x4fe   : > { %v6470_v35 = vmax.f32 %v6469_v5, %v2770_v37  ;;  %v10902_v31 = vcombine.low %v9732_v14, %v9734_v10  ;;  %v2438_v50 = vadd.f32 %v2437_v49, %v9299_v60  ;;  %v2631_v11 = vadd.f32 %v2630_v25, %v9306_v62 }
 0x4ff   : > { %10901 = vst [vmem:[#allocation31_spill] sm:$0xff] %v9888_v47  ;;  %v10903_v30 = vcombine.low %v9784_v55, %v9786_v15  ;;  %v2440_v46 = vadd.f32 %v2439_v28, %v9302_v61  ;;  %v2633_v48 = vadd.f32 %v2632_v3, %v9316_v1  ;;  %4655 = vmatprep.mubr.bf16.mxu0 %v9888_v47  ;;  %v2636_v55 = vpop.f32.mrb[119].mxu1 }
 0x500   : > { %4767 = vmatpush1.bf16.msra.mxu0 %v10902_v31  ;;  %5041 = vmatprep.mubr.bf16.mxu1 %v9888_v47  ;;  %v2771_v14 = vmax.f32 %v2438_v50, 0.0  ;;  %v2773_v10 = vmax.f32 %v2631_v11, 0.0  ;;  %v2442_v44 = vadd.f32 %v2441_v4, %v9299_v60  ;;  %v2635_v53 = vadd.f32 %v2634_v24, %v9306_v62 }
 0x501   : > { %5153 = vmatpush1.bf16.msra.mxu1 %v10903_v30  ;;  %5315 = vmatprep.subr.bf16.mxu0 %v7320_v26  ;;  %v2772_v15 = vmax.f32 %v2440_v46, 0.0  ;;  %v2774_v26 = vmax.f32 %v2633_v48, 0.0  ;;  %v2444_v19 = vadd.f32 %v2443_v36, %v9302_v61  ;;  %v2637_v29 = vadd.f32 %v2636_v55, %v9316_v1 }
 0x502   : > { %4656 = vmatmul.mubr.bf16.gmra.mrb[176].mxu0 %v9884_v13  ;;  %5042 = vmatmul.mubr.bf16.gmra.mrb[176].mxu1 %v9884_v13  ;;  %v6360_v5 = vmax.f32 %v6359_v34, %v2771_v14  ;;  %v6434_v6 = vmax.f32 %v6433_v38, %v2773_v10  ;;  %v2775_v37 = vmax.f32 %v2442_v44, 0.0  ;;  %v2777_v8 = vmax.f32 %v2635_v53, 0.0  ;;  %v2447_v34 = vpop.f32.mrb[120].mxu0  ;;  %v2640_v38 = vpop.f32.mrb[120].mxu1 }
 0x503   : > { %5701 = vmatprep.subr.bf16.mxu1 %v7322_v22  ;;  %v6397_v49 = vmax.f32 %v6396_v57, %v2772_v15  ;;  %v6471_v25 = vmax.f32 %v6470_v35, %v2774_v26  ;;  %v2776_v31 = vmax.f32 %v2444_v19, 0.0  ;;  %v2778_v50 = vmax.f32 %v2637_v29, 0.0  ;;  %v2449_v35 = vpop.f32.mrb[121].mxu0  ;;  %v2642_v44 = vpop.f32.mrb[121].mxu1 }
 0x504   : > { %v9910_v11 = vpack.c.bf16 %v2775_v37, %v2771_v14  ;;  %v6361_v28 = vmax.f32 %v6360_v5, %v2775_v37  ;;  %v9912_v3 = vpack.c.bf16 %v2777_v8, %v2773_v10  ;;  %v6435_v30 = vmax.f32 %v6434_v6, %v2777_v8  ;;  %v2451_v53 = vpop.f32.mrb[122].mxu0  ;;  %v2644_v36 = vpop.f32.mrb[122].mxu1 }
 0x505   : > { %v9914_v46 = vpack.c.bf16 %v2776_v31, %v2772_v15  ;;  %v6398_v48 = vmax.f32 %v6397_v49, %v2776_v31  ;;  %v9916_v4 = vpack.c.bf16 %v2778_v50, %v2774_v26  ;;  %v6472_v22 = vmax.f32 %v6471_v25, %v2778_v50  ;;  %v2453_v29 = vpop.f32.mrb[123].mxu0  ;;  %v2646_v5 = vpop.f32.mrb[123].mxu1 }
 0x506   : > { %10904 = vst [vmem:[#allocation32_spill] sm:$0xff] %v9910_v11  ;;  %v2448_v24 = vadd.f32 %v2447_v34, %v9299_v60  ;;  %v2641_v57 = vadd.f32 %v2640_v38, %v9306_v62  ;;  %v2450_v14 = vadd.f32 %v2449_v35, %v9302_v61  ;;  %v2643_v10 = vadd.f32 %v2642_v44, %v9316_v1 }
 0x507   : > { %10905 = vst [vmem:[#allocation33_spill] sm:$0xff] %v9914_v46  ;;  %4665 = vmatprep.mubr.bf16.mxu0 %v9914_v46  ;;  %5051 = vmatprep.mubr.bf16.mxu1 %v9914_v46  ;;  %v2452_v26 = vadd.f32 %v2451_v53, %v9299_v60  ;;  %v2645_v19 = vadd.f32 %v2644_v36, %v9306_v62 }
 0x508   : > { %v2779_v55 = vmax.f32 %v2448_v24, 0.0  ;;  %v2781_v15 = vmax.f32 %v2641_v57, 0.0  ;;  %v2780_v6 = vmax.f32 %v2450_v14, 0.0  ;;  %v2782_v37 = vmax.f32 %v2643_v10, 0.0 }
 0x509   : > { %v2454_v8 = vadd.f32 %v2453_v29, %v9302_v61  ;;  %v2647_v49 = vadd.f32 %v2646_v5, %v9316_v1  ;;  %v2783_v50 = vmax.f32 %v2452_v26, 0.0  ;;  %v2785_v34 = vmax.f32 %v2645_v19, 0.0 }
 0x50a   : > { %4666 = vmatmul.mubr.bf16.gmra.mrb[180].mxu0 %v9910_v11  ;;  %5052 = vmatmul.mubr.bf16.gmra.mrb[180].mxu1 %v9910_v11  ;;  %v6362_v25 = vmax.f32 %v6361_v28, %v2779_v55  ;;  %v6436_v31 = vmax.f32 %v6435_v30, %v2781_v15  ;;  %v6399_v38 = vmax.f32 %v6398_v48, %v2780_v6  ;;  %v2457_v28 = vpop.f32.mrb[124].mxu0  ;;  %v2650_v30 = vpop.f32.mrb[124].mxu1 }
 0x50b   : > { %v6473_v24 = vmax.f32 %v6472_v22, %v2782_v37  ;;  %v2784_v57 = vmax.f32 %v2454_v8, 0.0  ;;  %v2786_v35 = vmax.f32 %v2647_v49, 0.0  ;;  %v9930_v44 = vpack.c.bf16 %v2783_v50, %v2779_v55  ;;  %v2459_v22 = vpop.f32.mrb[125].mxu0  ;;  %v2652_v19 = vpop.f32.mrb[125].mxu1 }
 0x50c   : > { %v6363_v53 = vmax.f32 %v6362_v25, %v2783_v50  ;;  %v9932_v36 = vpack.c.bf16 %v2785_v34, %v2781_v15  ;;  %v6437_v11 = vmax.f32 %v6436_v31, %v2785_v34  ;;  %v2458_v26 = vadd.f32 %v2457_v28, %v9299_v60  ;;  %v2461_v8 = vpop.f32.mrb[126].mxu0  ;;  %v2654_v49 = vpop.f32.mrb[126].mxu1 }
 0x50d   : > { %10906 = vst [vmem:[#allocation34_spill] sm:$0xff] %v9930_v44  ;;  %v9934_v14 = vpack.c.bf16 %v2784_v57, %v2780_v6  ;;  %v6400_v10 = vmax.f32 %v6399_v38, %v2784_v57  ;;  %v9936_v29 = vpack.c.bf16 %v2786_v35, %v2782_v37  ;;  %v6474_v5 = vmax.f32 %v6473_v24, %v2786_v35  ;;  %v2463_v50 = vpop.f32.mrb[127].mxu0  ;;  %v2656_v34 = vpop.f32.mrb[127].mxu1 }
 0x50e   : > { %v2651_v48 = vadd.f32 %v2650_v30, %v9306_v62  ;;  %v2460_v55 = vadd.f32 %v2459_v22, %v9302_v61  ;;  %v2653_v15 = vadd.f32 %v2652_v19, %v9316_v1  ;;  %v2787_v6 = vmax.f32 %v2458_v26, 0.0 }
 0x50f   : > { %10907 = vst [vmem:[#allocation35_spill] sm:$0xff] %v9934_v14  ;;  %4675 = vmatprep.mubr.bf16.mxu0 %v9934_v14  ;;  %5061 = vmatprep.mubr.bf16.mxu1 %v9934_v14  ;;  %v2462_v25 = vadd.f32 %v2461_v8, %v9299_v60  ;;  %v2655_v31 = vadd.f32 %v2654_v49, %v9306_v62 }
 0x510   : > { %v2789_v37 = vmax.f32 %v2651_v48, 0.0  ;;  %v2788_v38 = vmax.f32 %v2460_v55, 0.0  ;;  %v2790_v24 = vmax.f32 %v2653_v15, 0.0  ;;  %v2464_v57 = vadd.f32 %v2463_v50, %v9302_v61 }
 0x511   : > { %v2657_v35 = vadd.f32 %v2656_v34, %v9316_v1  ;;  %v6364_v28 = vmax.f32 %v6363_v53, %v2787_v6  ;;  %v2791_v26 = vmax.f32 %v2462_v25, 0.0  ;;  %v2793_v48 = vmax.f32 %v2655_v31, 0.0  ;;  %v2467_v53 = vpop.f32.mrb[128].mxu0 }
 0x512   : > { %4676 = vmatmul.mubr.bf16.gmra.mrb[184].mxu0 %v9930_v44  ;;  %5062 = vmatmul.mubr.bf16.gmra.mrb[184].mxu1 %v9930_v44  ;;  %v6438_v30 = vmax.f32 %v6437_v11, %v2789_v37  ;;  %v6401_v22 = vmax.f32 %v6400_v10, %v2788_v38  ;;  %v6475_v19 = vmax.f32 %v6474_v5, %v2790_v24  ;;  %v2792_v8 = vmax.f32 %v2464_v57, 0.0  ;;  %v2660_v11 = vpop.f32.mrb[128].mxu1  ;;  %v2469_v5 = vpop.f32.mrb[129].mxu0 }
 0x513   : > { %v2794_v49 = vmax.f32 %v2657_v35, 0.0  ;;  %v9950_v14 = vpack.c.bf16 %v2791_v26, %v2787_v6  ;;  %v6365_v46 = vmax.f32 %v6364_v28, %v2791_v26  ;;  %v9952_v13 = vpack.c.bf16 %v2793_v48, %v2789_v37  ;;  %v2662_v31 = vpop.f32.mrb[129].mxu1  ;;  %v2471_v57 = vpop.f32.mrb[130].mxu0 }
 0x514   : > { %v6439_v44 = vmax.f32 %v6438_v30, %v2793_v48  ;;  %v9954_v55 = vpack.c.bf16 %v2792_v8, %v2788_v38  ;;  %v6402_v15 = vmax.f32 %v6401_v22, %v2792_v8  ;;  %v2468_v25 = vadd.f32 %v2467_v53, %v9299_v60  ;;  %v2664_v35 = vpop.f32.mrb[130].mxu1  ;;  %v2473_v26 = vpop.f32.mrb[131].mxu0 }
 0x515   : > { %10908 = vst [vmem:[#allocation36_spill] sm:$0xff] %v9950_v14  ;;  %v9956_v50 = vpack.c.bf16 %v2794_v49, %v2790_v24  ;;  %v6476_v34 = vmax.f32 %v6475_v19, %v2794_v49  ;;  %v2661_v10 = vadd.f32 %v2660_v11, %v9306_v62  ;;  %v2470_v6 = vadd.f32 %v2469_v5, %v9302_v61  ;;  %v2666_v48 = vpop.f32.mrb[131].mxu1 }
 0x516   : > { %10909 = vst [vmem:[#allocation37_spill] sm:$0xff] %v9954_v55  ;;  %v2663_v37 = vadd.f32 %v2662_v31, %v9316_v1  ;;  %4685 = vmatprep.mubr.bf16.mxu0 %v9954_v55  ;;  %5071 = vmatprep.mubr.bf16.mxu1 %v9954_v55  ;;  %v2795_v38 = vmax.f32 %v2468_v25, 0.0  ;;  %v2472_v28 = vadd.f32 %v2471_v57, %v9299_v60 }
 0x517   : > { %v2797_v24 = vmax.f32 %v2661_v10, 0.0  ;;  %v2665_v30 = vadd.f32 %v2664_v35, %v9306_v62  ;;  %v2796_v22 = vmax.f32 %v2470_v6, 0.0  ;;  %v2474_v8 = vadd.f32 %v2473_v26, %v9302_v61 }
 0x518   : > { %v2798_v19 = vmax.f32 %v2663_v37, 0.0  ;;  %v2667_v49 = vadd.f32 %v2666_v48, %v9316_v1  ;;  %v6366_v53 = vmax.f32 %v6365_v46, %v2795_v38  ;;  %v2799_v25 = vmax.f32 %v2472_v28, 0.0  ;;  %v2477_v46 = vpop.f32.mrb[132].mxu0 }
 0x519   : > { %v6440_v11 = vmax.f32 %v6439_v44, %v2797_v24  ;;  %v2801_v10 = vmax.f32 %v2665_v30, 0.0  ;;  %v6403_v5 = vmax.f32 %v6402_v15, %v2796_v22  ;;  %v2800_v57 = vmax.f32 %v2474_v8, 0.0  ;;  %v2670_v44 = vpop.f32.mrb[132].mxu1 }
 0x51a   : > { %4686 = vmatmul.mubr.bf16.gmra.mrb[188].mxu0 %v9950_v14  ;;  %5072 = vmatmul.mubr.bf16.gmra.mrb[188].mxu1 %v9950_v14  ;;  %v6477_v31 = vmax.f32 %v6476_v34, %v2798_v19  ;;  %v2802_v35 = vmax.f32 %v2667_v49, 0.0  ;;  %v9970_v55 = vpack.c.bf16 %v2799_v25, %v2795_v38  ;;  %v6367_v47 = vmax.f32 %v6366_v53, %v2799_v25  ;;  %v2479_v34 = vpop.f32.mrb[133].mxu0  ;;  %v2672_v30 = vpop.f32.mrb[133].mxu1 }
 0x51b   : > { %v9972_v45 = vpack.c.bf16 %v2801_v10, %v2797_v24  ;;  %v6441_v14 = vmax.f32 %v6440_v11, %v2801_v10  ;;  %v9974_v6 = vpack.c.bf16 %v2800_v57, %v2796_v22  ;;  %v6404_v37 = vmax.f32 %v6403_v5, %v2800_v57  ;;  %v2481_v8 = vpop.f32.mrb[134].mxu0  ;;  %v2674_v49 = vpop.f32.mrb[134].mxu1 }
 0x51c   : > { %10910 = vst [vmem:[#allocation38_spill] sm:$0xff] %v9970_v55  ;;  %v9976_v26 = vpack.c.bf16 %v2802_v35, %v2798_v19  ;;  %v6478_v48 = vmax.f32 %v6477_v31, %v2802_v35  ;;  %v2478_v28 = vadd.f32 %v2477_v46, %v9299_v60  ;;  %v2671_v15 = vadd.f32 %v2670_v44, %v9306_v62  ;;  %v2483_v25 = vpop.f32.mrb[135].mxu0  ;;  %v2676_v10 = vpop.f32.mrb[135].mxu1 }
 0x51d   : > { %10911 = vst [vmem:[#allocation39_spill] sm:$0xff] %v9974_v6  ;;  %v2480_v38 = vadd.f32 %v2479_v34, %v9302_v61  ;;  %v2673_v24 = vadd.f32 %v2672_v30, %v9316_v1  ;;  %4695 = vmatprep.mubr.bf16.mxu0 %v9974_v6  ;;  %5081 = vmatprep.mubr.bf16.mxu1 %v9974_v6 }
 0x51e   : > { %v2803_v22 = vmax.f32 %v2478_v28, 0.0  ;;  %v2805_v19 = vmax.f32 %v2671_v15, 0.0  ;;  %v2482_v53 = vadd.f32 %v2481_v8, %v9299_v60  ;;  %v2675_v11 = vadd.f32 %v2674_v49, %v9306_v62 }
 0x51f   : > { %v2804_v5 = vmax.f32 %v2480_v38, 0.0  ;;  %v2806_v31 = vmax.f32 %v2673_v24, 0.0  ;;  %v2484_v57 = vadd.f32 %v2483_v25, %v9302_v61  ;;  %v2677_v35 = vadd.f32 %v2676_v10, %v9316_v1 }
 0x520   : > { %v6368_v46 = vmax.f32 %v6367_v47, %v2803_v22  ;;  %v6442_v44 = vmax.f32 %v6441_v14, %v2805_v19  ;;  %v2807_v28 = vmax.f32 %v2482_v53, 0.0  ;;  %v2809_v15 = vmax.f32 %v2675_v11, 0.0  ;;  %v2487_v47 = vpop.f32.mrb[136].mxu0  ;;  %v2680_v14 = vpop.f32.mrb[136].mxu1 }
 0x521   : > { %v6405_v34 = vmax.f32 %v6404_v37, %v2804_v5  ;;  %v6479_v30 = vmax.f32 %v6478_v48, %v2806_v31  ;;  %v2808_v8 = vmax.f32 %v2484_v57, 0.0  ;;  %v2810_v49 = vmax.f32 %v2677_v35, 0.0  ;;  %v2489_v48 = vpop.f32.mrb[137].mxu0  ;;  %v2682_v11 = vpop.f32.mrb[137].mxu1 }
 0x522   : > { %4696 = vmatmul.mubr.bf16.gmra.mrb[192].mxu0 %v9970_v55  ;;  %5082 = vmatmul.mubr.bf16.gmra.mrb[192].mxu1 %v9970_v55  ;;  %v9990_v6 = vpack.c.bf16 %v2807_v28, %v2803_v22  ;;  %v6369_v7 = vmax.f32 %v6368_v46, %v2807_v28  ;;  %v9992_v54 = vpack.c.bf16 %v2809_v15, %v2805_v19  ;;  %v2491_v57 = vpop.f32.mrb[138].mxu0  ;;  %v2684_v35 = vpop.f32.mrb[138].mxu1 }
 0x523   : > { %v6443_v55 = vmax.f32 %v6442_v44, %v2809_v15  ;;  %v9994_v38 = vpack.c.bf16 %v2808_v8, %v2804_v5  ;;  %v6406_v24 = vmax.f32 %v6405_v34, %v2808_v8  ;;  %v9996_v25 = vpack.c.bf16 %v2810_v49, %v2806_v31  ;;  %v2493_v28 = vpop.f32.mrb[139].mxu0  ;;  %v2686_v15 = vpop.f32.mrb[139].mxu1 }
 0x524   : > { %10912 = vst [vmem:[#allocation40_spill] sm:$0xff] %v9990_v6  ;;  %v6480_v10 = vmax.f32 %v6479_v30, %v2810_v49  ;;  %v2488_v53 = vadd.f32 %v2487_v47, %v9299_v60  ;;  %v2681_v37 = vadd.f32 %v2680_v14, %v9306_v62  ;;  %v2490_v22 = vadd.f32 %v2489_v48, %v9302_v61 }
 0x525   : > { %10913 = vst [vmem:[#allocation52_spill] sm:$0xff] %v9994_v38  ;;  %v2683_v19 = vadd.f32 %v2682_v11, %v9316_v1  ;;  %4705 = vmatprep.mubr.bf16.mxu0 %v9994_v38  ;;  %5091 = vmatprep.mubr.bf16.mxu1 %v9994_v38  ;;  %v2492_v46 = vadd.f32 %v2491_v57, %v9299_v60 }
 0x526   : > { %v2811_v5 = vmax.f32 %v2488_v53, 0.0  ;;  %v2813_v31 = vmax.f32 %v2681_v37, 0.0  ;;  %v2685_v44 = vadd.f32 %v2684_v35, %v9306_v62  ;;  %v2812_v34 = vmax.f32 %v2490_v22, 0.0 }
 0x527   : > { %v2814_v30 = vmax.f32 %v2683_v19, 0.0  ;;  %v2494_v8 = vadd.f32 %v2493_v28, %v9302_v61  ;;  %v2687_v49 = vadd.f32 %v2686_v15, %v9316_v1  ;;  %v2815_v53 = vmax.f32 %v2492_v46, 0.0 }
 0x528   : > { %v6370_v47 = vmax.f32 %v6369_v7, %v2811_v5  ;;  %v6444_v14 = vmax.f32 %v6443_v55, %v2813_v31  ;;  %v2817_v37 = vmax.f32 %v2685_v44, 0.0  ;;  %v6407_v48 = vmax.f32 %v6406_v24, %v2812_v34  ;;  %v2497_v7 = vpop.f32.mrb[140].mxu0  ;;  %v2690_v55 = vpop.f32.mrb[140].mxu1 }
 0x529   : > { %v6481_v11 = vmax.f32 %v6480_v10, %v2814_v30  ;;  %v2816_v57 = vmax.f32 %v2494_v8, 0.0  ;;  %v2818_v35 = vmax.f32 %v2687_v49, 0.0  ;;  %v10010_v38 = vpack.c.bf16 %v2815_v53, %v2811_v5  ;;  %v2499_v10 = vpop.f32.mrb[141].mxu0  ;;  %v2692_v44 = vpop.f32.mrb[141].mxu1 }
 0x52a   : > { %4706 = vmatmul.mubr.bf16.gmra.mrb[196].mxu0 %v9990_v6  ;;  %5092 = vmatmul.mubr.bf16.gmra.mrb[196].mxu1 %v9990_v6  ;;  %v6371_v63 = vmax.f32 %v6370_v47, %v2815_v53  ;;  %v10012_v17 = vpack.c.bf16 %v2817_v37, %v2813_v31  ;;  %v6445_v6 = vmax.f32 %v6444_v14, %v2817_v37  ;;  %v2501_v8 = vpop.f32.mrb[142].mxu0  ;;  %v2694_v49 = vpop.f32.mrb[142].mxu1 }
 0x52b   : > { %10914 = vst [vmem:[#allocation53_spill] sm:$0xff] %v10010_v38  ;;  %v10014_v22 = vpack.c.bf16 %v2816_v57, %v2812_v34  ;;  %v6408_v19 = vmax.f32 %v6407_v48, %v2816_v57  ;;  %v10016_v28 = vpack.c.bf16 %v2818_v35, %v2814_v30  ;;  %v6482_v15 = vmax.f32 %v6481_v11, %v2818_v35  ;;  %v2503_v53 = vpop.f32.mrb[143].mxu0  ;;  %v2696_v37 = vpop.f32.mrb[143].mxu1 }
 0x52c   : > { %v2498_v46 = vadd.f32 %v2497_v7, %v9299_v60  ;;  %v2691_v24 = vadd.f32 %v2690_v55, %v9306_v62  ;;  %v2500_v5 = vadd.f32 %v2499_v10, %v9302_v61  ;;  %v2693_v31 = vadd.f32 %v2692_v44, %v9316_v1 }
 0x52d   : > { %10915 = vst [vmem:[#allocation54_spill] sm:$0xff] %v10014_v22  ;;  %4715 = vmatprep.mubr.bf16.mxu0 %v10014_v22  ;;  %5101 = vmatprep.mubr.bf16.mxu1 %v10014_v22  ;;  %v2502_v47 = vadd.f32 %v2501_v8, %v9299_v60  ;;  %v2695_v14 = vadd.f32 %v2694_v49, %v9306_v62 }
 0x52e   : > { %v2819_v34 = vmax.f32 %v2498_v46, 0.0  ;;  %v2821_v30 = vmax.f32 %v2691_v24, 0.0  ;;  %v2820_v48 = vmax.f32 %v2500_v5, 0.0  ;;  %v2822_v11 = vmax.f32 %v2693_v31, 0.0 }
 0x52f   : > { %v2504_v57 = vadd.f32 %v2503_v53, %v9302_v61  ;;  %v2697_v35 = vadd.f32 %v2696_v37, %v9316_v1  ;;  %v2823_v46 = vmax.f32 %v2502_v47, 0.0  ;;  %v2825_v24 = vmax.f32 %v2695_v14, 0.0  ;;  %v10918_v53 = vld [vmem:[#allocation43_spill] sm:$0xff] }
 0x530   : > { %v6372_v7 = vmax.f32 %v6371_v63, %v2819_v34  ;;  %v6446_v55 = vmax.f32 %v6445_v6, %v2821_v30  ;;  %v6409_v10 = vmax.f32 %v6408_v19, %v2820_v48  ;;  %v6483_v60 = vmax.f32 %v6482_v15, %v2822_v11 }
 0x531   : > { %v2824_v44 = vmax.f32 %v2504_v57, 0.0  ;;  %v2826_v62 = vmax.f32 %v2697_v35, 0.0  ;;  %v10030_v8 = vpack.c.bf16 %v2823_v46, %v2819_v34  ;;  %v10032_v22 = vpack.c.bf16 %v2825_v24, %v2821_v30  ;;  %v2975_v35 = vld [vmem:[#allocation5 + $0x50] sm:$0xff] }
 0x532   : > { %4716 = vmatmul.mubr.bf16.gmra.mrb[200].mxu0 %v10010_v38  ;;  %5102 = vmatmul.mubr.bf16.gmra.mrb[200].mxu1 %v10010_v38  ;;  %v6373_v49 = vmax.f32 %v6372_v7, %v2823_v46  ;;  %v6447_v38 = vmax.f32 %v6446_v55, %v2825_v24  ;;  %v2979_v46 = vld [vmem:[#allocation5 + $0x70] sm:$0xff]  ;;  %v2976_v24 = vld [vmem:[#allocation5 + $0x58] sm:$0xff] }
 0x533   : > { %10916 = vst [vmem:[#allocation55_spill] sm:$0xff] %v10030_v8  ;;  %v10034_v5 = vpack.c.bf16 %v2824_v44, %v2820_v48  ;;  %v6410_v31 = vmax.f32 %v6409_v10, %v2824_v44  ;;  %v10036_v61 = vpack.c.bf16 %v2826_v62, %v2822_v11  ;;  %v6484_v1 = vmax.f32 %v6483_v60, %v2826_v62 }
 0x534   : > { %v6374_v63 = vrot.slane %v6373_v49, 4  ;;  %v6448_v6 = vrot.slane %v6447_v38, 4 }
 0x535   : > { %10917 = vst [vmem:[#allocation56_spill] sm:$0xff] %v10034_v5  ;;  %v6411_v47 = vrot.slane %v6410_v31, 4  ;;  %v6485_v14 = vrot.slane %v6484_v1, 4  ;;  %4725 = vmatprep.mubr.bf16.mxu0 %v10034_v5  ;;  %5111 = vmatprep.mubr.bf16.mxu1 %v10034_v5 }
 0x536   : > { %v6375_v19 = vmax.f32 %v6373_v49, %v6374_v63  ;;  %v6449_v15 = vmax.f32 %v6447_v38, %v6448_v6  ;;  %v2980_v38 = vld [vmem:[#allocation5 + $0x78] sm:$0xff]  ;;  %v2983_v49 = vld [vmem:[#allocation5 + $0x90] sm:$0xff]  ;;  %v7328_v63 = vcombine.high %v2975_v35, %v2979_v46 }
 0x537   : > { %v6412_v34 = vmax.f32 %v6410_v31, %v6411_v47  ;;  %v6486_v30 = vmax.f32 %v6484_v1, %v6485_v14  ;;  %v7330_v6 = vcombine.high %v2976_v24, %v2980_v38  ;;  %v2987_v47 = vld [vmem:[#allocation5 + $0xb0] sm:$0xff]  ;;  %v2984_v14 = vld [vmem:[#allocation5 + $0x98] sm:$0xff] }
 0x538   : > { %v6376_v37 = vrot.slane %v6375_v19, 2  ;;  %v6450_v48 = vrot.slane %v6449_v15, 2 }
 0x539   : > { %v6413_v11 = vrot.slane %v6412_v34, 2  ;;  %v6487_v57 = vrot.slane %v6486_v30, 2 }
 0x53a   : > { %4726 = vmatmul.mubr.bf16.gmra.mrb[204].mxu0 %v10030_v8  ;;  %5112 = vmatmul.mubr.bf16.gmra.mrb[204].mxu1 %v10030_v8  ;;  %v6377_v7 = vmax.f32 %v6375_v19, %v6376_v37  ;;  %v6451_v55 = vmax.f32 %v6449_v15, %v6450_v48  ;;  %v7327_v19 = vcombine.low %v2975_v35, %v2979_v46  ;;  %v2995_v35 = vld [vmem:[#allocation5 + $0xf0] sm:$0xff] }
 0x53b   : > { %4768 = vmatprep.mubr.bf16.mxu0 %v10918_v53  ;;  %5154 = vmatprep.mubr.bf16.mxu1 %v10918_v53  ;;  %v6414_v10 = vmax.f32 %v6412_v34, %v6413_v11  ;;  %v6488_v60 = vmax.f32 %v6486_v30, %v6487_v57  ;;  %v2988_v53 = vld [vmem:[#allocation5 + $0xb8] sm:$0xff]  ;;  %v10920_v30 = vcombine.low %v9572_v41, %v9574_v21 }
 0x53c   : > { %v6378_v44 = vrot.slane %v6377_v7, 1  ;;  %v6452_v62 = vrot.slane %v6451_v55, 1  ;;  %v10921_v37 = vcombine.low %v9628_v56, %v9630_v42  ;;  %v7329_v48 = vcombine.low %v2976_v24, %v2980_v38  ;;  %v2992_v41 = vld [vmem:[#allocation5 + $0xd8] sm:$0xff]  ;;  %v10057_v56 = vld [vmem:[#allocation5 + $0x430] sm:$0xff] }
 0x53d   : > { %v6415_v31 = vrot.slane %v6414_v10, 1  ;;  %v6489_v1 = vrot.slane %v6488_v60, 1  ;;  %v7336_v11 = vcombine.high %v2983_v49, %v2987_v47  ;;  %v7338_v57 = vcombine.high %v2984_v14, %v2988_v53  ;;  %v2996_v21 = vld [vmem:[#allocation5 + $0xf8] sm:$0xff] }
 0x53e   : > { %v6379_v8 = vmax.f32 %v6377_v7, %v6378_v44  ;;  %v6453_v5 = vmax.f32 %v6451_v55, %v6452_v62  ;;  %v2991_v7 = vld [vmem:[#allocation5 + $0xd0] sm:$0xff]  ;;  %v10059_v42 = vld [vmem:[#allocation5 + $0x418] sm:$0xff] }
 0x53f   : > { %v6416_v15 = vmax.f32 %v6414_v10, %v6415_v31  ;;  %v6490_v34 = vmax.f32 %v6488_v60, %v6489_v1  ;;  %v10054_v10 = vld [vmem:[#allocation5 + $0x410] sm:$0xff]  ;;  %v10061_v24 = vld [vmem:[#allocation5 + $0x438] sm:$0xff]  ;;  %v7344_v62 = vcombine.high %v2991_v7, %v2995_v35  ;;  %v7346_v1 = vcombine.high %v2992_v41, %v2996_v21 }
 0x540   : > { %v10922_v38 = vld [vmem:[#allocation22_spill] sm:$0xff] }
 0x541   : > { %v6855_v55 = vcombine.low %v6379_v8, %v6416_v15  ;;  %v6856_v46 = vcombine.low %v6453_v5, %v6490_v34  ;;  %v7335_v8 = vcombine.low %v2983_v49, %v2987_v47  ;;  %v7337_v5 = vcombine.low %v2984_v14, %v2988_v53  ;;  %v3003_v49 = vld [vmem:[#allocation5 + $0x130] sm:$0xff]  ;;  %v3000_v47 = vld [vmem:[#allocation5 + $0x118] sm:$0xff] }
 0x542   : > { %4769 = vmatmul.mubr.bf16.vlgmr.msra.gmra.mrb[144].mxu0 %v10919_v58  ;;  %5155 = vmatmul.mubr.bf16.vlgmr.msra.gmra.mrb[144].mxu1 %v10919_v58  ;;  %v7449_v15 = vcombine.low %v10059_v42, %v10061_v24  ;;  %v3004_v53 = vld [vmem:[#allocation5 + $0x138] sm:$0xff] }
 0x543   : > { %5316 = vmatpush1.bf16.msra.mxu0 %v10920_v30  ;;  %5702 = vmatpush1.bf16.msra.mxu1 %v10921_v37  ;;  %v6864_v60 = vrot.slane %v6855_v55, %v10922_v38  ;;  %v6871_v44 = vrot.slane %v6856_v46, %v10922_v38  ;;  %v7343_v30 = vcombine.low %v2991_v7, %v2995_v35  ;;  %v3007_v55 = vld [vmem:[#allocation5 + $0x150] sm:$0xff] }
 0x544   : > { %4778 = vmatprep.mubr.bf16.mxu0 %v9530_v51  ;;  %5164 = vmatprep.mubr.bf16.mxu1 %v9530_v51  ;;  %v7345_v37 = vcombine.low %v2992_v41, %v2996_v21  ;;  %v7353_v7 = vcombine.low %v3000_v47, %v3004_v53  ;;  %v3015_v21 = vld [vmem:[#allocation5 + $0x190] sm:$0xff] }
 0x545   : > { %5317 = vmatprep.subr.bf16.mxu0 %v7328_v63  ;;  %5703 = vmatprep.subr.bf16.mxu1 %v7330_v6  ;;  %v6886_v31 = vcombine.low %v6864_v60, %v6871_v44  ;;  %v2999_v63 = vld [vmem:[#allocation5 + $0x110] sm:$0xff]  ;;  %v7447_v6 = vcombine.low %v10054_v10, %v10057_v56  ;;  %v3008_v44 = vld [vmem:[#allocation5 + $0x158] sm:$0xff] }
 0x546   : > { %v3011_v60 = vld [vmem:[#allocation5 + $0x170] sm:$0xff] }
 0x547   : > { %5318 = vmatpush1.bf16.msra.mxu0 %v7327_v19  ;;  %5704 = vmatpush1.bf16.msra.mxu1 %v7329_v48  ;;  %v6894_v14 = vrot.slane %v6886_v31, %v10922_v38  ;;  %v10923_v19 = vld [vmem:[#allocation23_spill] sm:$0xff]  ;;  %v10924_v48 = vlaneseq  ;;  %v7360_v35 = vcombine.high %v3007_v55, %v3011_v60 }
 0x548   : > { %5319 = vmatprep.subr.bf16.mxu0 %v7336_v11  ;;  %5705 = vmatprep.subr.bf16.mxu1 %v7338_v57  ;;  %v6901_v34 = vrot.slane %v10923_v19, %v10922_v38  ;;  %v7352_v11 = vcombine.high %v2999_v63, %v3003_v49  ;;  %v7354_v57 = vcombine.high %v3000_v47, %v3004_v53  ;;  %v3012_v31 = vld [vmem:[#allocation5 + $0x178] sm:$0xff]  ;;  %v3027_v19 = vld [vmem:[#allocation5 + $0x1f0] sm:$0xff] }
 0x549   : > { %vm6908_vm3 = vcmp.lt.s32.totalorder %v10924_v48, 896  ;;  %v7362_v41 = vcombine.high %v3008_v44, %v3012_v31 }
 0x54a   : > { %4779 = vmatmul.mubr.bf16.gmra.mrb[148].mxu0 %v9526_v43  ;;  %5165 = vmatmul.mubr.bf16.gmra.mrb[148].mxu1 %v9526_v43  ;;  %v6902_v46 = vcombine.low %v6894_v14, %v6901_v34  ;;  %v3023_v14 = vld [vmem:[#allocation5 + $0x1d0] sm:$0xff]  ;;  %v3024_v34 = vld [vmem:[#allocation5 + $0x1d8] sm:$0xff] }
 0x54b   : > { %4788 = vmatprep.mubr.bf16.mxu0 %v9586_v2  ;;  %5174 = vmatprep.mubr.bf16.mxu1 %v9586_v2 }
 0x54c   : > { %5320 = vmatpush1.bf16.msra.mxu0 %v7335_v8  ;;  %5706 = vmatpush1.bf16.msra.mxu1 %v7337_v5  ;;  %6910 = vst.msk [vmem:[%s10079_s29 + $0x8] sm:$0x7f] %vm6908_vm3, %v6902_v46  ;;  %v7351_v8 = vcombine.low %v2999_v63, %v3003_v49  ;;  %v3019_v5 = vld [vmem:[#allocation5 + $0x1b0] sm:$0xff]  ;;  %v7359_v63 = vcombine.low %v3007_v55, %v3011_v60  ;;  %v3032_v60 = vld [vmem:[#allocation5 + $0x218] sm:$0xff] }
 0x54d   : > { %5321 = vmatprep.subr.bf16.mxu0 %v7344_v62  ;;  %5707 = vmatprep.subr.bf16.mxu1 %v7346_v1  ;;  %v3016_v62 = vld [vmem:[#allocation5 + $0x198] sm:$0xff]  ;;  %v7361_v49 = vcombine.low %v3008_v44, %v3012_v31  ;;  %v7368_v47 = vcombine.high %v3015_v21, %v3019_v5  ;;  %v3031_v46 = vld [vmem:[#allocation5 + $0x210] sm:$0xff]  ;;  %v7375_v31 = vcombine.low %v3023_v14, %v3027_v19 }
 0x54e   : > { %v3020_v1 = vld [vmem:[#allocation5 + $0x1b8] sm:$0xff]  ;;  %v3035_v55 = vld [vmem:[#allocation5 + $0x230] sm:$0xff] }
 0x54f   : > { %v7370_v53 = vcombine.high %v3016_v62, %v3020_v1  ;;  %v7369_v48 = vcombine.low %v3016_v62, %v3020_v1  ;;  %v3036_v44 = vld [vmem:[#allocation5 + $0x238] sm:$0xff]  ;;  %v7383_v1 = vcombine.low %v3031_v46, %v3035_v55 }
 0x550   : > { %5322 = vmatpush1.bf16.msra.mxu0 %v7343_v30  ;;  %5708 = vmatpush1.bf16.msra.mxu1 %v7345_v37  ;;  %v3028_v30 = vld [vmem:[#allocation5 + $0x1f8] sm:$0xff]  ;;  %v7367_v37 = vcombine.low %v3015_v21, %v3019_v5  ;;  %v3043_v21 = vld [vmem:[#allocation5 + $0x270] sm:$0xff] }
 0x551   : > { %5323 = vmatprep.subr.bf16.mxu0 %v7352_v11  ;;  %5709 = vmatprep.subr.bf16.mxu1 %v7354_v57  ;;  %v7376_v11 = vcombine.high %v3023_v14, %v3027_v19  ;;  %v7378_v57 = vcombine.high %v3024_v34, %v3028_v30  ;;  %v3040_v5 = vld [vmem:[#allocation5 + $0x258] sm:$0xff]  ;;  %v3051_v14 = vld [vmem:[#allocation5 + $0x2b0] sm:$0xff] }
 0x552   : > { %4789 = vmatmul.mubr.bf16.gmra.mrb[152].mxu0 %v9578_v23  ;;  %5175 = vmatmul.mubr.bf16.gmra.mrb[152].mxu1 %v9578_v23  ;;  %v3044_v62 = vld [vmem:[#allocation5 + $0x278] sm:$0xff] }
 0x553   : > { %4798 = vmatprep.mubr.bf16.mxu0 %v9638_v39  ;;  %5184 = vmatprep.mubr.bf16.mxu1 %v9638_v39  ;;  %v3048_v19 = vld [vmem:[#allocation5 + $0x298] sm:$0xff] }
 0x554   : > { %5324 = vmatpush1.bf16.msra.mxu0 %v7351_v8  ;;  %5710 = vmatpush1.bf16.msra.mxu1 %v7353_v7  ;;  %v7377_v8 = vcombine.low %v3024_v34, %v3028_v30  ;;  %v7384_v7 = vcombine.high %v3031_v46, %v3035_v55  ;;  %v3052_v34 = vld [vmem:[#allocation5 + $0x2b8] sm:$0xff]  ;;  %v3059_v46 = vld [vmem:[#allocation5 + $0x2f0] sm:$0xff] }
 0x555   : > { %5325 = vmatprep.subr.bf16.mxu0 %v7360_v35  ;;  %5711 = vmatprep.subr.bf16.mxu1 %v7362_v41  ;;  %v7386_v35 = vcombine.high %v3032_v60, %v3036_v44  ;;  %v3039_v41 = vld [vmem:[#allocation5 + $0x250] sm:$0xff]  ;;  %v3056_v55 = vld [vmem:[#allocation5 + $0x2d8] sm:$0xff] }
 0x556   : > { %v7391_v30 = vcombine.low %v3039_v41, %v3043_v21 }
 0x558   : > { %5326 = vmatpush1.bf16.msra.mxu0 %v7359_v63  ;;  %5712 = vmatpush1.bf16.msra.mxu1 %v7361_v49  ;;  %v7385_v63 = vcombine.low %v3032_v60, %v3036_v44  ;;  %v7392_v49 = vcombine.high %v3039_v41, %v3043_v21  ;;  %v3060_v60 = vld [vmem:[#allocation5 + $0x2f8] sm:$0xff]  ;;  %v3067_v41 = vld [vmem:[#allocation5 + $0x330] sm:$0xff] }
 0x559   : > { %5327 = vmatprep.subr.bf16.mxu0 %v7368_v47  ;;  %5713 = vmatprep.subr.bf16.mxu1 %v7370_v53  ;;  %v7394_v47 = vcombine.high %v3040_v5, %v3044_v62  ;;  %v3047_v53 = vld [vmem:[#allocation5 + $0x290] sm:$0xff]  ;;  %v3064_v21 = vld [vmem:[#allocation5 + $0x318] sm:$0xff] }
 0x55a   : > { %4799 = vmatmul.mubr.bf16.gmra.mrb[156].mxu0 %v9634_v59  ;;  %5185 = vmatmul.mubr.bf16.gmra.mrb[156].mxu1 %v9634_v59  ;;  %v7399_v44 = vcombine.low %v3047_v53, %v3051_v14 }
 0x55b   : > { %4808 = vmatprep.mubr.bf16.mxu0 %v9690_v32  ;;  %5194 = vmatprep.mubr.bf16.mxu1 %v9690_v32 }
 0x55c   : > { %5328 = vmatpush1.bf16.msra.mxu0 %v7367_v37  ;;  %5714 = vmatpush1.bf16.msra.mxu1 %v7369_v48  ;;  %v7393_v37 = vcombine.low %v3040_v5, %v3044_v62  ;;  %v7400_v48 = vcombine.high %v3047_v53, %v3051_v14  ;;  %v3068_v5 = vld [vmem:[#allocation5 + $0x338] sm:$0xff]  ;;  %v3075_v53 = vld [vmem:[#allocation5 + $0x370] sm:$0xff] }
 0x55d   : > { %5329 = vmatprep.subr.bf16.mxu0 %v7376_v11  ;;  %5715 = vmatprep.subr.bf16.mxu1 %v7378_v57  ;;  %v7402_v11 = vcombine.high %v3048_v19, %v3052_v34  ;;  %v3055_v57 = vld [vmem:[#allocation5 + $0x2d0] sm:$0xff]  ;;  %v3072_v14 = vld [vmem:[#allocation5 + $0x358] sm:$0xff] }
 0x55e   : > { %v7407_v62 = vcombine.low %v3055_v57, %v3059_v46 }
 0x560   : > { %5330 = vmatpush1.bf16.msra.mxu0 %v7375_v31  ;;  %5716 = vmatpush1.bf16.msra.mxu1 %v7377_v8  ;;  %v7401_v31 = vcombine.low %v3048_v19, %v3052_v34  ;;  %v7408_v8 = vcombine.high %v3055_v57, %v3059_v46  ;;  %v3076_v19 = vld [vmem:[#allocation5 + $0x378] sm:$0xff]  ;;  %v3083_v57 = vld [vmem:[#allocation5 + $0x3b0] sm:$0xff] }
 0x561   : > { %5331 = vmatprep.subr.bf16.mxu0 %v7384_v7  ;;  %5717 = vmatprep.subr.bf16.mxu1 %v7386_v35  ;;  %v7410_v7 = vcombine.high %v3056_v55, %v3060_v60  ;;  %v3063_v35 = vld [vmem:[#allocation5 + $0x310] sm:$0xff]  ;;  %v3080_v46 = vld [vmem:[#allocation5 + $0x398] sm:$0xff] }
 0x562   : > { %4809 = vmatmul.mubr.bf16.gmra.mrb[160].mxu0 %v9686_v33  ;;  %5195 = vmatmul.mubr.bf16.gmra.mrb[160].mxu1 %v9686_v33  ;;  %v7415_v34 = vcombine.low %v3063_v35, %v3067_v41 }
 0x563   : > { %4818 = vmatprep.mubr.bf16.mxu0 %v9742_v12  ;;  %5204 = vmatprep.mubr.bf16.mxu1 %v9742_v12 }
 0x564   : > { %5332 = vmatpush1.bf16.msra.mxu0 %v7383_v1  ;;  %5718 = vmatpush1.bf16.msra.mxu1 %v7385_v63  ;;  %v7409_v1 = vcombine.low %v3056_v55, %v3060_v60  ;;  %v7416_v63 = vcombine.high %v3063_v35, %v3067_v41  ;;  %v3084_v55 = vld [vmem:[#allocation5 + $0x3b8] sm:$0xff]  ;;  %v3091_v35 = vld [vmem:[#allocation5 + $0x3f0] sm:$0xff] }
 0x565   : > { %5333 = vmatprep.subr.bf16.mxu0 %v7392_v49  ;;  %5719 = vmatprep.subr.bf16.mxu1 %v7394_v47  ;;  %v7418_v49 = vcombine.high %v3064_v21, %v3068_v5  ;;  %v3071_v47 = vld [vmem:[#allocation5 + $0x350] sm:$0xff]  ;;  %v3088_v41 = vld [vmem:[#allocation5 + $0x3d8] sm:$0xff] }
 0x566   : > { %v7423_v60 = vcombine.low %v3071_v47, %v3075_v53 }
 0x568   : > { %5334 = vmatpush1.bf16.msra.mxu0 %v7391_v30  ;;  %5720 = vmatpush1.bf16.msra.mxu1 %v7393_v37  ;;  %v7417_v30 = vcombine.low %v3064_v21, %v3068_v5  ;;  %v7424_v37 = vcombine.high %v3071_v47, %v3075_v53  ;;  %v3092_v21 = vld [vmem:[#allocation5 + $0x3f8] sm:$0xff]  ;;  %v7448_v53 = vcombine.high %v10054_v10, %v10057_v56 }
 0x569   : > { %5335 = vmatprep.subr.bf16.mxu0 %v7400_v48  ;;  %5721 = vmatprep.subr.bf16.mxu1 %v7402_v11  ;;  %v7426_v48 = vcombine.high %v3072_v14, %v3076_v19  ;;  %v3079_v11 = vld [vmem:[#allocation5 + $0x390] sm:$0xff]  ;;  %v7441_v47 = vcombine.low %v3088_v41, %v3092_v21 }
 0x56a   : > { %4819 = vmatmul.mubr.bf16.gmra.mrb[164].mxu0 %v9738_v52  ;;  %5205 = vmatmul.mubr.bf16.gmra.mrb[164].mxu1 %v9738_v52  ;;  %v7431_v5 = vcombine.low %v3079_v11, %v3083_v57 }
 0x56b   : > { %4828 = vmatprep.mubr.bf16.mxu0 %v9794_v20  ;;  %5214 = vmatprep.mubr.bf16.mxu1 %v9794_v20 }
 0x56c   : > { %5336 = vmatpush1.bf16.msra.mxu0 %v7399_v44  ;;  %5722 = vmatpush1.bf16.msra.mxu1 %v7401_v31  ;;  %v7425_v44 = vcombine.low %v3072_v14, %v3076_v19  ;;  %v7432_v31 = vcombine.high %v3079_v11, %v3083_v57  ;;  %v7450_v14 = vcombine.high %v10059_v42, %v10061_v24  ;;  %v10925_v19 = vld [vmem:[#allocation42_spill] sm:$0xff] }
 0x56d   : > { %5337 = vmatprep.subr.bf16.mxu0 %v7408_v8  ;;  %5723 = vmatprep.subr.bf16.mxu1 %v7410_v7  ;;  %v7434_v8 = vcombine.high %v3080_v46, %v3084_v55  ;;  %v3087_v7 = vld [vmem:[#allocation5 + $0x3d0] sm:$0xff] }
 0x56e   : > { %v3111_v11 = vld [vmem:[#allocation5 + $0x490] sm:$0xff] }
 0x570   : > { %5338 = vmatpush1.bf16.msra.mxu0 %v7407_v62  ;;  %5724 = vmatpush1.bf16.msra.mxu1 %v7409_v1  ;;  %v7433_v62 = vcombine.low %v3080_v46, %v3084_v55  ;;  %v7440_v1 = vcombine.high %v3087_v7, %v3091_v35  ;;  %v3115_v55 = vld [vmem:[#allocation5 + $0x4b0] sm:$0xff] }
 0x571   : > { %5339 = vmatprep.subr.bf16.mxu0 %v7416_v63  ;;  %5725 = vmatprep.subr.bf16.mxu1 %v7418_v49  ;;  %v7442_v63 = vcombine.high %v3088_v41, %v3092_v21  ;;  %v7439_v49 = vcombine.low %v3087_v7, %v3091_v35  ;;  %v10926_v7 = vld [vmem:[#allocation45_spill] sm:$0xff]  ;;  %v7464_v35 = vcombine.high %v3111_v11, %v3115_v55 }
 0x572   : > { %4829 = vmatmul.mubr.bf16.gmra.mrb[168].mxu0 %v9790_v0  ;;  %5215 = vmatmul.mubr.bf16.gmra.mrb[168].mxu1 %v9790_v0  ;;  %v3119_v21 = vld [vmem:[#allocation5 + $0x4d0] sm:$0xff]  ;;  %v7463_v10 = vcombine.low %v3111_v11, %v3115_v55  ;;  %v3140_v11 = vld [vmem:[#allocation5 + $0x578] sm:$0xff] }
 0x573   : > { %4838 = vmatprep.mubr.bf16.mxu0 %v9842_v16  ;;  %5224 = vmatprep.mubr.bf16.mxu1 %v9842_v16 }
 0x574   : > { %5340 = vmatpush1.bf16.msra.mxu0 %v7415_v34  ;;  %5726 = vmatpush1.bf16.msra.mxu1 %v7417_v30  ;;  %v3103_v34 = vld [vmem:[#allocation5 + $0x450] sm:$0xff] }
 0x575   : > { %5341 = vmatprep.subr.bf16.mxu0 %v7424_v37  ;;  %5727 = vmatprep.subr.bf16.mxu1 %v7426_v48  ;;  %v3107_v30 = vld [vmem:[#allocation5 + $0x470] sm:$0xff]  ;;  %v3104_v37 = vld [vmem:[#allocation5 + $0x458] sm:$0xff] }
 0x576   : > { %v3108_v48 = vld [vmem:[#allocation5 + $0x478] sm:$0xff]  ;;  %v7456_v57 = vcombine.high %v3103_v34, %v3107_v30 }
 0x577   : > { %v7458_v46 = vcombine.high %v3104_v37, %v3108_v48 }
 0x578   : > { %5342 = vmatpush1.bf16.msra.mxu0 %v7423_v60  ;;  %5728 = vmatpush1.bf16.msra.mxu1 %v7425_v44  ;;  %v3112_v60 = vld [vmem:[#allocation5 + $0x498] sm:$0xff] }
 0x579   : > { %5343 = vmatprep.subr.bf16.mxu0 %v7432_v31  ;;  %5729 = vmatprep.subr.bf16.mxu1 %v7434_v8  ;;  %v3116_v44 = vld [vmem:[#allocation5 + $0x4b8] sm:$0xff]  ;;  %v7455_v31 = vcombine.low %v3103_v34, %v3107_v30  ;;  %v7457_v8 = vcombine.low %v3104_v37, %v3108_v48  ;;  %v3135_v30 = vld [vmem:[#allocation5 + $0x550] sm:$0xff] }
 0x57a   : > { %4839 = vmatmul.mubr.bf16.gmra.mrb[172].mxu0 %v9838_v40  ;;  %5225 = vmatmul.mubr.bf16.gmra.mrb[172].mxu1 %v9838_v40  ;;  %v7466_v41 = vcombine.high %v3112_v60, %v3116_v44  ;;  %v7465_v56 = vcombine.low %v3112_v60, %v3116_v44  ;;  %v3139_v37 = vld [vmem:[#allocation5 + $0x570] sm:$0xff]  ;;  %v3136_v48 = vld [vmem:[#allocation5 + $0x558] sm:$0xff] }
 0x57b   : > { %4848 = vmatprep.mubr.bf16.mxu0 %v9890_v27  ;;  %5234 = vmatprep.mubr.bf16.mxu1 %v9890_v27  ;;  %v7488_v55 = vcombine.high %v3135_v30, %v3139_v37  ;;  %v7490_v60 = vcombine.high %v3136_v48, %v3140_v11  ;;  %v3143_v44 = vld [vmem:[#allocation5 + $0x590] sm:$0xff] }
 0x57c   : > { %5344 = vmatpush1.bf16.msra.mxu0 %v7431_v5  ;;  %5730 = vmatpush1.bf16.msra.mxu1 %v7433_v62  ;;  %v3120_v5 = vld [vmem:[#allocation5 + $0x4d8] sm:$0xff] }
 0x57d   : > { %5345 = vmatprep.subr.bf16.mxu0 %v7440_v1  ;;  %5731 = vmatprep.subr.bf16.mxu1 %v7442_v63  ;;  %v3124_v62 = vld [vmem:[#allocation5 + $0x4f8] sm:$0xff]  ;;  %v3131_v1 = vld [vmem:[#allocation5 + $0x530] sm:$0xff] }
 0x57e   : > { %v7474_v24 = vcombine.high %v3120_v5, %v3124_v62  ;;  %v3128_v63 = vld [vmem:[#allocation5 + $0x518] sm:$0xff] }
 0x580   : > { %5346 = vmatpush1.bf16.msra.mxu0 %v7439_v49  ;;  %5732 = vmatpush1.bf16.msra.mxu1 %v7441_v47  ;;  %v3132_v49 = vld [vmem:[#allocation5 + $0x538] sm:$0xff] }
 0x581   : > { %5508 = vmatprep.subr.bf16.mxu0 %v7448_v53  ;;  %5894 = vmatprep.subr.bf16.mxu1 %v7450_v14  ;;  %v10928_v47 = vld [vmem:[#allocation47_spill] sm:$0xff]  ;;  %v7473_v14 = vcombine.low %v3120_v5, %v3124_v62  ;;  %v7482_v34 = vcombine.high %v3128_v63, %v3132_v49 }
 0x582   : > { %4849 = vmatmul.mubr.bf16.gmra.mrb[176].mxu0 %v9886_v9  ;;  %5235 = vmatmul.mubr.bf16.gmra.mrb[176].mxu1 %v9886_v9 }
 0x583   : > { %4858 = vmatprep.mubr.bf16.mxu0 %v9916_v4  ;;  %5244 = vmatprep.mubr.bf16.mxu1 %v9916_v4 }
 0x58a   : > { %4859 = vmatmul.mubr.bf16.gmra.mrb[180].mxu0 %v9912_v3  ;;  %5245 = vmatmul.mubr.bf16.gmra.mrb[180].mxu1 %v9912_v3 }
 0x58b   : > { %4868 = vmatprep.mubr.bf16.mxu0 %v9936_v29  ;;  %5254 = vmatprep.mubr.bf16.mxu1 %v9936_v29 }
 0x592   : > { %4869 = vmatmul.mubr.bf16.gmra.mrb[184].mxu0 %v9932_v36  ;;  %5255 = vmatmul.mubr.bf16.gmra.mrb[184].mxu1 %v9932_v36 }
 0x593   : > { %4878 = vmatprep.mubr.bf16.mxu0 %v9956_v50  ;;  %5264 = vmatprep.mubr.bf16.mxu1 %v9956_v50 }
 0x59a   : > { %4879 = vmatmul.mubr.bf16.gmra.mrb[188].mxu0 %v9952_v13  ;;  %5265 = vmatmul.mubr.bf16.gmra.mrb[188].mxu1 %v9952_v13 }
 0x59b   : > { %4888 = vmatprep.mubr.bf16.mxu0 %v9976_v26  ;;  %5274 = vmatprep.mubr.bf16.mxu1 %v9976_v26 }
 0x5a2   : > { %4889 = vmatmul.mubr.bf16.gmra.mrb[192].mxu0 %v9972_v45  ;;  %5275 = vmatmul.mubr.bf16.gmra.mrb[192].mxu1 %v9972_v45 }
 0x5a3   : > { %4898 = vmatprep.mubr.bf16.mxu0 %v9996_v25  ;;  %5284 = vmatprep.mubr.bf16.mxu1 %v9996_v25 }
 0x5aa   : > { %4899 = vmatmul.mubr.bf16.gmra.mrb[196].mxu0 %v9992_v54  ;;  %5285 = vmatmul.mubr.bf16.gmra.mrb[196].mxu1 %v9992_v54 }
 0x5ab   : > { %4908 = vmatprep.mubr.bf16.mxu0 %v10016_v28  ;;  %5294 = vmatprep.mubr.bf16.mxu1 %v10016_v28 }
 0x5b2   : > { %4909 = vmatmul.mubr.bf16.gmra.mrb[200].mxu0 %v10012_v17  ;;  %5295 = vmatmul.mubr.bf16.gmra.mrb[200].mxu1 %v10012_v17 }
 0x5b3   : > { %4918 = vmatprep.mubr.bf16.mxu0 %v10036_v61  ;;  %5304 = vmatprep.mubr.bf16.mxu1 %v10036_v61 }
 0x5ba   : > { %4919 = vmatmul.mubr.bf16.gmra.mrb[204].mxu0 %v10032_v22  ;;  %5305 = vmatmul.mubr.bf16.gmra.mrb[204].mxu1 %v10032_v22 }
 0x5bb   : > { %5347 = vmatprep.mubr.bf16.mxu0 %v10925_v19  ;;  %5733 = vmatprep.mubr.bf16.mxu1 %v10925_v19 }
 0x5c2   : > { %5348 = vmatmul.mubr.bf16.vlgmr.msra.gmra.mrb[208].mxu0 %v9482_v18  ;;  %5734 = vmatmul.mubr.bf16.vlgmr.msra.gmra.mrb[208].mxu1 %v9482_v18  ;;  %v3123_v18 = vld [vmem:[#allocation5 + $0x4f0] sm:$0xff] }
 0x5c3   : > { %5509 = vmatpush1.bf16.msra.mxu0 %v7447_v6  ;;  %5895 = vmatpush1.bf16.msra.mxu1 %v7449_v15  ;;  %v7472_v42 = vcombine.high %v3119_v21, %v3123_v18  ;;  %v3127_v6 = vld [vmem:[#allocation5 + $0x510] sm:$0xff]  ;;  %v10927_v15 = vld [vmem:[#allocation44_spill] sm:$0xff]  ;;  %v7471_v53 = vcombine.low %v3119_v21, %v3123_v18  ;;  %v7487_v21 = vcombine.low %v3135_v30, %v3139_v37 }
 0x5c4   : > { %5357 = vmatprep.mubr.bf16.mxu0 %v10926_v7  ;;  %5743 = vmatprep.mubr.bf16.mxu1 %v10926_v7  ;;  %v7480_v19 = vcombine.high %v3127_v6, %v3131_v1  ;;  %v3144_v7 = vld [vmem:[#allocation5 + $0x598] sm:$0xff]  ;;  %v7489_v18 = vcombine.low %v3136_v48, %v3140_v11 }
 0x5c5   : > { %5510 = vmatprep.subr.bf16.mxu0 %v7456_v57  ;;  %5896 = vmatprep.subr.bf16.mxu1 %v7458_v46  ;;  %v7479_v57 = vcombine.low %v3127_v6, %v3131_v1  ;;  %v7481_v46 = vcombine.low %v3128_v63, %v3132_v49  ;;  %v3159_v49 = vld [vmem:[#allocation5 + $0x610] sm:$0xff] }
 0x5c7   : > { %5511 = vmatpush1.bf16.msra.mxu0 %v7455_v31  ;;  %5897 = vmatpush1.bf16.msra.mxu1 %v7457_v8  ;;  %v10929_v31 = vld [vmem:[#allocation46_spill] sm:$0xff] }
 0x5c8   : > { %5512 = vmatprep.subr.bf16.mxu0 %v7464_v35  ;;  %5898 = vmatprep.subr.bf16.mxu1 %v7466_v41  ;;  %v3147_v8 = vld [vmem:[#allocation5 + $0x5b0] sm:$0xff]  ;;  %v3148_v35 = vld [vmem:[#allocation5 + $0x5b8] sm:$0xff] }
 0x5c9   : > { %v10930_v41 = vld [vmem:[#allocation49_spill] sm:$0xff]  ;;  %v7496_v5 = vcombine.high %v3143_v44, %v3147_v8  ;;  %v7498_v62 = vcombine.high %v3144_v7, %v3148_v35  ;;  %v7495_v6 = vcombine.low %v3143_v44, %v3147_v8 }
 0x5ca   : > { %5358 = vmatmul.mubr.bf16.gmra.mrb[212].mxu0 %v10927_v15  ;;  %5744 = vmatmul.mubr.bf16.gmra.mrb[212].mxu1 %v10927_v15  ;;  %v7497_v15 = vcombine.low %v3144_v7, %v3148_v35  ;;  %v3175_v35 = vld [vmem:[#allocation5 + $0x690] sm:$0xff] }
 0x5cb   : > { %5367 = vmatprep.mubr.bf16.mxu0 %v10928_v47  ;;  %5753 = vmatprep.mubr.bf16.mxu1 %v10928_v47  ;;  %v10931_v47 = vld [vmem:[#allocation48_spill] sm:$0xff] }
 0x5cc   : > { %5513 = vmatpush1.bf16.msra.mxu0 %v7463_v10  ;;  %5899 = vmatpush1.bf16.msra.mxu1 %v7465_v56  ;;  %v3151_v10 = vld [vmem:[#allocation5 + $0x5d0] sm:$0xff] }
 0x5cd   : > { %5514 = vmatprep.subr.bf16.mxu0 %v7472_v42  ;;  %5900 = vmatprep.subr.bf16.mxu1 %v7474_v24  ;;  %v3155_v56 = vld [vmem:[#allocation5 + $0x5f0] sm:$0xff]  ;;  %v3152_v42 = vld [vmem:[#allocation5 + $0x5d8] sm:$0xff] }
 0x5ce   : > { %v3156_v24 = vld [vmem:[#allocation5 + $0x5f8] sm:$0xff]  ;;  %v7504_v1 = vcombine.high %v3151_v10, %v3155_v56  ;;  %v7503_v30 = vcombine.low %v3151_v10, %v3155_v56 }
 0x5cf   : > { %v7506_v63 = vcombine.high %v3152_v42, %v3156_v24  ;;  %v7505_v37 = vcombine.low %v3152_v42, %v3156_v24 }
 0x5d0   : > { %5515 = vmatpush1.bf16.msra.mxu0 %v7471_v53  ;;  %5901 = vmatpush1.bf16.msra.mxu1 %v7473_v14  ;;  %v3163_v53 = vld [vmem:[#allocation5 + $0x630] sm:$0xff]  ;;  %v3160_v14 = vld [vmem:[#allocation5 + $0x618] sm:$0xff] }
 0x5d1   : > { %5516 = vmatprep.subr.bf16.mxu0 %v7480_v19  ;;  %5902 = vmatprep.subr.bf16.mxu1 %v7482_v34  ;;  %v3164_v19 = vld [vmem:[#allocation5 + $0x638] sm:$0xff]  ;;  %v7512_v48 = vcombine.high %v3159_v49, %v3163_v53  ;;  %v7511_v44 = vcombine.low %v3159_v49, %v3163_v53 }
 0x5d2   : > { %5368 = vmatmul.mubr.bf16.gmra.mrb[216].mxu0 %v10929_v31  ;;  %5754 = vmatmul.mubr.bf16.gmra.mrb[216].mxu1 %v10929_v31  ;;  %v10932_v34 = vld [vmem:[#allocation51_spill] sm:$0xff]  ;;  %v7514_v11 = vcombine.high %v3160_v14, %v3164_v19  ;;  %v7513_v31 = vcombine.low %v3160_v14, %v3164_v19  ;;  %v3191_v19 = vld [vmem:[#allocation5 + $0x710] sm:$0xff] }
 0x5d3   : > { %5377 = vmatprep.mubr.bf16.mxu0 %v10930_v41  ;;  %5763 = vmatprep.mubr.bf16.mxu1 %v10930_v41  ;;  %v10933_v41 = vld [vmem:[#allocation50_spill] sm:$0xff] }
 0x5d4   : > { %5517 = vmatpush1.bf16.msra.mxu0 %v7479_v57  ;;  %5903 = vmatpush1.bf16.msra.mxu1 %v7481_v46  ;;  %v3167_v57 = vld [vmem:[#allocation5 + $0x650] sm:$0xff] }
 0x5d5   : > { %5518 = vmatprep.subr.bf16.mxu0 %v7488_v55  ;;  %5904 = vmatprep.subr.bf16.mxu1 %v7490_v60  ;;  %v3171_v46 = vld [vmem:[#allocation5 + $0x670] sm:$0xff]  ;;  %v3168_v55 = vld [vmem:[#allocation5 + $0x658] sm:$0xff] }
 0x5d6   : > { %v3172_v60 = vld [vmem:[#allocation5 + $0x678] sm:$0xff]  ;;  %v7520_v8 = vcombine.high %v3167_v57, %v3171_v46  ;;  %v7519_v10 = vcombine.low %v3167_v57, %v3171_v46 }
 0x5d7   : > { %v7522_v7 = vcombine.high %v3168_v55, %v3172_v60  ;;  %v7521_v56 = vcombine.low %v3168_v55, %v3172_v60 }
 0x5d8   : > { %5519 = vmatpush1.bf16.msra.mxu0 %v7487_v21  ;;  %5905 = vmatpush1.bf16.msra.mxu1 %v7489_v18  ;;  %v3179_v21 = vld [vmem:[#allocation5 + $0x6b0] sm:$0xff]  ;;  %v3176_v18 = vld [vmem:[#allocation5 + $0x698] sm:$0xff] }
 0x5d9   : > { %5520 = vmatprep.subr.bf16.mxu0 %v7496_v5  ;;  %5906 = vmatprep.subr.bf16.mxu1 %v7498_v62  ;;  %v3180_v5 = vld [vmem:[#allocation5 + $0x6b8] sm:$0xff]  ;;  %v10934_v62 = vld [vmem:[#allocation25_spill] sm:$0xff]  ;;  %v7528_v42 = vcombine.high %v3175_v35, %v3179_v21  ;;  %v7527_v49 = vcombine.low %v3175_v35, %v3179_v21 }
 0x5da   : > { %5378 = vmatmul.mubr.bf16.gmra.mrb[220].mxu0 %v10931_v47  ;;  %5764 = vmatmul.mubr.bf16.gmra.mrb[220].mxu1 %v10931_v47  ;;  %v7530_v24 = vcombine.high %v3176_v18, %v3180_v5  ;;  %v7529_v47 = vcombine.low %v3176_v18, %v3180_v5  ;;  %v3207_v5 = vld [vmem:[#allocation5 + $0x790] sm:$0xff] }
 0x5db   : > { %5387 = vmatprep.mubr.bf16.mxu0 %v10932_v34  ;;  %5773 = vmatprep.mubr.bf16.mxu1 %v10932_v34  ;;  %v10935_v34 = vld [vmem:[#allocation24_spill] sm:$0xff] }
 0x5dc   : > { %5521 = vmatpush1.bf16.msra.mxu0 %v7495_v6  ;;  %5907 = vmatpush1.bf16.msra.mxu1 %v7497_v15  ;;  %v3183_v6 = vld [vmem:[#allocation5 + $0x6d0] sm:$0xff] }
 0x5dd   : > { %5522 = vmatprep.subr.bf16.mxu0 %v7504_v1  ;;  %5908 = vmatprep.subr.bf16.mxu1 %v7506_v63  ;;  %v3187_v15 = vld [vmem:[#allocation5 + $0x6f0] sm:$0xff]  ;;  %v3184_v1 = vld [vmem:[#allocation5 + $0x6d8] sm:$0xff] }
 0x5de   : > { %v3188_v63 = vld [vmem:[#allocation5 + $0x6f8] sm:$0xff]  ;;  %v7536_v53 = vcombine.high %v3183_v6, %v3187_v15  ;;  %v7535_v57 = vcombine.low %v3183_v6, %v3187_v15 }
 0x5df   : > { %v7538_v14 = vcombine.high %v3184_v1, %v3188_v63  ;;  %v7537_v46 = vcombine.low %v3184_v1, %v3188_v63 }
 0x5e0   : > { %5523 = vmatpush1.bf16.msra.mxu0 %v7503_v30  ;;  %5909 = vmatpush1.bf16.msra.mxu1 %v7505_v37  ;;  %v3195_v30 = vld [vmem:[#allocation5 + $0x730] sm:$0xff]  ;;  %v3192_v37 = vld [vmem:[#allocation5 + $0x718] sm:$0xff] }
 0x5e1   : > { %5524 = vmatprep.subr.bf16.mxu0 %v7512_v48  ;;  %5910 = vmatprep.subr.bf16.mxu1 %v7514_v11  ;;  %v3196_v48 = vld [vmem:[#allocation5 + $0x738] sm:$0xff]  ;;  %v7544_v55 = vcombine.high %v3191_v19, %v3195_v30  ;;  %v7543_v35 = vcombine.low %v3191_v19, %v3195_v30 }
 0x5e2   : > { %5388 = vmatmul.mubr.bf16.gmra.mrb[224].mxu0 %v10933_v41  ;;  %5774 = vmatmul.mubr.bf16.gmra.mrb[224].mxu1 %v10933_v41  ;;  %v10936_v11 = vld [vmem:[#allocation27_spill] sm:$0xff]  ;;  %v7546_v60 = vcombine.high %v3192_v37, %v3196_v48  ;;  %v7545_v41 = vcombine.low %v3192_v37, %v3196_v48  ;;  %v10939_v48 = vld [vmem:[#allocation28_spill] sm:$0xff] }
 0x5e3   : > { %5397 = vmatprep.mubr.bf16.mxu0 %v10934_v62  ;;  %5783 = vmatprep.mubr.bf16.mxu1 %v10934_v62  ;;  %v10937_v62 = vld [vmem:[#allocation26_spill] sm:$0xff] }
 0x5e4   : > { %5525 = vmatpush1.bf16.msra.mxu0 %v7511_v44  ;;  %5911 = vmatpush1.bf16.msra.mxu1 %v7513_v31  ;;  %v3199_v44 = vld [vmem:[#allocation5 + $0x750] sm:$0xff] }
 0x5e5   : > { %5526 = vmatprep.subr.bf16.mxu0 %v7520_v8  ;;  %5912 = vmatprep.subr.bf16.mxu1 %v7522_v7  ;;  %v3203_v31 = vld [vmem:[#allocation5 + $0x770] sm:$0xff]  ;;  %v3200_v8 = vld [vmem:[#allocation5 + $0x758] sm:$0xff] }
 0x5e6   : > { %v3204_v7 = vld [vmem:[#allocation5 + $0x778] sm:$0xff]  ;;  %v7552_v21 = vcombine.high %v3199_v44, %v3203_v31  ;;  %v7551_v6 = vcombine.low %v3199_v44, %v3203_v31  ;;  %v10943_v44 = vld [vmem:[#allocation32_spill] sm:$0xff] }
 0x5e7   : > { %v7554_v18 = vcombine.high %v3200_v8, %v3204_v7  ;;  %v7553_v15 = vcombine.low %v3200_v8, %v3204_v7  ;;  %v10944_v31 = vld [vmem:[#allocation35_spill] sm:$0xff]  ;;  %v10945_v7 = vld [vmem:[#allocation20_spill] sm:$0xff] }
 0x5e8   : > { %5527 = vmatpush1.bf16.msra.mxu0 %v7519_v10  ;;  %5913 = vmatpush1.bf16.msra.mxu1 %v7521_v56  ;;  %v3211_v10 = vld [vmem:[#allocation5 + $0x7b0] sm:$0xff]  ;;  %v3208_v56 = vld [vmem:[#allocation5 + $0x798] sm:$0xff]  ;;  %v3221_v8 = vld [vmem:[%s10644_s12] sm:$0xff] }
 0x5e9   : > { %5528 = vmatprep.subr.bf16.mxu0 %v7528_v42  ;;  %5914 = vmatprep.subr.bf16.mxu1 %v7530_v24  ;;  %v3212_v42 = vld [vmem:[#allocation5 + $0x7b8] sm:$0xff]  ;;  %v10938_v24 = vld [vmem:[#allocation29_spill] sm:$0xff]  ;;  %v7560_v1 = vcombine.high %v3207_v5, %v3211_v10  ;;  %v7559_v19 = vcombine.low %v3207_v5, %v3211_v10 }
 0x5ea   : > { %5398 = vmatmul.mubr.bf16.gmra.mrb[228].mxu0 %v10935_v34  ;;  %5784 = vmatmul.mubr.bf16.gmra.mrb[228].mxu1 %v10935_v34  ;;  %v7562_v63 = vcombine.high %v3208_v56, %v3212_v42  ;;  %v7561_v34 = vcombine.low %v3208_v56, %v3212_v42  ;;  %v10948_v5 = vld [vmem:[#allocation34_spill] sm:$0xff] }
 0x5eb   : > { %5407 = vmatprep.mubr.bf16.mxu0 %v10936_v11  ;;  %5793 = vmatprep.mubr.bf16.mxu1 %v10936_v11  ;;  %v10940_v11 = vld [vmem:[#allocation31_spill] sm:$0xff] }
 0x5ec   : > { %5529 = vmatpush1.bf16.msra.mxu0 %v7527_v49  ;;  %5915 = vmatpush1.bf16.msra.mxu1 %v7529_v47  ;;  %v3215_v49 = vld [vmem:[#allocation5 + $0x7d0] sm:$0xff] }
 0x5ed   : > { %5530 = vmatprep.subr.bf16.mxu0 %v7536_v53  ;;  %5916 = vmatprep.subr.bf16.mxu1 %v7538_v14  ;;  %v3219_v47 = vld [vmem:[#allocation5 + $0x7f0] sm:$0xff]  ;;  %v3216_v53 = vld [vmem:[#allocation5 + $0x7d8] sm:$0xff] }
 0x5ee   : > { %v3220_v14 = vld [vmem:[#allocation5 + $0x7f8] sm:$0xff]  ;;  %v7568_v30 = vcombine.high %v3215_v49, %v3219_v47 }
 0x5ef   : > { %v7570_v37 = vcombine.high %v3216_v53, %v3220_v14 }
 0x5f0   : > { %5531 = vmatpush1.bf16.msra.mxu0 %v7535_v57  ;;  %5917 = vmatpush1.bf16.msra.mxu1 %v7537_v46  ;;  %v7567_v57 = vcombine.low %v3215_v49, %v3219_v47  ;;  %v7569_v46 = vcombine.low %v3216_v53, %v3220_v14 }
 0x5f1   : > { %5532 = vmatprep.subr.bf16.mxu0 %v7544_v55  ;;  %5918 = vmatprep.subr.bf16.mxu1 %v7546_v60  ;;  %v10941_v55 = vld [vmem:[#allocation30_spill] sm:$0xff]  ;;  %v10942_v60 = vld [vmem:[#allocation33_spill] sm:$0xff] }
 0x5f2   : > { %5408 = vmatmul.mubr.bf16.gmra.mrb[232].mxu0 %v10937_v62  ;;  %5794 = vmatmul.mubr.bf16.gmra.mrb[232].mxu1 %v10937_v62  ;;  %v10949_v62 = vld [vmem:[#allocation21_spill] sm:$0xff] }
 0x5f3   : > { %5417 = vmatprep.mubr.bf16.mxu0 %v10938_v24  ;;  %5803 = vmatprep.mubr.bf16.mxu1 %v10938_v24  ;;  %v10201_v10 = vrot.slane %v3221_v8, %v10949_v62  ;;  %v10951_v24 = vld [vmem:[#allocation37_spill] sm:$0xff] }
 0x5f4   : > { %5533 = vmatpush1.bf16.msra.mxu0 %v7543_v35  ;;  %5919 = vmatpush1.bf16.msra.mxu1 %v7545_v41  ;;  %v10192_v35 = vrot.slane %v3221_v8, %v10945_v7  ;;  %v10946_v41 = vld [vmem:[#allocation19_spill] sm:$0xff] }
 0x5f5   : > { %5534 = vmatprep.subr.bf16.mxu0 %v7552_v21  ;;  %5920 = vmatprep.subr.bf16.mxu1 %v7554_v18  ;;  %v10947_v21 = vsub.s32 2, %v10946_v41  ;;  %v10950_v56 = vsub.s32 3, %v10946_v41 }
 0x5f7   : > { %v10196_v18 = vrot.slane %v3221_v8, %v10947_v21  ;;  %v10205_v42 = vrot.slane %v3221_v8, %v10950_v56  ;;  %v10952_v8 = vld [vmem:[#allocation36_spill] sm:$0xff]  ;;  %v10953_v56 = vld [vmem:[#allocation39_spill] sm:$0xff] }
 0x5f8   : > { %5535 = vmatpush1.bf16.msra.mxu0 %v7551_v6  ;;  %5921 = vmatpush1.bf16.msra.mxu1 %v7553_v15 }
 0x5f9   : > { %5536 = vmatprep.subr.bf16.mxu0 %v7560_v1  ;;  %5922 = vmatprep.subr.bf16.mxu1 %v7562_v63 }
 0x5fa   : > { %5418 = vmatmul.mubr.bf16.gmra.mrb[236].mxu0 %v10939_v48  ;;  %5804 = vmatmul.mubr.bf16.gmra.mrb[236].mxu1 %v10939_v48 }
 0x5fb   : > { %5427 = vmatprep.mubr.bf16.mxu0 %v10940_v11  ;;  %5813 = vmatprep.mubr.bf16.mxu1 %v10940_v11 }
 0x5fc   : > { %5537 = vmatpush1.bf16.msra.mxu0 %v7559_v19  ;;  %5923 = vmatpush1.bf16.msra.mxu1 %v7561_v34 }
 0x5fd   : > { %5538 = vmatprep.subr.bf16.mxu0 %v7568_v30  ;;  %5924 = vmatprep.subr.bf16.mxu1 %v7570_v37 }
 0x600   : > { %5539 = vmatpush1.bf16.msra.mxu0 %v7567_v57  ;;  %5925 = vmatpush1.bf16.msra.mxu1 %v7569_v46 }
 0x602   : > { %5428 = vmatmul.mubr.bf16.gmra.mrb[240].mxu0 %v10941_v55  ;;  %5814 = vmatmul.mubr.bf16.gmra.mrb[240].mxu1 %v10941_v55 }
 0x603   : > { %5437 = vmatprep.mubr.bf16.mxu0 %v10942_v60  ;;  %5823 = vmatprep.mubr.bf16.mxu1 %v10942_v60 }
 0x60a   : > { %5438 = vmatmul.mubr.bf16.gmra.mrb[244].mxu0 %v10943_v44  ;;  %5824 = vmatmul.mubr.bf16.gmra.mrb[244].mxu1 %v10943_v44 }
 0x60b   : > { %5447 = vmatprep.mubr.bf16.mxu0 %v10944_v31  ;;  %5833 = vmatprep.mubr.bf16.mxu1 %v10944_v31 }
 0x612   : > { %5448 = vmatmul.mubr.bf16.gmra.mrb[248].mxu0 %v10948_v5  ;;  %5834 = vmatmul.mubr.bf16.gmra.mrb[248].mxu1 %v10948_v5 }
 0x613   : > { %5457 = vmatprep.mubr.bf16.mxu0 %v10951_v24  ;;  %5843 = vmatprep.mubr.bf16.mxu1 %v10951_v24 }
 0x615   : > { %v4770_v6 = vpop.f32.mrb[144].mxu0  ;;  %v5156_v15 = vpop.f32.mrb[144].mxu1 }
 0x616   : > { %v7754_v1 = vadd.f32 %v4770_v6, %v10192_v35  ;;  %v7818_v63 = vadd.f32 %v5156_v15, %v10196_v18  ;;  %v4772_v49 = vpop.f32.mrb[145].mxu0  ;;  %v5158_v47 = vpop.f32.mrb[145].mxu1 }
 0x617   : > { %v7755_v53 = vadd.f32 %v4772_v49, %v10201_v10  ;;  %v7819_v14 = vadd.f32 %v5158_v47, %v10205_v42  ;;  %v4774_v19 = vpop.f32.mrb[146].mxu0  ;;  %v5160_v34 = vpop.f32.mrb[146].mxu1 }
 0x618   : > { %v7756_v30 = vadd.f32 %v4774_v19, %v10192_v35  ;;  %v7820_v37 = vadd.f32 %v5160_v34, %v10196_v18  ;;  %v4776_v48 = vpop.f32.mrb[147].mxu0  ;;  %v5162_v11 = vpop.f32.mrb[147].mxu1  ;;  %v6087_v55 = vmax.f32 %v7754_v1, 0.0  ;;  %v6089_v60 = vmax.f32 %v7818_v63, 0.0 }
 0x619   : > { %v7757_v57 = vadd.f32 %v4776_v48, %v10201_v10  ;;  %v7821_v46 = vadd.f32 %v5162_v11, %v10205_v42  ;;  %v6088_v7 = vmax.f32 %v7755_v53, 0.0  ;;  %v6090_v21 = vmax.f32 %v7819_v14, 0.0 }
 0x61a   : > { %v6095_v44 = vmax.f32 %v7756_v30, 0.0  ;;  %v6097_v31 = vmax.f32 %v7820_v37, 0.0  ;;  %5458 = vmatmul.mubr.bf16.gmra.mrb[252].mxu0 %v10952_v8  ;;  %5844 = vmatmul.mubr.bf16.gmra.mrb[252].mxu1 %v10952_v8 }
 0x61b   : > { %v6096_v5 = vmax.f32 %v7757_v57, 0.0  ;;  %v6098_v62 = vmax.f32 %v7821_v46, 0.0  ;;  %5467 = vmatprep.mubr.bf16.mxu0 %v10953_v56  ;;  %5853 = vmatprep.mubr.bf16.mxu1 %v10953_v56 }
 0x61c   : > { %v6491_v24 = vmax.f32 %v6087_v55, %v6095_v44  ;;  %v6565_v6 = vmax.f32 %v6089_v60, %v6097_v31 }
 0x61d   : > { %v6528_v15 = vmax.f32 %v6088_v7, %v6096_v5  ;;  %v6602_v49 = vmax.f32 %v6090_v21, %v6098_v62  ;;  %v4780_v1 = vpop.f32.mrb[148].mxu0  ;;  %v5166_v63 = vpop.f32.mrb[148].mxu1 }
 0x61e   : > { %v7758_v47 = vadd.f32 %v4780_v1, %v10192_v35  ;;  %v7822_v19 = vadd.f32 %v5166_v63, %v10196_v18  ;;  %v4782_v34 = vpop.f32.mrb[149].mxu0  ;;  %v5168_v30 = vpop.f32.mrb[149].mxu1  ;;  %v10954_v63 = vld [vmem:[#allocation38_spill] sm:$0xff] }
 0x61f   : > { %v7759_v53 = vadd.f32 %v4782_v34, %v10201_v10  ;;  %v7823_v14 = vadd.f32 %v5168_v30, %v10205_v42  ;;  %v4784_v37 = vpop.f32.mrb[150].mxu0  ;;  %v5170_v48 = vpop.f32.mrb[150].mxu1 }
 0x620   : > { %v6103_v11 = vmax.f32 %v7758_v47, 0.0  ;;  %v6105_v57 = vmax.f32 %v7822_v19, 0.0  ;;  %v7760_v46 = vadd.f32 %v4784_v37, %v10192_v35  ;;  %v7824_v55 = vadd.f32 %v5170_v48, %v10196_v18  ;;  %v4786_v60 = vpop.f32.mrb[151].mxu0  ;;  %v5172_v44 = vpop.f32.mrb[151].mxu1  ;;  %v10955_v37 = vld [vmem:[#allocation52_spill] sm:$0xff] }
 0x621   : > { %v6104_v31 = vmax.f32 %v7759_v53, 0.0  ;;  %v6106_v8 = vmax.f32 %v7823_v14, 0.0  ;;  %v7761_v7 = vadd.f32 %v4786_v60, %v10201_v10  ;;  %v7825_v21 = vadd.f32 %v5172_v44, %v10205_v42 }
 0x622   : > { %v6492_v5 = vmax.f32 %v6491_v24, %v6103_v11  ;;  %v6566_v62 = vmax.f32 %v6565_v6, %v6105_v57  ;;  %v6111_v56 = vmax.f32 %v7760_v46, 0.0  ;;  %v6113_v1 = vmax.f32 %v7824_v55, 0.0  ;;  %5468 = vmatmul.mubr.bf16.gmra.mrb[0].mxu0 %v10954_v63  ;;  %5854 = vmatmul.mubr.bf16.gmra.mrb[0].mxu1 %v10954_v63 }
 0x623   : > { %v6529_v47 = vmax.f32 %v6528_v15, %v6104_v31  ;;  %v6603_v19 = vmax.f32 %v6602_v49, %v6106_v8  ;;  %v6112_v34 = vmax.f32 %v7761_v7, 0.0  ;;  %v6114_v30 = vmax.f32 %v7825_v21, 0.0  ;;  %5477 = vmatprep.mubr.bf16.mxu0 %v10955_v37  ;;  %5863 = vmatprep.mubr.bf16.mxu1 %v10955_v37 }
 0x624   : > { %v6493_v53 = vmax.f32 %v6492_v5, %v6111_v56  ;;  %v6567_v14 = vmax.f32 %v6566_v62, %v6113_v1 }
 0x625   : > { %v6530_v48 = vmax.f32 %v6529_v47, %v6112_v34  ;;  %v6604_v60 = vmax.f32 %v6603_v19, %v6114_v30  ;;  %v4790_v24 = vpop.f32.mrb[152].mxu0  ;;  %v5176_v6 = vpop.f32.mrb[152].mxu1 }
 0x626   : > { %v7762_v11 = vadd.f32 %v4790_v24, %v10192_v35  ;;  %v7826_v57 = vadd.f32 %v5176_v6, %v10196_v18  ;;  %v4792_v46 = vpop.f32.mrb[153].mxu0  ;;  %v5178_v55 = vpop.f32.mrb[153].mxu1  ;;  %v10956_v6 = vld [vmem:[#allocation40_spill] sm:$0xff] }
 0x627   : > { %v7763_v15 = vadd.f32 %v4792_v46, %v10201_v10  ;;  %v7827_v49 = vadd.f32 %v5178_v55, %v10205_v42  ;;  %v4794_v44 = vpop.f32.mrb[154].mxu0  ;;  %v5180_v31 = vpop.f32.mrb[154].mxu1 }
 0x628   : > { %v6119_v8 = vmax.f32 %v7762_v11, 0.0  ;;  %v6121_v7 = vmax.f32 %v7826_v57, 0.0  ;;  %v7764_v21 = vadd.f32 %v4794_v44, %v10192_v35  ;;  %v7828_v5 = vadd.f32 %v5180_v31, %v10196_v18  ;;  %v4796_v62 = vpop.f32.mrb[155].mxu0  ;;  %v5182_v56 = vpop.f32.mrb[155].mxu1  ;;  %v10957_v44 = vld [vmem:[#allocation54_spill] sm:$0xff] }
 0x629   : > { %v6120_v1 = vmax.f32 %v7763_v15, 0.0  ;;  %v6122_v63 = vmax.f32 %v7827_v49, 0.0  ;;  %v7765_v47 = vadd.f32 %v4796_v62, %v10201_v10  ;;  %v7829_v19 = vadd.f32 %v5182_v56, %v10205_v42 }
 0x62a   : > { %v6494_v34 = vmax.f32 %v6493_v53, %v6119_v8  ;;  %v6568_v30 = vmax.f32 %v6567_v14, %v6121_v7  ;;  %v6127_v37 = vmax.f32 %v7764_v21, 0.0  ;;  %v6129_v24 = vmax.f32 %v7828_v5, 0.0  ;;  %5478 = vmatmul.mubr.bf16.gmra.mrb[4].mxu0 %v10956_v6  ;;  %5864 = vmatmul.mubr.bf16.gmra.mrb[4].mxu1 %v10956_v6 }
 0x62b   : > { %v6531_v11 = vmax.f32 %v6530_v48, %v6120_v1  ;;  %v6605_v57 = vmax.f32 %v6604_v60, %v6122_v63  ;;  %v6128_v46 = vmax.f32 %v7765_v47, 0.0  ;;  %v6130_v55 = vmax.f32 %v7829_v19, 0.0  ;;  %5487 = vmatprep.mubr.bf16.mxu0 %v10957_v44  ;;  %5873 = vmatprep.mubr.bf16.mxu1 %v10957_v44 }
 0x62c   : > { %v6495_v15 = vmax.f32 %v6494_v34, %v6127_v37  ;;  %v6569_v49 = vmax.f32 %v6568_v30, %v6129_v24 }
 0x62d   : > { %v6532_v31 = vmax.f32 %v6531_v11, %v6128_v46  ;;  %v6606_v62 = vmax.f32 %v6605_v57, %v6130_v55  ;;  %v4800_v53 = vpop.f32.mrb[156].mxu0  ;;  %v5186_v14 = vpop.f32.mrb[156].mxu1 }
 0x62e   : > { %v7766_v8 = vadd.f32 %v4800_v53, %v10192_v35  ;;  %v7830_v7 = vadd.f32 %v5186_v14, %v10196_v18  ;;  %v4802_v21 = vpop.f32.mrb[157].mxu0  ;;  %v5188_v5 = vpop.f32.mrb[157].mxu1  ;;  %v10958_v14 = vld [vmem:[#allocation53_spill] sm:$0xff] }
 0x62f   : > { %v7767_v48 = vadd.f32 %v4802_v21, %v10201_v10  ;;  %v7831_v60 = vadd.f32 %v5188_v5, %v10205_v42  ;;  %v4804_v56 = vpop.f32.mrb[158].mxu0  ;;  %v5190_v1 = vpop.f32.mrb[158].mxu1 }
 0x630   : > { %v6135_v63 = vmax.f32 %v7766_v8, 0.0  ;;  %v6137_v47 = vmax.f32 %v7830_v7, 0.0  ;;  %v7768_v19 = vadd.f32 %v4804_v56, %v10192_v35  ;;  %v7832_v34 = vadd.f32 %v5190_v1, %v10196_v18  ;;  %v4806_v30 = vpop.f32.mrb[159].mxu0  ;;  %v5192_v37 = vpop.f32.mrb[159].mxu1  ;;  %v10959_v56 = vld [vmem:[#allocation56_spill] sm:$0xff] }
 0x631   : > { %v6136_v24 = vmax.f32 %v7767_v48, 0.0  ;;  %v6138_v6 = vmax.f32 %v7831_v60, 0.0  ;;  %v7769_v11 = vadd.f32 %v4806_v30, %v10201_v10  ;;  %v7833_v57 = vadd.f32 %v5192_v37, %v10205_v42 }
 0x632   : > { %v6496_v46 = vmax.f32 %v6495_v15, %v6135_v63  ;;  %v6570_v55 = vmax.f32 %v6569_v49, %v6137_v47  ;;  %v6143_v44 = vmax.f32 %v7768_v19, 0.0  ;;  %v6145_v53 = vmax.f32 %v7832_v34, 0.0  ;;  %5488 = vmatmul.mubr.bf16.gmra.mrb[8].mxu0 %v10958_v14  ;;  %5874 = vmatmul.mubr.bf16.gmra.mrb[8].mxu1 %v10958_v14 }
 0x633   : > { %v6533_v8 = vmax.f32 %v6532_v31, %v6136_v24  ;;  %v6607_v7 = vmax.f32 %v6606_v62, %v6138_v6  ;;  %v6144_v21 = vmax.f32 %v7769_v11, 0.0  ;;  %v6146_v5 = vmax.f32 %v7833_v57, 0.0  ;;  %5497 = vmatprep.mubr.bf16.mxu0 %v10959_v56  ;;  %5883 = vmatprep.mubr.bf16.mxu1 %v10959_v56 }
 0x634   : > { %v6497_v48 = vmax.f32 %v6496_v46, %v6143_v44  ;;  %v6571_v60 = vmax.f32 %v6570_v55, %v6145_v53 }
 0x635   : > { %v6534_v1 = vmax.f32 %v6533_v8, %v6144_v21  ;;  %v6608_v30 = vmax.f32 %v6607_v7, %v6146_v5  ;;  %v4810_v15 = vpop.f32.mrb[160].mxu0  ;;  %v5196_v49 = vpop.f32.mrb[160].mxu1 }
 0x636   : > { %v7770_v63 = vadd.f32 %v4810_v15, %v10192_v35  ;;  %v7834_v47 = vadd.f32 %v5196_v49, %v10196_v18  ;;  %v4812_v19 = vpop.f32.mrb[161].mxu0  ;;  %v5198_v34 = vpop.f32.mrb[161].mxu1  ;;  %v10960_v49 = vld [vmem:[#allocation55_spill] sm:$0xff] }
 0x637   : > { %v7771_v31 = vadd.f32 %v4812_v19, %v10201_v10  ;;  %v7835_v62 = vadd.f32 %v5198_v34, %v10205_v42  ;;  %v4814_v37 = vpop.f32.mrb[162].mxu0  ;;  %v5200_v24 = vpop.f32.mrb[162].mxu1 }
 0x638   : > { %v6151_v6 = vmax.f32 %v7770_v63, 0.0  ;;  %v6153_v11 = vmax.f32 %v7834_v47, 0.0  ;;  %v7772_v57 = vadd.f32 %v4814_v37, %v10192_v35  ;;  %v7836_v46 = vadd.f32 %v5200_v24, %v10196_v18  ;;  %v4816_v55 = vpop.f32.mrb[163].mxu0  ;;  %v5202_v44 = vpop.f32.mrb[163].mxu1  ;;  %v10961_v37 = vld [vmem:[#allocation43_spill] sm:$0xff] }
 0x639   : > { %v6152_v53 = vmax.f32 %v7771_v31, 0.0  ;;  %v6154_v14 = vmax.f32 %v7835_v62, 0.0  ;;  %v7773_v8 = vadd.f32 %v4816_v55, %v10201_v10  ;;  %v7837_v7 = vadd.f32 %v5202_v44, %v10205_v42 }
 0x63a   : > { %v6498_v21 = vmax.f32 %v6497_v48, %v6151_v6  ;;  %v6572_v5 = vmax.f32 %v6571_v60, %v6153_v11  ;;  %v6159_v56 = vmax.f32 %v7772_v57, 0.0  ;;  %v6161_v15 = vmax.f32 %v7836_v46, 0.0  ;;  %5498 = vmatmul.mubr.bf16.gmra.mrb[12].mxu0 %v10960_v49  ;;  %5884 = vmatmul.mubr.bf16.gmra.mrb[12].mxu1 %v10960_v49 }
 0x63b   : > { %v6535_v63 = vmax.f32 %v6534_v1, %v6152_v53  ;;  %v6609_v47 = vmax.f32 %v6608_v30, %v6154_v14  ;;  %v6160_v19 = vmax.f32 %v7773_v8, 0.0  ;;  %v6162_v34 = vmax.f32 %v7837_v7, 0.0  ;;  %5540 = vmatprep.mubr.bf16.mxu0 %v10961_v37  ;;  %5926 = vmatprep.mubr.bf16.mxu1 %v10961_v37 }
 0x63c   : > { %v6499_v31 = vmax.f32 %v6498_v21, %v6159_v56  ;;  %v6573_v62 = vmax.f32 %v6572_v5, %v6161_v15 }
 0x63d   : > { %v6536_v24 = vmax.f32 %v6535_v63, %v6160_v19  ;;  %v6610_v55 = vmax.f32 %v6609_v47, %v6162_v34  ;;  %v4820_v48 = vpop.f32.mrb[164].mxu0  ;;  %v5206_v60 = vpop.f32.mrb[164].mxu1 }
 0x63e   : > { %v7774_v6 = vadd.f32 %v4820_v48, %v10192_v35  ;;  %v7838_v11 = vadd.f32 %v5206_v60, %v10196_v18  ;;  %v4822_v57 = vpop.f32.mrb[165].mxu0  ;;  %v5208_v46 = vpop.f32.mrb[165].mxu1 }
 0x63f   : > { %v7775_v1 = vadd.f32 %v4822_v57, %v10201_v10  ;;  %v7839_v30 = vadd.f32 %v5208_v46, %v10205_v42  ;;  %v4824_v44 = vpop.f32.mrb[166].mxu0  ;;  %v5210_v53 = vpop.f32.mrb[166].mxu1 }
 0x640   : > { %v6167_v14 = vmax.f32 %v7774_v6, 0.0  ;;  %v6169_v8 = vmax.f32 %v7838_v11, 0.0  ;;  %v7776_v7 = vadd.f32 %v4824_v44, %v10192_v35  ;;  %v7840_v21 = vadd.f32 %v5210_v53, %v10196_v18  ;;  %v4826_v5 = vpop.f32.mrb[167].mxu0  ;;  %v5212_v56 = vpop.f32.mrb[167].mxu1 }
 0x641   : > { %v6168_v15 = vmax.f32 %v7775_v1, 0.0  ;;  %v6170_v49 = vmax.f32 %v7839_v30, 0.0  ;;  %v7777_v63 = vadd.f32 %v4826_v5, %v10201_v10  ;;  %v7841_v47 = vadd.f32 %v5212_v56, %v10205_v42 }
 0x642   : > { %v6500_v19 = vmax.f32 %v6499_v31, %v6167_v14  ;;  %v6574_v34 = vmax.f32 %v6573_v62, %v6169_v8  ;;  %v6175_v37 = vmax.f32 %v7776_v7, 0.0  ;;  %v6177_v48 = vmax.f32 %v7840_v21, 0.0  ;;  %5541 = vmatmul.mubr.bf16.vlgmr.msra.gmra.mrb[208].mxu0 %v10919_v58  ;;  %5927 = vmatmul.mubr.bf16.vlgmr.msra.gmra.mrb[208].mxu1 %v10919_v58 }
 0x643   : > { %v6537_v60 = vmax.f32 %v6536_v24, %v6168_v15  ;;  %v6611_v6 = vmax.f32 %v6610_v55, %v6170_v49  ;;  %v6176_v11 = vmax.f32 %v7777_v63, 0.0  ;;  %v6178_v57 = vmax.f32 %v7841_v47, 0.0  ;;  %5550 = vmatprep.mubr.bf16.mxu0 %v9530_v51  ;;  %5936 = vmatprep.mubr.bf16.mxu1 %v9530_v51 }
 0x644   : > { %v6501_v46 = vmax.f32 %v6500_v19, %v6175_v37  ;;  %v6575_v1 = vmax.f32 %v6574_v34, %v6177_v48 }
 0x645   : > { %v6538_v30 = vmax.f32 %v6537_v60, %v6176_v11  ;;  %v6612_v44 = vmax.f32 %v6611_v6, %v6178_v57  ;;  %v4830_v31 = vpop.f32.mrb[168].mxu0  ;;  %v5216_v62 = vpop.f32.mrb[168].mxu1 }
 0x646   : > { %v7778_v53 = vadd.f32 %v4830_v31, %v10192_v35  ;;  %v7842_v14 = vadd.f32 %v5216_v62, %v10196_v18  ;;  %v4832_v8 = vpop.f32.mrb[169].mxu0  ;;  %v5218_v58 = vpop.f32.mrb[169].mxu1 }
 0x647   : > { %v7779_v24 = vadd.f32 %v4832_v8, %v10201_v10  ;;  %v7843_v55 = vadd.f32 %v5218_v58, %v10205_v42  ;;  %v4834_v7 = vpop.f32.mrb[170].mxu0  ;;  %v5220_v21 = vpop.f32.mrb[170].mxu1 }
 0x648   : > { %v6183_v5 = vmax.f32 %v7778_v53, 0.0  ;;  %v6185_v51 = vmax.f32 %v7842_v14, 0.0  ;;  %v7780_v56 = vadd.f32 %v4834_v7, %v10192_v35  ;;  %v7844_v15 = vadd.f32 %v5220_v21, %v10196_v18  ;;  %v4836_v49 = vpop.f32.mrb[171].mxu0  ;;  %v5222_v63 = vpop.f32.mrb[171].mxu1 }
 0x649   : > { %v6184_v47 = vmax.f32 %v7779_v24, 0.0  ;;  %v6186_v19 = vmax.f32 %v7843_v55, 0.0  ;;  %v7781_v34 = vadd.f32 %v4836_v49, %v10201_v10  ;;  %v7845_v37 = vadd.f32 %v5222_v63, %v10205_v42 }
 0x64a   : > { %v6502_v48 = vmax.f32 %v6501_v46, %v6183_v5  ;;  %v6576_v60 = vmax.f32 %v6575_v1, %v6185_v51  ;;  %v6191_v6 = vmax.f32 %v7780_v56, 0.0  ;;  %v6193_v11 = vmax.f32 %v7844_v15, 0.0  ;;  %5551 = vmatmul.mubr.bf16.gmra.mrb[212].mxu0 %v9526_v43  ;;  %5937 = vmatmul.mubr.bf16.gmra.mrb[212].mxu1 %v9526_v43 }
 0x64b   : > { %v6539_v57 = vmax.f32 %v6538_v30, %v6184_v47  ;;  %v6613_v31 = vmax.f32 %v6612_v44, %v6186_v19  ;;  %v6192_v62 = vmax.f32 %v7781_v34, 0.0  ;;  %v6194_v53 = vmax.f32 %v7845_v37, 0.0  ;;  %5560 = vmatprep.mubr.bf16.mxu0 %v9586_v2  ;;  %5946 = vmatprep.mubr.bf16.mxu1 %v9586_v2 }
 0x64c   : > { %v6503_v14 = vmax.f32 %v6502_v48, %v6191_v6  ;;  %v6577_v8 = vmax.f32 %v6576_v60, %v6193_v11 }
 0x64d   : > { %v6540_v58 = vmax.f32 %v6539_v57, %v6192_v62  ;;  %v6614_v24 = vmax.f32 %v6613_v31, %v6194_v53  ;;  %v4840_v46 = vpop.f32.mrb[172].mxu0  ;;  %v5226_v1 = vpop.f32.mrb[172].mxu1 }
 0x64e   : > { %v7782_v55 = vadd.f32 %v4840_v46, %v10192_v35  ;;  %v7846_v7 = vadd.f32 %v5226_v1, %v10196_v18  ;;  %v4842_v21 = vpop.f32.mrb[173].mxu0  ;;  %v5228_v43 = vpop.f32.mrb[173].mxu1 }
 0x64f   : > { %v7783_v30 = vadd.f32 %v4842_v21, %v10201_v10  ;;  %v7847_v44 = vadd.f32 %v5228_v43, %v10205_v42  ;;  %v4844_v5 = vpop.f32.mrb[174].mxu0  ;;  %v5230_v51 = vpop.f32.mrb[174].mxu1 }
 0x650   : > { %v6199_v56 = vmax.f32 %v7782_v55, 0.0  ;;  %v6201_v2 = vmax.f32 %v7846_v7, 0.0  ;;  %v7784_v15 = vadd.f32 %v4844_v5, %v10192_v35  ;;  %v7848_v49 = vadd.f32 %v5230_v51, %v10196_v18  ;;  %v4846_v63 = vpop.f32.mrb[175].mxu0  ;;  %v5232_v47 = vpop.f32.mrb[175].mxu1 }
 0x651   : > { %v6200_v19 = vmax.f32 %v7783_v30, 0.0  ;;  %v6202_v34 = vmax.f32 %v7847_v44, 0.0  ;;  %v7785_v37 = vadd.f32 %v4846_v63, %v10201_v10  ;;  %v7849_v48 = vadd.f32 %v5232_v47, %v10205_v42 }
 0x652   : > { %v6504_v60 = vmax.f32 %v6503_v14, %v6199_v56  ;;  %v6578_v6 = vmax.f32 %v6577_v8, %v6201_v2  ;;  %v6207_v11 = vmax.f32 %v7784_v15, 0.0  ;;  %v6209_v57 = vmax.f32 %v7848_v49, 0.0  ;;  %5561 = vmatmul.mubr.bf16.gmra.mrb[216].mxu0 %v9578_v23  ;;  %5947 = vmatmul.mubr.bf16.gmra.mrb[216].mxu1 %v9578_v23 }
 0x653   : > { %v6541_v31 = vmax.f32 %v6540_v58, %v6200_v19  ;;  %v6615_v62 = vmax.f32 %v6614_v24, %v6202_v34  ;;  %v6208_v53 = vmax.f32 %v7785_v37, 0.0  ;;  %v6210_v46 = vmax.f32 %v7849_v48, 0.0  ;;  %5570 = vmatprep.mubr.bf16.mxu0 %v9638_v39  ;;  %5956 = vmatprep.mubr.bf16.mxu1 %v9638_v39 }
 0x654   : > { %v6505_v1 = vmax.f32 %v6504_v60, %v6207_v11  ;;  %v6579_v55 = vmax.f32 %v6578_v6, %v6209_v57 }
 0x655   : > { %v6542_v7 = vmax.f32 %v6541_v31, %v6208_v53  ;;  %v6616_v21 = vmax.f32 %v6615_v62, %v6210_v46  ;;  %v4850_v14 = vpop.f32.mrb[176].mxu0  ;;  %v5236_v8 = vpop.f32.mrb[176].mxu1 }
 0x656   : > { %v7786_v43 = vadd.f32 %v4850_v14, %v10192_v35  ;;  %v7850_v30 = vadd.f32 %v5236_v8, %v10196_v18  ;;  %v4852_v44 = vpop.f32.mrb[177].mxu0  ;;  %v5238_v23 = vpop.f32.mrb[177].mxu1 }
 0x657   : > { %v7787_v58 = vadd.f32 %v4852_v44, %v10201_v10  ;;  %v7851_v24 = vadd.f32 %v5238_v23, %v10205_v42  ;;  %v4854_v5 = vpop.f32.mrb[178].mxu0  ;;  %v5240_v51 = vpop.f32.mrb[178].mxu1 }
 0x658   : > { %v6215_v56 = vmax.f32 %v7786_v43, 0.0  ;;  %v6217_v39 = vmax.f32 %v7850_v30, 0.0  ;;  %v7788_v2 = vadd.f32 %v4854_v5, %v10192_v35  ;;  %v7852_v15 = vadd.f32 %v5240_v51, %v10196_v18  ;;  %v4856_v49 = vpop.f32.mrb[179].mxu0  ;;  %v5242_v63 = vpop.f32.mrb[179].mxu1 }
 0x659   : > { %v6216_v47 = vmax.f32 %v7787_v58, 0.0  ;;  %v6218_v19 = vmax.f32 %v7851_v24, 0.0  ;;  %v7789_v34 = vadd.f32 %v4856_v49, %v10201_v10  ;;  %v7853_v37 = vadd.f32 %v5242_v63, %v10205_v42 }
 0x65a   : > { %v6506_v48 = vmax.f32 %v6505_v1, %v6215_v56  ;;  %v6580_v60 = vmax.f32 %v6579_v55, %v6217_v39  ;;  %v6223_v6 = vmax.f32 %v7788_v2, 0.0  ;;  %v6225_v11 = vmax.f32 %v7852_v15, 0.0  ;;  %5571 = vmatmul.mubr.bf16.gmra.mrb[220].mxu0 %v9634_v59  ;;  %5957 = vmatmul.mubr.bf16.gmra.mrb[220].mxu1 %v9634_v59 }
 0x65b   : > { %v6543_v57 = vmax.f32 %v6542_v7, %v6216_v47  ;;  %v6617_v31 = vmax.f32 %v6616_v21, %v6218_v19  ;;  %v6224_v62 = vmax.f32 %v7789_v34, 0.0  ;;  %v6226_v53 = vmax.f32 %v7853_v37, 0.0  ;;  %5580 = vmatprep.mubr.bf16.mxu0 %v9690_v32  ;;  %5966 = vmatprep.mubr.bf16.mxu1 %v9690_v32 }
 0x65c   : > { %v6507_v46 = vmax.f32 %v6506_v48, %v6223_v6  ;;  %v6581_v14 = vmax.f32 %v6580_v60, %v6225_v11 }
 0x65d   : > { %v6544_v8 = vmax.f32 %v6543_v57, %v6224_v62  ;;  %v6618_v43 = vmax.f32 %v6617_v31, %v6226_v53  ;;  %v4860_v1 = vpop.f32.mrb[180].mxu0  ;;  %v5246_v55 = vpop.f32.mrb[180].mxu1 }
 0x65e   : > { %v7790_v30 = vadd.f32 %v4860_v1, %v10192_v35  ;;  %v7854_v44 = vadd.f32 %v5246_v55, %v10196_v18  ;;  %v4862_v23 = vpop.f32.mrb[181].mxu0  ;;  %v5248_v59 = vpop.f32.mrb[181].mxu1 }
 0x65f   : > { %v7791_v7 = vadd.f32 %v4862_v23, %v10201_v10  ;;  %v7855_v21 = vadd.f32 %v5248_v59, %v10205_v42  ;;  %v4864_v58 = vpop.f32.mrb[182].mxu0  ;;  %v5250_v24 = vpop.f32.mrb[182].mxu1 }
 0x660   : > { %v6231_v5 = vmax.f32 %v7790_v30, 0.0  ;;  %v6233_v32 = vmax.f32 %v7854_v44, 0.0  ;;  %v7792_v51 = vadd.f32 %v4864_v58, %v10192_v35  ;;  %v7856_v56 = vadd.f32 %v5250_v24, %v10196_v18  ;;  %v4866_v39 = vpop.f32.mrb[183].mxu0  ;;  %v5252_v2 = vpop.f32.mrb[183].mxu1 }
 0x661   : > { %v6232_v15 = vmax.f32 %v7791_v7, 0.0  ;;  %v6234_v49 = vmax.f32 %v7855_v21, 0.0  ;;  %v7793_v63 = vadd.f32 %v4866_v39, %v10201_v10  ;;  %v7857_v47 = vadd.f32 %v5252_v2, %v10205_v42 }
 0x662   : > { %v6508_v19 = vmax.f32 %v6507_v46, %v6231_v5  ;;  %v6582_v34 = vmax.f32 %v6581_v14, %v6233_v32  ;;  %v6239_v37 = vmax.f32 %v7792_v51, 0.0  ;;  %v6241_v48 = vmax.f32 %v7856_v56, 0.0  ;;  %5581 = vmatmul.mubr.bf16.gmra.mrb[224].mxu0 %v9686_v33  ;;  %5967 = vmatmul.mubr.bf16.gmra.mrb[224].mxu1 %v9686_v33 }
 0x663   : > { %v6545_v60 = vmax.f32 %v6544_v8, %v6232_v15  ;;  %v6619_v6 = vmax.f32 %v6618_v43, %v6234_v49  ;;  %v6240_v11 = vmax.f32 %v7793_v63, 0.0  ;;  %v6242_v57 = vmax.f32 %v7857_v47, 0.0  ;;  %5590 = vmatprep.mubr.bf16.mxu0 %v9742_v12  ;;  %5976 = vmatprep.mubr.bf16.mxu1 %v9742_v12 }
 0x664   : > { %v6509_v31 = vmax.f32 %v6508_v19, %v6239_v37  ;;  %v6583_v62 = vmax.f32 %v6582_v34, %v6241_v48 }
 0x665   : > { %v6546_v53 = vmax.f32 %v6545_v60, %v6240_v11  ;;  %v6620_v1 = vmax.f32 %v6619_v6, %v6242_v57  ;;  %v4870_v46 = vpop.f32.mrb[184].mxu0  ;;  %v5256_v14 = vpop.f32.mrb[184].mxu1 }
 0x666   : > { %v7794_v55 = vadd.f32 %v4870_v46, %v10192_v35  ;;  %v7858_v30 = vadd.f32 %v5256_v14, %v10196_v18  ;;  %v4872_v44 = vpop.f32.mrb[185].mxu0  ;;  %v5258_v33 = vpop.f32.mrb[185].mxu1 }
 0x667   : > { %v7795_v8 = vadd.f32 %v4872_v44, %v10201_v10  ;;  %v7859_v43 = vadd.f32 %v5258_v33, %v10205_v42  ;;  %v4874_v23 = vpop.f32.mrb[186].mxu0  ;;  %v5260_v59 = vpop.f32.mrb[186].mxu1 }
 0x668   : > { %v6247_v7 = vmax.f32 %v7794_v55, 0.0  ;;  %v6249_v12 = vmax.f32 %v7858_v30, 0.0  ;;  %v7796_v21 = vadd.f32 %v4874_v23, %v10192_v35  ;;  %v7860_v58 = vadd.f32 %v5260_v59, %v10196_v18  ;;  %v4876_v24 = vpop.f32.mrb[187].mxu0  ;;  %v5262_v5 = vpop.f32.mrb[187].mxu1 }
 0x669   : > { %v6248_v32 = vmax.f32 %v7795_v8, 0.0  ;;  %v6250_v51 = vmax.f32 %v7859_v43, 0.0  ;;  %v7797_v56 = vadd.f32 %v4876_v24, %v10201_v10  ;;  %v7861_v39 = vadd.f32 %v5262_v5, %v10205_v42 }
 0x66a   : > { %v6510_v2 = vmax.f32 %v6509_v31, %v6247_v7  ;;  %v6584_v15 = vmax.f32 %v6583_v62, %v6249_v12  ;;  %v6255_v49 = vmax.f32 %v7796_v21, 0.0  ;;  %v6257_v63 = vmax.f32 %v7860_v58, 0.0  ;;  %5591 = vmatmul.mubr.bf16.gmra.mrb[228].mxu0 %v9738_v52  ;;  %5977 = vmatmul.mubr.bf16.gmra.mrb[228].mxu1 %v9738_v52 }
 0x66b   : > { %v6547_v47 = vmax.f32 %v6546_v53, %v6248_v32  ;;  %v6621_v19 = vmax.f32 %v6620_v1, %v6250_v51  ;;  %v6256_v34 = vmax.f32 %v7797_v56, 0.0  ;;  %v6258_v37 = vmax.f32 %v7861_v39, 0.0  ;;  %5600 = vmatprep.mubr.bf16.mxu0 %v9794_v20  ;;  %5986 = vmatprep.mubr.bf16.mxu1 %v9794_v20 }
 0x66c   : > { %v6511_v48 = vmax.f32 %v6510_v2, %v6255_v49  ;;  %v6585_v60 = vmax.f32 %v6584_v15, %v6257_v63 }
 0x66d   : > { %v6548_v6 = vmax.f32 %v6547_v47, %v6256_v34  ;;  %v6622_v11 = vmax.f32 %v6621_v19, %v6258_v37  ;;  %v4880_v57 = vpop.f32.mrb[188].mxu0  ;;  %v5266_v31 = vpop.f32.mrb[188].mxu1 }
 0x66e   : > { %v7798_v62 = vadd.f32 %v4880_v57, %v10192_v35  ;;  %v7862_v46 = vadd.f32 %v5266_v31, %v10196_v18  ;;  %v4882_v14 = vpop.f32.mrb[189].mxu0  ;;  %v5268_v52 = vpop.f32.mrb[189].mxu1 }
 0x66f   : > { %v7799_v53 = vadd.f32 %v4882_v14, %v10201_v10  ;;  %v7863_v1 = vadd.f32 %v5268_v52, %v10205_v42  ;;  %v4884_v55 = vpop.f32.mrb[190].mxu0  ;;  %v5270_v30 = vpop.f32.mrb[190].mxu1 }
 0x670   : > { %v6263_v44 = vmax.f32 %v7798_v62, 0.0  ;;  %v6265_v20 = vmax.f32 %v7862_v46, 0.0  ;;  %v7800_v33 = vadd.f32 %v4884_v55, %v10192_v35  ;;  %v7864_v8 = vadd.f32 %v5270_v30, %v10196_v18  ;;  %v4886_v43 = vpop.f32.mrb[191].mxu0  ;;  %v5272_v23 = vpop.f32.mrb[191].mxu1 }
 0x671   : > { %v6264_v59 = vmax.f32 %v7799_v53, 0.0  ;;  %v6266_v7 = vmax.f32 %v7863_v1, 0.0  ;;  %v7801_v12 = vadd.f32 %v4886_v43, %v10201_v10  ;;  %v7865_v21 = vadd.f32 %v5272_v23, %v10205_v42 }
 0x672   : > { %v6512_v58 = vmax.f32 %v6511_v48, %v6263_v44  ;;  %v6586_v24 = vmax.f32 %v6585_v60, %v6265_v20  ;;  %v6271_v5 = vmax.f32 %v7800_v33, 0.0  ;;  %v6273_v32 = vmax.f32 %v7864_v8, 0.0  ;;  %5601 = vmatmul.mubr.bf16.gmra.mrb[232].mxu0 %v9790_v0  ;;  %5987 = vmatmul.mubr.bf16.gmra.mrb[232].mxu1 %v9790_v0 }
 0x673   : > { %v6549_v51 = vmax.f32 %v6548_v6, %v6264_v59  ;;  %v6623_v56 = vmax.f32 %v6622_v11, %v6266_v7  ;;  %v6272_v39 = vmax.f32 %v7801_v12, 0.0  ;;  %v6274_v2 = vmax.f32 %v7865_v21, 0.0  ;;  %5610 = vmatprep.mubr.bf16.mxu0 %v9842_v16  ;;  %5996 = vmatprep.mubr.bf16.mxu1 %v9842_v16 }
 0x674   : > { %v6513_v15 = vmax.f32 %v6512_v58, %v6271_v5  ;;  %v6587_v49 = vmax.f32 %v6586_v24, %v6273_v32 }
 0x675   : > { %v6550_v63 = vmax.f32 %v6549_v51, %v6272_v39  ;;  %v6624_v47 = vmax.f32 %v6623_v56, %v6274_v2  ;;  %v4890_v19 = vpop.f32.mrb[192].mxu0  ;;  %v5276_v34 = vpop.f32.mrb[192].mxu1 }
 0x676   : > { %v7802_v37 = vadd.f32 %v4890_v19, %v10192_v35  ;;  %v7866_v48 = vadd.f32 %v5276_v34, %v10196_v18  ;;  %v4892_v60 = vpop.f32.mrb[193].mxu0  ;;  %v5278_v0 = vpop.f32.mrb[193].mxu1 }
 0x677   : > { %v7803_v6 = vadd.f32 %v4892_v60, %v10201_v10  ;;  %v7867_v11 = vadd.f32 %v5278_v0, %v10205_v42  ;;  %v4894_v57 = vpop.f32.mrb[194].mxu0  ;;  %v5280_v31 = vpop.f32.mrb[194].mxu1 }
 0x678   : > { %v6279_v62 = vmax.f32 %v7802_v37, 0.0  ;;  %v6281_v16 = vmax.f32 %v7866_v48, 0.0  ;;  %v7804_v46 = vadd.f32 %v4894_v57, %v10192_v35  ;;  %v7868_v14 = vadd.f32 %v5280_v31, %v10196_v18  ;;  %v4896_v52 = vpop.f32.mrb[195].mxu0  ;;  %v5282_v53 = vpop.f32.mrb[195].mxu1 }
 0x679   : > { %v6280_v1 = vmax.f32 %v7803_v6, 0.0  ;;  %v6282_v55 = vmax.f32 %v7867_v11, 0.0  ;;  %v7805_v30 = vadd.f32 %v4896_v52, %v10201_v10  ;;  %v7869_v44 = vadd.f32 %v5282_v53, %v10205_v42 }
 0x67a   : > { %v6514_v20 = vmax.f32 %v6513_v15, %v6279_v62  ;;  %v6588_v33 = vmax.f32 %v6587_v49, %v6281_v16  ;;  %v6287_v8 = vmax.f32 %v7804_v46, 0.0  ;;  %v6289_v43 = vmax.f32 %v7868_v14, 0.0  ;;  %5611 = vmatmul.mubr.bf16.gmra.mrb[236].mxu0 %v9838_v40  ;;  %5997 = vmatmul.mubr.bf16.gmra.mrb[236].mxu1 %v9838_v40 }
 0x67b   : > { %v6551_v23 = vmax.f32 %v6550_v63, %v6280_v1  ;;  %v6625_v59 = vmax.f32 %v6624_v47, %v6282_v55  ;;  %v6288_v7 = vmax.f32 %v7805_v30, 0.0  ;;  %v6290_v12 = vmax.f32 %v7869_v44, 0.0  ;;  %5620 = vmatprep.mubr.bf16.mxu0 %v9890_v27  ;;  %6006 = vmatprep.mubr.bf16.mxu1 %v9890_v27 }
 0x67c   : > { %v6515_v21 = vmax.f32 %v6514_v20, %v6287_v8  ;;  %v6589_v58 = vmax.f32 %v6588_v33, %v6289_v43 }
 0x67d   : > { %v6552_v24 = vmax.f32 %v6551_v23, %v6288_v7  ;;  %v6626_v5 = vmax.f32 %v6625_v59, %v6290_v12  ;;  %v4900_v32 = vpop.f32.mrb[196].mxu0  ;;  %v5286_v51 = vpop.f32.mrb[196].mxu1 }
 0x67e   : > { %v7806_v56 = vadd.f32 %v4900_v32, %v10192_v35  ;;  %v7870_v39 = vadd.f32 %v5286_v51, %v10196_v18  ;;  %v4902_v2 = vpop.f32.mrb[197].mxu0  ;;  %v5288_v40 = vpop.f32.mrb[197].mxu1 }
 0x67f   : > { %v7807_v15 = vadd.f32 %v4902_v2, %v10201_v10  ;;  %v7871_v49 = vadd.f32 %v5288_v40, %v10205_v42  ;;  %v4904_v63 = vpop.f32.mrb[198].mxu0  ;;  %v5290_v47 = vpop.f32.mrb[198].mxu1 }
 0x680   : > { %v6295_v19 = vmax.f32 %v7806_v56, 0.0  ;;  %v6297_v27 = vmax.f32 %v7870_v39, 0.0  ;;  %v7808_v34 = vadd.f32 %v4904_v63, %v10192_v35  ;;  %v7872_v37 = vadd.f32 %v5290_v47, %v10196_v18  ;;  %v4906_v48 = vpop.f32.mrb[199].mxu0  ;;  %v5292_v60 = vpop.f32.mrb[199].mxu1 }
 0x681   : > { %v6296_v0 = vmax.f32 %v7807_v15, 0.0  ;;  %v6298_v6 = vmax.f32 %v7871_v49, 0.0  ;;  %v7809_v11 = vadd.f32 %v4906_v48, %v10201_v10  ;;  %v7873_v57 = vadd.f32 %v5292_v60, %v10205_v42 }
 0x682   : > { %v6516_v31 = vmax.f32 %v6515_v21, %v6295_v19  ;;  %v6590_v62 = vmax.f32 %v6589_v58, %v6297_v27  ;;  %v6303_v16 = vmax.f32 %v7808_v34, 0.0  ;;  %v6305_v46 = vmax.f32 %v7872_v37, 0.0  ;;  %5621 = vmatmul.mubr.bf16.gmra.mrb[240].mxu0 %v9886_v9  ;;  %6007 = vmatmul.mubr.bf16.gmra.mrb[240].mxu1 %v9886_v9 }
 0x683   : > { %v6553_v14 = vmax.f32 %v6552_v24, %v6296_v0  ;;  %v6627_v52 = vmax.f32 %v6626_v5, %v6298_v6  ;;  %v6304_v53 = vmax.f32 %v7809_v11, 0.0  ;;  %v6306_v1 = vmax.f32 %v7873_v57, 0.0  ;;  %5630 = vmatprep.mubr.bf16.mxu0 %v9916_v4  ;;  %6016 = vmatprep.mubr.bf16.mxu1 %v9916_v4 }
 0x684   : > { %v6517_v55 = vmax.f32 %v6516_v31, %v6303_v16  ;;  %v6591_v30 = vmax.f32 %v6590_v62, %v6305_v46 }
 0x685   : > { %v6554_v44 = vmax.f32 %v6553_v14, %v6304_v53  ;;  %v6628_v20 = vmax.f32 %v6627_v52, %v6306_v1  ;;  %v4910_v33 = vpop.f32.mrb[200].mxu0  ;;  %v5296_v8 = vpop.f32.mrb[200].mxu1 }
 0x686   : > { %v7810_v43 = vadd.f32 %v4910_v33, %v10192_v35  ;;  %v7874_v23 = vadd.f32 %v5296_v8, %v10196_v18  ;;  %v4912_v59 = vpop.f32.mrb[201].mxu0  ;;  %v5298_v9 = vpop.f32.mrb[201].mxu1 }
 0x687   : > { %v7811_v7 = vadd.f32 %v4912_v59, %v10201_v10  ;;  %v7875_v12 = vadd.f32 %v5298_v9, %v10205_v42  ;;  %v4914_v21 = vpop.f32.mrb[202].mxu0  ;;  %v5300_v58 = vpop.f32.mrb[202].mxu1 }
 0x688   : > { %v6311_v24 = vmax.f32 %v7810_v43, 0.0  ;;  %v6313_v4 = vmax.f32 %v7874_v23, 0.0  ;;  %v7812_v5 = vadd.f32 %v4914_v21, %v10192_v35  ;;  %v7876_v32 = vadd.f32 %v5300_v58, %v10196_v18  ;;  %v4916_v51 = vpop.f32.mrb[203].mxu0  ;;  %v5302_v56 = vpop.f32.mrb[203].mxu1 }
 0x689   : > { %v6312_v39 = vmax.f32 %v7811_v7, 0.0  ;;  %v6314_v2 = vmax.f32 %v7875_v12, 0.0  ;;  %v7813_v40 = vadd.f32 %v4916_v51, %v10201_v10  ;;  %v7877_v15 = vadd.f32 %v5302_v56, %v10205_v42 }
 0x68a   : > { %v6518_v49 = vmax.f32 %v6517_v55, %v6311_v24  ;;  %v6592_v63 = vmax.f32 %v6591_v30, %v6313_v4  ;;  %v6319_v47 = vmax.f32 %v7812_v5, 0.0  ;;  %v6321_v19 = vmax.f32 %v7876_v32, 0.0  ;;  %5631 = vmatmul.mubr.bf16.gmra.mrb[244].mxu0 %v9912_v3  ;;  %6017 = vmatmul.mubr.bf16.gmra.mrb[244].mxu1 %v9912_v3 }
 0x68b   : > { %v6555_v27 = vmax.f32 %v6554_v44, %v6312_v39  ;;  %v6629_v34 = vmax.f32 %v6628_v20, %v6314_v2  ;;  %v6320_v37 = vmax.f32 %v7813_v40, 0.0  ;;  %v6322_v48 = vmax.f32 %v7877_v15, 0.0  ;;  %5640 = vmatprep.mubr.bf16.mxu0 %v9936_v29  ;;  %6026 = vmatprep.mubr.bf16.mxu1 %v9936_v29 }
 0x68c   : > { %v6519_v60 = vmax.f32 %v6518_v49, %v6319_v47  ;;  %v6593_v0 = vmax.f32 %v6592_v63, %v6321_v19 }
 0x68d   : > { %v6556_v6 = vmax.f32 %v6555_v27, %v6320_v37  ;;  %v6630_v11 = vmax.f32 %v6629_v34, %v6322_v48  ;;  %v4920_v57 = vpop.f32.mrb[204].mxu0  ;;  %v5306_v31 = vpop.f32.mrb[204].mxu1 }
 0x68e   : > { %v7814_v62 = vadd.f32 %v4920_v57, %v10192_v35  ;;  %v7878_v16 = vadd.f32 %v5306_v31, %v10196_v18  ;;  %v4922_v46 = vpop.f32.mrb[205].mxu0  ;;  %v5308_v3 = vpop.f32.mrb[205].mxu1 }
 0x68f   : > { %v7815_v14 = vadd.f32 %v4922_v46, %v10201_v10  ;;  %v7879_v52 = vadd.f32 %v5308_v3, %v10205_v42  ;;  %v4924_v53 = vpop.f32.mrb[206].mxu0  ;;  %v5310_v1 = vpop.f32.mrb[206].mxu1 }
 0x690   : > { %v6327_v55 = vmax.f32 %v7814_v62, 0.0  ;;  %v6329_v29 = vmax.f32 %v7878_v16, 0.0  ;;  %v7816_v30 = vadd.f32 %v4924_v53, %v10192_v35  ;;  %v7880_v44 = vadd.f32 %v5310_v1, %v10196_v18  ;;  %v4926_v20 = vpop.f32.mrb[207].mxu0  ;;  %v5312_v33 = vpop.f32.mrb[207].mxu1 }
 0x691   : > { %v6328_v8 = vmax.f32 %v7815_v14, 0.0  ;;  %v6330_v43 = vmax.f32 %v7879_v52, 0.0  ;;  %v7817_v23 = vadd.f32 %v4926_v20, %v10201_v10  ;;  %v7881_v59 = vadd.f32 %v5312_v33, %v10205_v42 }
 0x692   : > { %v6520_v9 = vmax.f32 %v6519_v60, %v6327_v55  ;;  %v6594_v7 = vmax.f32 %v6593_v0, %v6329_v29  ;;  %v6335_v12 = vmax.f32 %v7816_v30, 0.0  ;;  %v6337_v21 = vmax.f32 %v7880_v44, 0.0  ;;  %5641 = vmatmul.mubr.bf16.gmra.mrb[248].mxu0 %v9932_v36  ;;  %6027 = vmatmul.mubr.bf16.gmra.mrb[248].mxu1 %v9932_v36 }
 0x693   : > { %v6557_v58 = vmax.f32 %v6556_v6, %v6328_v8  ;;  %v6631_v35 = vmax.f32 %v6630_v11, %v6330_v43  ;;  %v6336_v24 = vmax.f32 %v7817_v23, 0.0  ;;  %v6338_v18 = vmax.f32 %v7881_v59, 0.0  ;;  %5650 = vmatprep.mubr.bf16.mxu0 %v9956_v50  ;;  %6036 = vmatprep.mubr.bf16.mxu1 %v9956_v50 }
 0x694   : > { %v6521_v4 = vmax.f32 %v6520_v9, %v6335_v12  ;;  %v6595_v10 = vmax.f32 %v6594_v7, %v6337_v21 }
 0x695   : > { %v6558_v5 = vmax.f32 %v6557_v58, %v6336_v24  ;;  %v6632_v42 = vmax.f32 %v6631_v35, %v6338_v18 }
 0x696   : > { %v6522_v32 = vrot.slane %v6521_v4, 4  ;;  %v6596_v51 = vrot.slane %v6595_v10, 4 }
 0x697   : > { %v6559_v56 = vrot.slane %v6558_v5, 4  ;;  %v6633_v39 = vrot.slane %v6632_v42, 4 }
 0x698   : > { %v6523_v2 = vmax.f32 %v6521_v4, %v6522_v32  ;;  %v6597_v40 = vmax.f32 %v6595_v10, %v6596_v51 }
 0x699   : > { %v6560_v15 = vmax.f32 %v6558_v5, %v6559_v56  ;;  %v6634_v36 = vmax.f32 %v6632_v42, %v6633_v39 }
 0x69a   : > { %v6524_v49 = vrot.slane %v6523_v2, 2  ;;  %v6598_v63 = vrot.slane %v6597_v40, 2  ;;  %5651 = vmatmul.mubr.bf16.gmra.mrb[252].mxu0 %v9952_v13  ;;  %6037 = vmatmul.mubr.bf16.gmra.mrb[252].mxu1 %v9952_v13 }
 0x69b   : > { %v6561_v47 = vrot.slane %v6560_v15, 2  ;;  %v6635_v50 = vrot.slane %v6634_v36, 2  ;;  %5660 = vmatprep.mubr.bf16.mxu0 %v9976_v26  ;;  %6046 = vmatprep.mubr.bf16.mxu1 %v9976_v26 }
 0x69c   : > { %v6525_v19 = vmax.f32 %v6523_v2, %v6524_v49  ;;  %v6599_v27 = vmax.f32 %v6597_v40, %v6598_v63 }
 0x69d   : > { %v6562_v34 = vmax.f32 %v6560_v15, %v6561_v47  ;;  %v6636_v37 = vmax.f32 %v6634_v36, %v6635_v50 }
 0x69e   : > { %v6526_v48 = vrot.slane %v6525_v19, 1  ;;  %v6600_v60 = vrot.slane %v6599_v27, 1 }
 0x69f   : > { %v6563_v0 = vrot.slane %v6562_v34, 1  ;;  %v6637_v6 = vrot.slane %v6636_v37, 1 }
 0x6a0   : > { %v6527_v11 = vmax.f32 %v6525_v19, %v6526_v48  ;;  %v6601_v57 = vmax.f32 %v6599_v27, %v6600_v60 }
 0x6a1   : > { %v6564_v31 = vmax.f32 %v6562_v34, %v6563_v0  ;;  %v6638_v62 = vmax.f32 %v6636_v37, %v6637_v6 }
 0x6a2   : > { %5661 = vmatmul.mubr.bf16.gmra.mrb[0].mxu0 %v9972_v45  ;;  %6047 = vmatmul.mubr.bf16.gmra.mrb[0].mxu1 %v9972_v45  ;;  %v3241_v45 = vsub.s32 4, %v10946_v41 }
 0x6a3   : > { %v6806_v13 = vcombine.low %v6527_v11, %v6564_v31  ;;  %v6807_v16 = vcombine.low %v6601_v57, %v6638_v62  ;;  %5670 = vmatprep.mubr.bf16.mxu0 %v9996_v25  ;;  %6056 = vmatprep.mubr.bf16.mxu1 %v9996_v25  ;;  %v3245_v25 = vsub.s32 5, %v10946_v41 }
 0x6a5   : > { %v10410_v26 = vrot.slane %v6806_v13, %v10922_v38  ;;  %v10413_v46 = vrot.slane %v6807_v16, %v10922_v38 }
 0x6a7   : > { %v6838_v3 = vcombine.low %v10410_v26, %v10413_v46 }
 0x6aa   : > { %5671 = vmatmul.mubr.bf16.gmra.mrb[4].mxu0 %v9992_v54  ;;  %6057 = vmatmul.mubr.bf16.gmra.mrb[4].mxu1 %v9992_v54  ;;  %v3249_v54 = vsub.s32 6, %v10946_v41 }
 0x6ab   : > { %5680 = vmatprep.mubr.bf16.mxu0 %v10016_v28  ;;  %6066 = vmatprep.mubr.bf16.mxu1 %v10016_v28  ;;  %v3253_v28 = vsub.s32 7, %v10946_v41 }
 0x6b2   : > { %5681 = vmatmul.mubr.bf16.gmra.mrb[8].mxu0 %v10012_v17  ;;  %6067 = vmatmul.mubr.bf16.gmra.mrb[8].mxu1 %v10012_v17  ;;  %v8495_v17 = vld [vmem:[%s10644_s12] sm:$0xff] }
 0x6b3   : > { %5690 = vmatprep.mubr.bf16.mxu0 %v10036_v61  ;;  %6076 = vmatprep.mubr.bf16.mxu1 %v10036_v61  ;;  %v10434_v14 = vrot.slane %v8495_v17, %v3241_v45  ;;  %v10436_v52 = vrot.slane %v8495_v17, %v3249_v54  ;;  %v10438_v61 = vrot.slane %v8495_v17, %v3245_v25 }
 0x6b4   : > { %v10440_v53 = vrot.slane %v8495_v17, %v3253_v28 }
 0x6ba   : > { %5691 = vmatmul.mubr.bf16.gmra.mrb[12].mxu0 %v10032_v22  ;;  %6077 = vmatmul.mubr.bf16.gmra.mrb[12].mxu1 %v10032_v22 }
 0x715   : > { %v5542_v22 = vpop.f32.mrb[208].mxu0  ;;  %v5928_v1 = vpop.f32.mrb[208].mxu1 }
 0x716   : > { %v7882_v55 = vadd.f32 %v5542_v22, %v10434_v14  ;;  %v7946_v29 = vadd.f32 %v5928_v1, %v10436_v52  ;;  %v5544_v30 = vpop.f32.mrb[209].mxu0  ;;  %v5930_v41 = vpop.f32.mrb[209].mxu1 }
 0x717   : > { %v7883_v44 = vadd.f32 %v5544_v30, %v10438_v61  ;;  %v7947_v20 = vadd.f32 %v5930_v41, %v10440_v53  ;;  %v5546_v33 = vpop.f32.mrb[210].mxu0  ;;  %v5932_v8 = vpop.f32.mrb[210].mxu1 }
 0x718   : > { %v7884_v43 = vadd.f32 %v5546_v33, %v10434_v14  ;;  %v7948_v23 = vadd.f32 %v5932_v8, %v10436_v52  ;;  %v5548_v59 = vpop.f32.mrb[211].mxu0  ;;  %v5934_v9 = vpop.f32.mrb[211].mxu1  ;;  %v6091_v21 = vmax.f32 %v7882_v55, 0.0  ;;  %v6093_v58 = vmax.f32 %v7946_v29, 0.0 }
 0x719   : > { %v7885_v7 = vadd.f32 %v5548_v59, %v10438_v61  ;;  %v7949_v12 = vadd.f32 %v5934_v9, %v10440_v53  ;;  %v6092_v18 = vmax.f32 %v7883_v44, 0.0  ;;  %v6094_v4 = vmax.f32 %v7947_v20, 0.0 }
 0x71a   : > { %v6099_v35 = vmax.f32 %v7884_v43, 0.0  ;;  %v6101_v24 = vmax.f32 %v7948_v23, 0.0 }
 0x71b   : > { %v6100_v10 = vmax.f32 %v7885_v7, 0.0  ;;  %v6102_v5 = vmax.f32 %v7949_v12, 0.0 }
 0x71c   : > { %v6639_v42 = vmax.f32 %v6091_v21, %v6099_v35  ;;  %v6713_v32 = vmax.f32 %v6093_v58, %v6101_v24 }
 0x71d   : > { %v6676_v51 = vmax.f32 %v6092_v18, %v6100_v10  ;;  %v6750_v56 = vmax.f32 %v6094_v4, %v6102_v5  ;;  %v5552_v39 = vpop.f32.mrb[212].mxu0  ;;  %v5938_v2 = vpop.f32.mrb[212].mxu1 }
 0x71e   : > { %v7886_v40 = vadd.f32 %v5552_v39, %v10434_v14  ;;  %v7950_v15 = vadd.f32 %v5938_v2, %v10436_v52  ;;  %v5554_v36 = vpop.f32.mrb[213].mxu0  ;;  %v5940_v49 = vpop.f32.mrb[213].mxu1 }
 0x71f   : > { %v7887_v63 = vadd.f32 %v5554_v36, %v10438_v61  ;;  %v7951_v47 = vadd.f32 %v5940_v49, %v10440_v53  ;;  %v5556_v50 = vpop.f32.mrb[214].mxu0  ;;  %v5942_v19 = vpop.f32.mrb[214].mxu1 }
 0x720   : > { %v6107_v27 = vmax.f32 %v7886_v40, 0.0  ;;  %v6109_v34 = vmax.f32 %v7950_v15, 0.0  ;;  %v7888_v37 = vadd.f32 %v5556_v50, %v10434_v14  ;;  %v7952_v48 = vadd.f32 %v5942_v19, %v10436_v52  ;;  %v5558_v60 = vpop.f32.mrb[215].mxu0  ;;  %v5944_v0 = vpop.f32.mrb[215].mxu1 }
 0x721   : > { %v6108_v6 = vmax.f32 %v7887_v63, 0.0  ;;  %v6110_v11 = vmax.f32 %v7951_v47, 0.0  ;;  %v7889_v57 = vadd.f32 %v5558_v60, %v10438_v61  ;;  %v7953_v31 = vadd.f32 %v5944_v0, %v10440_v53 }
 0x722   : > { %v6640_v62 = vmax.f32 %v6639_v42, %v6107_v27  ;;  %v6714_v13 = vmax.f32 %v6713_v32, %v6109_v34  ;;  %v6115_v16 = vmax.f32 %v7888_v37, 0.0  ;;  %v6117_v45 = vmax.f32 %v7952_v48, 0.0 }
 0x723   : > { %v6677_v54 = vmax.f32 %v6676_v51, %v6108_v6  ;;  %v6751_v25 = vmax.f32 %v6750_v56, %v6110_v11  ;;  %v6116_v28 = vmax.f32 %v7889_v57, 0.0  ;;  %v6118_v17 = vmax.f32 %v7953_v31, 0.0 }
 0x724   : > { %v6641_v22 = vmax.f32 %v6640_v62, %v6115_v16  ;;  %v6715_v1 = vmax.f32 %v6714_v13, %v6117_v45 }
 0x725   : > { %v6678_v55 = vmax.f32 %v6677_v54, %v6116_v28  ;;  %v6752_v29 = vmax.f32 %v6751_v25, %v6118_v17  ;;  %v5562_v30 = vpop.f32.mrb[216].mxu0  ;;  %v5948_v41 = vpop.f32.mrb[216].mxu1 }
 0x726   : > { %v7890_v44 = vadd.f32 %v5562_v30, %v10434_v14  ;;  %v7954_v20 = vadd.f32 %v5948_v41, %v10436_v52  ;;  %v5564_v33 = vpop.f32.mrb[217].mxu0  ;;  %v5950_v8 = vpop.f32.mrb[217].mxu1 }
 0x727   : > { %v7891_v43 = vadd.f32 %v5564_v33, %v10438_v61  ;;  %v7955_v23 = vadd.f32 %v5950_v8, %v10440_v53  ;;  %v5566_v59 = vpop.f32.mrb[218].mxu0  ;;  %v5952_v9 = vpop.f32.mrb[218].mxu1 }
 0x728   : > { %v6123_v7 = vmax.f32 %v7890_v44, 0.0  ;;  %v6125_v12 = vmax.f32 %v7954_v20, 0.0  ;;  %v7892_v21 = vadd.f32 %v5566_v59, %v10434_v14  ;;  %v7956_v58 = vadd.f32 %v5952_v9, %v10436_v52  ;;  %v5568_v35 = vpop.f32.mrb[219].mxu0  ;;  %v5954_v24 = vpop.f32.mrb[219].mxu1 }
 0x729   : > { %v6124_v18 = vmax.f32 %v7891_v43, 0.0  ;;  %v6126_v4 = vmax.f32 %v7955_v23, 0.0  ;;  %v7893_v10 = vadd.f32 %v5568_v35, %v10438_v61  ;;  %v7957_v5 = vadd.f32 %v5954_v24, %v10440_v53 }
 0x72a   : > { %v6642_v42 = vmax.f32 %v6641_v22, %v6123_v7  ;;  %v6716_v32 = vmax.f32 %v6715_v1, %v6125_v12  ;;  %v6131_v51 = vmax.f32 %v7892_v21, 0.0  ;;  %v6133_v56 = vmax.f32 %v7956_v58, 0.0 }
 0x72b   : > { %v6679_v39 = vmax.f32 %v6678_v55, %v6124_v18  ;;  %v6753_v2 = vmax.f32 %v6752_v29, %v6126_v4  ;;  %v6132_v40 = vmax.f32 %v7893_v10, 0.0  ;;  %v6134_v15 = vmax.f32 %v7957_v5, 0.0 }
 0x72c   : > { %v6643_v36 = vmax.f32 %v6642_v42, %v6131_v51  ;;  %v6717_v49 = vmax.f32 %v6716_v32, %v6133_v56 }
 0x72d   : > { %v6680_v63 = vmax.f32 %v6679_v39, %v6132_v40  ;;  %v6754_v47 = vmax.f32 %v6753_v2, %v6134_v15  ;;  %v5572_v50 = vpop.f32.mrb[220].mxu0  ;;  %v5958_v19 = vpop.f32.mrb[220].mxu1 }
 0x72e   : > { %v7894_v27 = vadd.f32 %v5572_v50, %v10434_v14  ;;  %v7958_v34 = vadd.f32 %v5958_v19, %v10436_v52  ;;  %v5574_v37 = vpop.f32.mrb[221].mxu0  ;;  %v5960_v48 = vpop.f32.mrb[221].mxu1 }
 0x72f   : > { %v7895_v60 = vadd.f32 %v5574_v37, %v10438_v61  ;;  %v7959_v0 = vadd.f32 %v5960_v48, %v10440_v53  ;;  %v5576_v6 = vpop.f32.mrb[222].mxu0  ;;  %v5962_v11 = vpop.f32.mrb[222].mxu1 }
 0x730   : > { %v6139_v57 = vmax.f32 %v7894_v27, 0.0  ;;  %v6141_v31 = vmax.f32 %v7958_v34, 0.0  ;;  %v7896_v62 = vadd.f32 %v5576_v6, %v10434_v14  ;;  %v7960_v13 = vadd.f32 %v5962_v11, %v10436_v52  ;;  %v5578_v16 = vpop.f32.mrb[223].mxu0  ;;  %v5964_v45 = vpop.f32.mrb[223].mxu1 }
 0x731   : > { %v6140_v54 = vmax.f32 %v7895_v60, 0.0  ;;  %v6142_v25 = vmax.f32 %v7959_v0, 0.0  ;;  %v7897_v28 = vadd.f32 %v5578_v16, %v10438_v61  ;;  %v7961_v17 = vadd.f32 %v5964_v45, %v10440_v53 }
 0x732   : > { %v6644_v22 = vmax.f32 %v6643_v36, %v6139_v57  ;;  %v6718_v1 = vmax.f32 %v6717_v49, %v6141_v31  ;;  %v6147_v55 = vmax.f32 %v7896_v62, 0.0  ;;  %v6149_v29 = vmax.f32 %v7960_v13, 0.0 }
 0x733   : > { %v6681_v30 = vmax.f32 %v6680_v63, %v6140_v54  ;;  %v6755_v41 = vmax.f32 %v6754_v47, %v6142_v25  ;;  %v6148_v44 = vmax.f32 %v7897_v28, 0.0  ;;  %v6150_v20 = vmax.f32 %v7961_v17, 0.0 }
 0x734   : > { %v6645_v33 = vmax.f32 %v6644_v22, %v6147_v55  ;;  %v6719_v8 = vmax.f32 %v6718_v1, %v6149_v29 }
 0x735   : > { %v6682_v43 = vmax.f32 %v6681_v30, %v6148_v44  ;;  %v6756_v23 = vmax.f32 %v6755_v41, %v6150_v20  ;;  %v5582_v59 = vpop.f32.mrb[224].mxu0  ;;  %v5968_v9 = vpop.f32.mrb[224].mxu1 }
 0x736   : > { %v7898_v7 = vadd.f32 %v5582_v59, %v10434_v14  ;;  %v7962_v12 = vadd.f32 %v5968_v9, %v10436_v52  ;;  %v5584_v21 = vpop.f32.mrb[225].mxu0  ;;  %v5970_v58 = vpop.f32.mrb[225].mxu1 }
 0x737   : > { %v7899_v35 = vadd.f32 %v5584_v21, %v10438_v61  ;;  %v7963_v24 = vadd.f32 %v5970_v58, %v10440_v53  ;;  %v5586_v18 = vpop.f32.mrb[226].mxu0  ;;  %v5972_v4 = vpop.f32.mrb[226].mxu1 }
 0x738   : > { %v6155_v10 = vmax.f32 %v7898_v7, 0.0  ;;  %v6157_v5 = vmax.f32 %v7962_v12, 0.0  ;;  %v7900_v42 = vadd.f32 %v5586_v18, %v10434_v14  ;;  %v7964_v32 = vadd.f32 %v5972_v4, %v10436_v52  ;;  %v5588_v51 = vpop.f32.mrb[227].mxu0  ;;  %v5974_v56 = vpop.f32.mrb[227].mxu1 }
 0x739   : > { %v6156_v39 = vmax.f32 %v7899_v35, 0.0  ;;  %v6158_v2 = vmax.f32 %v7963_v24, 0.0  ;;  %v7901_v40 = vadd.f32 %v5588_v51, %v10438_v61  ;;  %v7965_v15 = vadd.f32 %v5974_v56, %v10440_v53 }
 0x73a   : > { %v6646_v36 = vmax.f32 %v6645_v33, %v6155_v10  ;;  %v6720_v49 = vmax.f32 %v6719_v8, %v6157_v5  ;;  %v6163_v63 = vmax.f32 %v7900_v42, 0.0  ;;  %v6165_v47 = vmax.f32 %v7964_v32, 0.0 }
 0x73b   : > { %v6683_v50 = vmax.f32 %v6682_v43, %v6156_v39  ;;  %v6757_v19 = vmax.f32 %v6756_v23, %v6158_v2  ;;  %v6164_v27 = vmax.f32 %v7901_v40, 0.0  ;;  %v6166_v34 = vmax.f32 %v7965_v15, 0.0 }
 0x73c   : > { %v6647_v37 = vmax.f32 %v6646_v36, %v6163_v63  ;;  %v6721_v48 = vmax.f32 %v6720_v49, %v6165_v47 }
 0x73d   : > { %v6684_v60 = vmax.f32 %v6683_v50, %v6164_v27  ;;  %v6758_v0 = vmax.f32 %v6757_v19, %v6166_v34  ;;  %v5592_v6 = vpop.f32.mrb[228].mxu0  ;;  %v5978_v11 = vpop.f32.mrb[228].mxu1 }
 0x73e   : > { %v7902_v57 = vadd.f32 %v5592_v6, %v10434_v14  ;;  %v7966_v31 = vadd.f32 %v5978_v11, %v10436_v52  ;;  %v5594_v62 = vpop.f32.mrb[229].mxu0  ;;  %v5980_v13 = vpop.f32.mrb[229].mxu1 }
 0x73f   : > { %v7903_v16 = vadd.f32 %v5594_v62, %v10438_v61  ;;  %v7967_v45 = vadd.f32 %v5980_v13, %v10440_v53  ;;  %v5596_v54 = vpop.f32.mrb[230].mxu0  ;;  %v5982_v25 = vpop.f32.mrb[230].mxu1 }
 0x740   : > { %v6171_v28 = vmax.f32 %v7902_v57, 0.0  ;;  %v6173_v17 = vmax.f32 %v7966_v31, 0.0  ;;  %v7904_v22 = vadd.f32 %v5596_v54, %v10434_v14  ;;  %v7968_v1 = vadd.f32 %v5982_v25, %v10436_v52  ;;  %v5598_v55 = vpop.f32.mrb[231].mxu0  ;;  %v5984_v29 = vpop.f32.mrb[231].mxu1 }
 0x741   : > { %v6172_v30 = vmax.f32 %v7903_v16, 0.0  ;;  %v6174_v41 = vmax.f32 %v7967_v45, 0.0  ;;  %v7905_v44 = vadd.f32 %v5598_v55, %v10438_v61  ;;  %v7969_v20 = vadd.f32 %v5984_v29, %v10440_v53 }
 0x742   : > { %v6648_v33 = vmax.f32 %v6647_v37, %v6171_v28  ;;  %v6722_v8 = vmax.f32 %v6721_v48, %v6173_v17  ;;  %v6179_v43 = vmax.f32 %v7904_v22, 0.0  ;;  %v6181_v23 = vmax.f32 %v7968_v1, 0.0 }
 0x743   : > { %v6685_v59 = vmax.f32 %v6684_v60, %v6172_v30  ;;  %v6759_v9 = vmax.f32 %v6758_v0, %v6174_v41  ;;  %v6180_v7 = vmax.f32 %v7905_v44, 0.0  ;;  %v6182_v12 = vmax.f32 %v7969_v20, 0.0 }
 0x744   : > { %v6649_v21 = vmax.f32 %v6648_v33, %v6179_v43  ;;  %v6723_v58 = vmax.f32 %v6722_v8, %v6181_v23 }
 0x745   : > { %v6686_v35 = vmax.f32 %v6685_v59, %v6180_v7  ;;  %v6760_v24 = vmax.f32 %v6759_v9, %v6182_v12  ;;  %v5602_v18 = vpop.f32.mrb[232].mxu0  ;;  %v5988_v4 = vpop.f32.mrb[232].mxu1 }
 0x746   : > { %v7906_v10 = vadd.f32 %v5602_v18, %v10434_v14  ;;  %v7970_v5 = vadd.f32 %v5988_v4, %v10436_v52  ;;  %v5604_v42 = vpop.f32.mrb[233].mxu0  ;;  %v5990_v32 = vpop.f32.mrb[233].mxu1 }
 0x747   : > { %v7907_v51 = vadd.f32 %v5604_v42, %v10438_v61  ;;  %v7971_v56 = vadd.f32 %v5990_v32, %v10440_v53  ;;  %v5606_v39 = vpop.f32.mrb[234].mxu0  ;;  %v5992_v2 = vpop.f32.mrb[234].mxu1 }
 0x748   : > { %v6187_v40 = vmax.f32 %v7906_v10, 0.0  ;;  %v6189_v15 = vmax.f32 %v7970_v5, 0.0  ;;  %v7908_v36 = vadd.f32 %v5606_v39, %v10434_v14  ;;  %v7972_v49 = vadd.f32 %v5992_v2, %v10436_v52  ;;  %v5608_v63 = vpop.f32.mrb[235].mxu0  ;;  %v5994_v47 = vpop.f32.mrb[235].mxu1 }
 0x749   : > { %v6188_v50 = vmax.f32 %v7907_v51, 0.0  ;;  %v6190_v19 = vmax.f32 %v7971_v56, 0.0  ;;  %v7909_v27 = vadd.f32 %v5608_v63, %v10438_v61  ;;  %v7973_v34 = vadd.f32 %v5994_v47, %v10440_v53 }
 0x74a   : > { %v6650_v37 = vmax.f32 %v6649_v21, %v6187_v40  ;;  %v6724_v48 = vmax.f32 %v6723_v58, %v6189_v15  ;;  %v6195_v60 = vmax.f32 %v7908_v36, 0.0  ;;  %v6197_v0 = vmax.f32 %v7972_v49, 0.0 }
 0x74b   : > { %v6687_v6 = vmax.f32 %v6686_v35, %v6188_v50  ;;  %v6761_v11 = vmax.f32 %v6760_v24, %v6190_v19  ;;  %v6196_v57 = vmax.f32 %v7909_v27, 0.0  ;;  %v6198_v31 = vmax.f32 %v7973_v34, 0.0 }
 0x74c   : > { %v6651_v62 = vmax.f32 %v6650_v37, %v6195_v60  ;;  %v6725_v13 = vmax.f32 %v6724_v48, %v6197_v0 }
 0x74d   : > { %v6688_v16 = vmax.f32 %v6687_v6, %v6196_v57  ;;  %v6762_v45 = vmax.f32 %v6761_v11, %v6198_v31  ;;  %v5612_v54 = vpop.f32.mrb[236].mxu0  ;;  %v5998_v25 = vpop.f32.mrb[236].mxu1 }
 0x74e   : > { %v7910_v28 = vadd.f32 %v5612_v54, %v10434_v14  ;;  %v7974_v17 = vadd.f32 %v5998_v25, %v10436_v52  ;;  %v5614_v22 = vpop.f32.mrb[237].mxu0  ;;  %v6000_v1 = vpop.f32.mrb[237].mxu1 }
 0x74f   : > { %v7911_v55 = vadd.f32 %v5614_v22, %v10438_v61  ;;  %v7975_v29 = vadd.f32 %v6000_v1, %v10440_v53  ;;  %v5616_v30 = vpop.f32.mrb[238].mxu0  ;;  %v6002_v41 = vpop.f32.mrb[238].mxu1 }
 0x750   : > { %v6203_v44 = vmax.f32 %v7910_v28, 0.0  ;;  %v6205_v20 = vmax.f32 %v7974_v17, 0.0  ;;  %v7912_v33 = vadd.f32 %v5616_v30, %v10434_v14  ;;  %v7976_v8 = vadd.f32 %v6002_v41, %v10436_v52  ;;  %v5618_v43 = vpop.f32.mrb[239].mxu0  ;;  %v6004_v23 = vpop.f32.mrb[239].mxu1 }
 0x751   : > { %v6204_v59 = vmax.f32 %v7911_v55, 0.0  ;;  %v6206_v9 = vmax.f32 %v7975_v29, 0.0  ;;  %v7913_v7 = vadd.f32 %v5618_v43, %v10438_v61  ;;  %v7977_v12 = vadd.f32 %v6004_v23, %v10440_v53 }
 0x752   : > { %v6652_v21 = vmax.f32 %v6651_v62, %v6203_v44  ;;  %v6726_v58 = vmax.f32 %v6725_v13, %v6205_v20  ;;  %v6211_v35 = vmax.f32 %v7912_v33, 0.0  ;;  %v6213_v24 = vmax.f32 %v7976_v8, 0.0 }
 0x753   : > { %v6689_v18 = vmax.f32 %v6688_v16, %v6204_v59  ;;  %v6763_v4 = vmax.f32 %v6762_v45, %v6206_v9  ;;  %v6212_v10 = vmax.f32 %v7913_v7, 0.0  ;;  %v6214_v5 = vmax.f32 %v7977_v12, 0.0 }
 0x754   : > { %v6653_v42 = vmax.f32 %v6652_v21, %v6211_v35  ;;  %v6727_v32 = vmax.f32 %v6726_v58, %v6213_v24 }
 0x755   : > { %v6690_v51 = vmax.f32 %v6689_v18, %v6212_v10  ;;  %v6764_v56 = vmax.f32 %v6763_v4, %v6214_v5  ;;  %v5622_v39 = vpop.f32.mrb[240].mxu0  ;;  %v6008_v2 = vpop.f32.mrb[240].mxu1 }
 0x756   : > { %v7914_v40 = vadd.f32 %v5622_v39, %v10434_v14  ;;  %v7978_v15 = vadd.f32 %v6008_v2, %v10436_v52  ;;  %v5624_v36 = vpop.f32.mrb[241].mxu0  ;;  %v6010_v49 = vpop.f32.mrb[241].mxu1 }
 0x757   : > { %v7915_v63 = vadd.f32 %v5624_v36, %v10438_v61  ;;  %v7979_v47 = vadd.f32 %v6010_v49, %v10440_v53  ;;  %v5626_v50 = vpop.f32.mrb[242].mxu0  ;;  %v6012_v19 = vpop.f32.mrb[242].mxu1 }
 0x758   : > { %v6219_v27 = vmax.f32 %v7914_v40, 0.0  ;;  %v6221_v34 = vmax.f32 %v7978_v15, 0.0  ;;  %v7916_v37 = vadd.f32 %v5626_v50, %v10434_v14  ;;  %v7980_v48 = vadd.f32 %v6012_v19, %v10436_v52  ;;  %v5628_v60 = vpop.f32.mrb[243].mxu0  ;;  %v6014_v0 = vpop.f32.mrb[243].mxu1 }
 0x759   : > { %v6220_v6 = vmax.f32 %v7915_v63, 0.0  ;;  %v6222_v11 = vmax.f32 %v7979_v47, 0.0  ;;  %v7917_v57 = vadd.f32 %v5628_v60, %v10438_v61  ;;  %v7981_v31 = vadd.f32 %v6014_v0, %v10440_v53 }
 0x75a   : > { %v6654_v62 = vmax.f32 %v6653_v42, %v6219_v27  ;;  %v6728_v13 = vmax.f32 %v6727_v32, %v6221_v34  ;;  %v6227_v16 = vmax.f32 %v7916_v37, 0.0  ;;  %v6229_v45 = vmax.f32 %v7980_v48, 0.0 }
 0x75b   : > { %v6691_v54 = vmax.f32 %v6690_v51, %v6220_v6  ;;  %v6765_v25 = vmax.f32 %v6764_v56, %v6222_v11  ;;  %v6228_v28 = vmax.f32 %v7917_v57, 0.0  ;;  %v6230_v17 = vmax.f32 %v7981_v31, 0.0 }
 0x75c   : > { %v6655_v22 = vmax.f32 %v6654_v62, %v6227_v16  ;;  %v6729_v1 = vmax.f32 %v6728_v13, %v6229_v45 }
 0x75d   : > { %v6692_v55 = vmax.f32 %v6691_v54, %v6228_v28  ;;  %v6766_v29 = vmax.f32 %v6765_v25, %v6230_v17  ;;  %v5632_v30 = vpop.f32.mrb[244].mxu0  ;;  %v6018_v41 = vpop.f32.mrb[244].mxu1 }
 0x75e   : > { %v7918_v44 = vadd.f32 %v5632_v30, %v10434_v14  ;;  %v7982_v20 = vadd.f32 %v6018_v41, %v10436_v52  ;;  %v5634_v33 = vpop.f32.mrb[245].mxu0  ;;  %v6020_v8 = vpop.f32.mrb[245].mxu1 }
 0x75f   : > { %v7919_v43 = vadd.f32 %v5634_v33, %v10438_v61  ;;  %v7983_v23 = vadd.f32 %v6020_v8, %v10440_v53  ;;  %v5636_v59 = vpop.f32.mrb[246].mxu0  ;;  %v6022_v9 = vpop.f32.mrb[246].mxu1 }
 0x760   : > { %v6235_v7 = vmax.f32 %v7918_v44, 0.0  ;;  %v6237_v12 = vmax.f32 %v7982_v20, 0.0  ;;  %v7920_v21 = vadd.f32 %v5636_v59, %v10434_v14  ;;  %v7984_v58 = vadd.f32 %v6022_v9, %v10436_v52  ;;  %v5638_v35 = vpop.f32.mrb[247].mxu0  ;;  %v6024_v24 = vpop.f32.mrb[247].mxu1 }
 0x761   : > { %v6236_v18 = vmax.f32 %v7919_v43, 0.0  ;;  %v6238_v4 = vmax.f32 %v7983_v23, 0.0  ;;  %v7921_v10 = vadd.f32 %v5638_v35, %v10438_v61  ;;  %v7985_v5 = vadd.f32 %v6024_v24, %v10440_v53 }
 0x762   : > { %v6656_v42 = vmax.f32 %v6655_v22, %v6235_v7  ;;  %v6730_v32 = vmax.f32 %v6729_v1, %v6237_v12  ;;  %v6243_v51 = vmax.f32 %v7920_v21, 0.0  ;;  %v6245_v56 = vmax.f32 %v7984_v58, 0.0 }
 0x763   : > { %v6693_v39 = vmax.f32 %v6692_v55, %v6236_v18  ;;  %v6767_v2 = vmax.f32 %v6766_v29, %v6238_v4  ;;  %v6244_v40 = vmax.f32 %v7921_v10, 0.0  ;;  %v6246_v15 = vmax.f32 %v7985_v5, 0.0 }
 0x764   : > { %v6657_v36 = vmax.f32 %v6656_v42, %v6243_v51  ;;  %v6731_v49 = vmax.f32 %v6730_v32, %v6245_v56 }
 0x765   : > { %v6694_v63 = vmax.f32 %v6693_v39, %v6244_v40  ;;  %v6768_v47 = vmax.f32 %v6767_v2, %v6246_v15  ;;  %v5642_v50 = vpop.f32.mrb[248].mxu0  ;;  %v6028_v19 = vpop.f32.mrb[248].mxu1 }
 0x766   : > { %v7922_v27 = vadd.f32 %v5642_v50, %v10434_v14  ;;  %v7986_v34 = vadd.f32 %v6028_v19, %v10436_v52  ;;  %v5644_v37 = vpop.f32.mrb[249].mxu0  ;;  %v6030_v48 = vpop.f32.mrb[249].mxu1 }
 0x767   : > { %v7923_v60 = vadd.f32 %v5644_v37, %v10438_v61  ;;  %v7987_v0 = vadd.f32 %v6030_v48, %v10440_v53  ;;  %v5646_v6 = vpop.f32.mrb[250].mxu0  ;;  %v6032_v11 = vpop.f32.mrb[250].mxu1 }
 0x768   : > { %v6251_v57 = vmax.f32 %v7922_v27, 0.0  ;;  %v6253_v31 = vmax.f32 %v7986_v34, 0.0  ;;  %v7924_v62 = vadd.f32 %v5646_v6, %v10434_v14  ;;  %v7988_v13 = vadd.f32 %v6032_v11, %v10436_v52  ;;  %v5648_v16 = vpop.f32.mrb[251].mxu0  ;;  %v6034_v45 = vpop.f32.mrb[251].mxu1 }
 0x769   : > { %v6252_v54 = vmax.f32 %v7923_v60, 0.0  ;;  %v6254_v25 = vmax.f32 %v7987_v0, 0.0  ;;  %v7925_v28 = vadd.f32 %v5648_v16, %v10438_v61  ;;  %v7989_v17 = vadd.f32 %v6034_v45, %v10440_v53 }
 0x76a   : > { %v6658_v22 = vmax.f32 %v6657_v36, %v6251_v57  ;;  %v6732_v1 = vmax.f32 %v6731_v49, %v6253_v31  ;;  %v6259_v55 = vmax.f32 %v7924_v62, 0.0  ;;  %v6261_v29 = vmax.f32 %v7988_v13, 0.0 }
 0x76b   : > { %v6695_v30 = vmax.f32 %v6694_v63, %v6252_v54  ;;  %v6769_v41 = vmax.f32 %v6768_v47, %v6254_v25  ;;  %v6260_v44 = vmax.f32 %v7925_v28, 0.0  ;;  %v6262_v20 = vmax.f32 %v7989_v17, 0.0 }
 0x76c   : > { %v6659_v33 = vmax.f32 %v6658_v22, %v6259_v55  ;;  %v6733_v8 = vmax.f32 %v6732_v1, %v6261_v29 }
 0x76d   : > { %v6696_v43 = vmax.f32 %v6695_v30, %v6260_v44  ;;  %v6770_v23 = vmax.f32 %v6769_v41, %v6262_v20  ;;  %v5652_v59 = vpop.f32.mrb[252].mxu0  ;;  %v6038_v9 = vpop.f32.mrb[252].mxu1 }
 0x76e   : > { %v7926_v7 = vadd.f32 %v5652_v59, %v10434_v14  ;;  %v7990_v12 = vadd.f32 %v6038_v9, %v10436_v52  ;;  %v5654_v21 = vpop.f32.mrb[253].mxu0  ;;  %v6040_v58 = vpop.f32.mrb[253].mxu1 }
 0x76f   : > { %v7927_v35 = vadd.f32 %v5654_v21, %v10438_v61  ;;  %v7991_v24 = vadd.f32 %v6040_v58, %v10440_v53  ;;  %v5656_v18 = vpop.f32.mrb[254].mxu0  ;;  %v6042_v4 = vpop.f32.mrb[254].mxu1 }
 0x770   : > { %v6267_v10 = vmax.f32 %v7926_v7, 0.0  ;;  %v6269_v5 = vmax.f32 %v7990_v12, 0.0  ;;  %v7928_v42 = vadd.f32 %v5656_v18, %v10434_v14  ;;  %v7992_v32 = vadd.f32 %v6042_v4, %v10436_v52  ;;  %v5658_v51 = vpop.f32.mrb[255].mxu0  ;;  %v6044_v56 = vpop.f32.mrb[255].mxu1 }
 0x771   : > { %v6268_v39 = vmax.f32 %v7927_v35, 0.0  ;;  %v6270_v2 = vmax.f32 %v7991_v24, 0.0  ;;  %v7929_v40 = vadd.f32 %v5658_v51, %v10438_v61  ;;  %v7993_v15 = vadd.f32 %v6044_v56, %v10440_v53 }
 0x772   : > { %v6660_v36 = vmax.f32 %v6659_v33, %v6267_v10  ;;  %v6734_v49 = vmax.f32 %v6733_v8, %v6269_v5  ;;  %v6275_v63 = vmax.f32 %v7928_v42, 0.0  ;;  %v6277_v47 = vmax.f32 %v7992_v32, 0.0 }
 0x773   : > { %v6697_v50 = vmax.f32 %v6696_v43, %v6268_v39  ;;  %v6771_v19 = vmax.f32 %v6770_v23, %v6270_v2  ;;  %v6276_v27 = vmax.f32 %v7929_v40, 0.0  ;;  %v6278_v34 = vmax.f32 %v7993_v15, 0.0 }
 0x774   : > { %v6661_v37 = vmax.f32 %v6660_v36, %v6275_v63  ;;  %v6735_v48 = vmax.f32 %v6734_v49, %v6277_v47 }
 0x775   : > { %v6698_v60 = vmax.f32 %v6697_v50, %v6276_v27  ;;  %v6772_v0 = vmax.f32 %v6771_v19, %v6278_v34  ;;  %v5662_v6 = vpop.f32.mrb[0].mxu0  ;;  %v6048_v11 = vpop.f32.mrb[0].mxu1 }
 0x776   : > { %v7930_v57 = vadd.f32 %v5662_v6, %v10434_v14  ;;  %v7994_v31 = vadd.f32 %v6048_v11, %v10436_v52  ;;  %v5664_v62 = vpop.f32.mrb[1].mxu0  ;;  %v6050_v13 = vpop.f32.mrb[1].mxu1 }
 0x777   : > { %v7931_v16 = vadd.f32 %v5664_v62, %v10438_v61  ;;  %v7995_v45 = vadd.f32 %v6050_v13, %v10440_v53  ;;  %v5666_v54 = vpop.f32.mrb[2].mxu0  ;;  %v6052_v25 = vpop.f32.mrb[2].mxu1 }
 0x778   : > { %v6283_v28 = vmax.f32 %v7930_v57, 0.0  ;;  %v6285_v17 = vmax.f32 %v7994_v31, 0.0  ;;  %v7932_v22 = vadd.f32 %v5666_v54, %v10434_v14  ;;  %v7996_v1 = vadd.f32 %v6052_v25, %v10436_v52  ;;  %v5668_v55 = vpop.f32.mrb[3].mxu0  ;;  %v6054_v29 = vpop.f32.mrb[3].mxu1 }
 0x779   : > { %v6284_v30 = vmax.f32 %v7931_v16, 0.0  ;;  %v6286_v41 = vmax.f32 %v7995_v45, 0.0  ;;  %v7933_v44 = vadd.f32 %v5668_v55, %v10438_v61  ;;  %v7997_v20 = vadd.f32 %v6054_v29, %v10440_v53 }
 0x77a   : > { %v6662_v33 = vmax.f32 %v6661_v37, %v6283_v28  ;;  %v6736_v8 = vmax.f32 %v6735_v48, %v6285_v17  ;;  %v6291_v43 = vmax.f32 %v7932_v22, 0.0  ;;  %v6293_v23 = vmax.f32 %v7996_v1, 0.0 }
 0x77b   : > { %v6699_v59 = vmax.f32 %v6698_v60, %v6284_v30  ;;  %v6773_v9 = vmax.f32 %v6772_v0, %v6286_v41  ;;  %v6292_v7 = vmax.f32 %v7933_v44, 0.0  ;;  %v6294_v12 = vmax.f32 %v7997_v20, 0.0 }
 0x77c   : > { %v6663_v21 = vmax.f32 %v6662_v33, %v6291_v43  ;;  %v6737_v58 = vmax.f32 %v6736_v8, %v6293_v23 }
 0x77d   : > { %v6700_v35 = vmax.f32 %v6699_v59, %v6292_v7  ;;  %v6774_v24 = vmax.f32 %v6773_v9, %v6294_v12  ;;  %v5672_v18 = vpop.f32.mrb[4].mxu0  ;;  %v6058_v4 = vpop.f32.mrb[4].mxu1 }
 0x77e   : > { %v7934_v10 = vadd.f32 %v5672_v18, %v10434_v14  ;;  %v7998_v5 = vadd.f32 %v6058_v4, %v10436_v52  ;;  %v5674_v42 = vpop.f32.mrb[5].mxu0  ;;  %v6060_v32 = vpop.f32.mrb[5].mxu1 }
 0x77f   : > { %v7935_v51 = vadd.f32 %v5674_v42, %v10438_v61  ;;  %v7999_v56 = vadd.f32 %v6060_v32, %v10440_v53  ;;  %v5676_v39 = vpop.f32.mrb[6].mxu0  ;;  %v6062_v2 = vpop.f32.mrb[6].mxu1 }
 0x780   : > { %v6299_v40 = vmax.f32 %v7934_v10, 0.0  ;;  %v6301_v15 = vmax.f32 %v7998_v5, 0.0  ;;  %v7936_v36 = vadd.f32 %v5676_v39, %v10434_v14  ;;  %v8000_v49 = vadd.f32 %v6062_v2, %v10436_v52  ;;  %v5678_v63 = vpop.f32.mrb[7].mxu0  ;;  %v6064_v47 = vpop.f32.mrb[7].mxu1 }
 0x781   : > { %v6300_v50 = vmax.f32 %v7935_v51, 0.0  ;;  %v6302_v19 = vmax.f32 %v7999_v56, 0.0  ;;  %v7937_v27 = vadd.f32 %v5678_v63, %v10438_v61  ;;  %v8001_v34 = vadd.f32 %v6064_v47, %v10440_v53 }
 0x782   : > { %v6664_v37 = vmax.f32 %v6663_v21, %v6299_v40  ;;  %v6738_v48 = vmax.f32 %v6737_v58, %v6301_v15  ;;  %v6307_v60 = vmax.f32 %v7936_v36, 0.0  ;;  %v6309_v0 = vmax.f32 %v8000_v49, 0.0 }
 0x783   : > { %v6701_v6 = vmax.f32 %v6700_v35, %v6300_v50  ;;  %v6775_v11 = vmax.f32 %v6774_v24, %v6302_v19  ;;  %v6308_v57 = vmax.f32 %v7937_v27, 0.0  ;;  %v6310_v31 = vmax.f32 %v8001_v34, 0.0 }
 0x784   : > { %v6665_v62 = vmax.f32 %v6664_v37, %v6307_v60  ;;  %v6739_v13 = vmax.f32 %v6738_v48, %v6309_v0 }
 0x785   : > { %v6702_v16 = vmax.f32 %v6701_v6, %v6308_v57  ;;  %v6776_v45 = vmax.f32 %v6775_v11, %v6310_v31  ;;  %v5682_v54 = vpop.f32.mrb[8].mxu0  ;;  %v6068_v25 = vpop.f32.mrb[8].mxu1 }
 0x786   : > { %v7938_v28 = vadd.f32 %v5682_v54, %v10434_v14  ;;  %v8002_v17 = vadd.f32 %v6068_v25, %v10436_v52  ;;  %v5684_v22 = vpop.f32.mrb[9].mxu0  ;;  %v6070_v1 = vpop.f32.mrb[9].mxu1 }
 0x787   : > { %v7939_v55 = vadd.f32 %v5684_v22, %v10438_v61  ;;  %v8003_v29 = vadd.f32 %v6070_v1, %v10440_v53  ;;  %v5686_v30 = vpop.f32.mrb[10].mxu0  ;;  %v6072_v41 = vpop.f32.mrb[10].mxu1 }
 0x788   : > { %v6315_v44 = vmax.f32 %v7938_v28, 0.0  ;;  %v6317_v20 = vmax.f32 %v8002_v17, 0.0  ;;  %v7940_v33 = vadd.f32 %v5686_v30, %v10434_v14  ;;  %v8004_v8 = vadd.f32 %v6072_v41, %v10436_v52  ;;  %v5688_v43 = vpop.f32.mrb[11].mxu0  ;;  %v6074_v23 = vpop.f32.mrb[11].mxu1 }
 0x789   : > { %v6316_v59 = vmax.f32 %v7939_v55, 0.0  ;;  %v6318_v9 = vmax.f32 %v8003_v29, 0.0  ;;  %v7941_v7 = vadd.f32 %v5688_v43, %v10438_v61  ;;  %v8005_v12 = vadd.f32 %v6074_v23, %v10440_v53 }
 0x78a   : > { %v6666_v21 = vmax.f32 %v6665_v62, %v6315_v44  ;;  %v6740_v58 = vmax.f32 %v6739_v13, %v6317_v20  ;;  %v6323_v35 = vmax.f32 %v7940_v33, 0.0  ;;  %v6325_v24 = vmax.f32 %v8004_v8, 0.0 }
 0x78b   : > { %v6703_v18 = vmax.f32 %v6702_v16, %v6316_v59  ;;  %v6777_v4 = vmax.f32 %v6776_v45, %v6318_v9  ;;  %v6324_v10 = vmax.f32 %v7941_v7, 0.0  ;;  %v6326_v5 = vmax.f32 %v8005_v12, 0.0 }
 0x78c   : > { %v6667_v42 = vmax.f32 %v6666_v21, %v6323_v35  ;;  %v6741_v32 = vmax.f32 %v6740_v58, %v6325_v24 }
 0x78d   : > { %v6704_v51 = vmax.f32 %v6703_v18, %v6324_v10  ;;  %v6778_v56 = vmax.f32 %v6777_v4, %v6326_v5  ;;  %v5692_v39 = vpop.f32.mrb[12].mxu0  ;;  %v6078_v2 = vpop.f32.mrb[12].mxu1 }
 0x78e   : > { %v7942_v40 = vadd.f32 %v5692_v39, %v10434_v14  ;;  %v8006_v15 = vadd.f32 %v6078_v2, %v10436_v52  ;;  %v5694_v36 = vpop.f32.mrb[13].mxu0  ;;  %v6080_v49 = vpop.f32.mrb[13].mxu1  ;;  %v6846_v2 = vrot.slane %v6838_v3, %v10922_v38 }
 0x78f   : > { %v7943_v63 = vadd.f32 %v5694_v36, %v10438_v61  ;;  %v8007_v47 = vadd.f32 %v6080_v49, %v10440_v53  ;;  %v5696_v50 = vpop.f32.mrb[14].mxu0  ;;  %v6082_v19 = vpop.f32.mrb[14].mxu1 }
 0x790   : > { %v6331_v27 = vmax.f32 %v7942_v40, 0.0  ;;  %v6333_v34 = vmax.f32 %v8006_v15, 0.0  ;;  %v7944_v37 = vadd.f32 %v5696_v50, %v10434_v14  ;;  %v8008_v48 = vadd.f32 %v6082_v19, %v10436_v52  ;;  %v5698_v60 = vpop.f32.mrb[15].mxu0  ;;  %v6084_v0 = vpop.f32.mrb[15].mxu1 }
 0x791   : > { %v6332_v6 = vmax.f32 %v7943_v63, 0.0  ;;  %v6334_v11 = vmax.f32 %v8007_v47, 0.0  ;;  %v7945_v57 = vadd.f32 %v5698_v60, %v10438_v61  ;;  %v8009_v31 = vadd.f32 %v6084_v0, %v10440_v53 }
 0x792   : > { %v6668_v62 = vmax.f32 %v6667_v42, %v6331_v27  ;;  %v6742_v13 = vmax.f32 %v6741_v32, %v6333_v34  ;;  %v6339_v16 = vmax.f32 %v7944_v37, 0.0  ;;  %v6341_v45 = vmax.f32 %v8008_v48, 0.0 }
 0x793   : > { %v6705_v54 = vmax.f32 %v6704_v51, %v6332_v6  ;;  %v6779_v25 = vmax.f32 %v6778_v56, %v6334_v11  ;;  %v6340_v28 = vmax.f32 %v7945_v57, 0.0  ;;  %v6342_v17 = vmax.f32 %v8009_v31, 0.0 }
 0x794   : > { %v6669_v22 = vmax.f32 %v6668_v62, %v6339_v16  ;;  %v6743_v14 = vmax.f32 %v6742_v13, %v6341_v45 }
 0x795   : > { %v6706_v1 = vmax.f32 %v6705_v54, %v6340_v28  ;;  %v6780_v52 = vmax.f32 %v6779_v25, %v6342_v17 }
 0x796   : > { %v6670_v55 = vrot.slane %v6669_v22, 4  ;;  %v6744_v29 = vrot.slane %v6743_v14, 4 }
 0x797   : > { %v6707_v30 = vrot.slane %v6706_v1, 4  ;;  %v6781_v41 = vrot.slane %v6780_v52, 4 }
 0x798   : > { %v6671_v44 = vmax.f32 %v6669_v22, %v6670_v55  ;;  %v6745_v61 = vmax.f32 %v6743_v14, %v6744_v29 }
 0x799   : > { %v6708_v20 = vmax.f32 %v6706_v1, %v6707_v30  ;;  %v6782_v53 = vmax.f32 %v6780_v52, %v6781_v41 }
 0x79a   : > { %v6672_v33 = vrot.slane %v6671_v44, 2  ;;  %v6746_v8 = vrot.slane %v6745_v61, 2 }
 0x79b   : > { %v6709_v43 = vrot.slane %v6708_v20, 2  ;;  %v6783_v23 = vrot.slane %v6782_v53, 2 }
 0x79c   : > { %v6673_v59 = vmax.f32 %v6671_v44, %v6672_v33  ;;  %v6747_v9 = vmax.f32 %v6745_v61, %v6746_v8 }
 0x79d   : > { %v6710_v7 = vmax.f32 %v6708_v20, %v6709_v43  ;;  %v6784_v12 = vmax.f32 %v6782_v53, %v6783_v23 }
 0x79e   : > { %v6674_v21 = vrot.slane %v6673_v59, 1  ;;  %v6748_v58 = vrot.slane %v6747_v9, 1 }
 0x79f   : > { %v6711_v35 = vrot.slane %v6710_v7, 1  ;;  %v6785_v24 = vrot.slane %v6784_v12, 1 }
 0x7a0   : > { %v6675_v18 = vmax.f32 %v6673_v59, %v6674_v21  ;;  %v6749_v4 = vmax.f32 %v6747_v9, %v6748_v58 }
 0x7a1   : > { %v6712_v10 = vmax.f32 %v6710_v7, %v6711_v35  ;;  %v6786_v5 = vmax.f32 %v6784_v12, %v6785_v24 }
 0x7a3   : > { %v6808_v42 = vcombine.low %v6675_v18, %v6712_v10  ;;  %v6809_v32 = vcombine.low %v6749_v4, %v6786_v5 }
 0x7a5   : > { %v6830_v51 = vrot.slane %v6808_v42, %v10922_v38  ;;  %v6837_v56 = vrot.slane %v6809_v32, %v10922_v38 }
 0x7a7   : > { %v6839_v39 = vcombine.low %v6830_v51, %v6837_v56 }
 0x7a9   : > { %v6853_v40 = vrot.slane %v6839_v39, %v10922_v38 }
 0x7ab   : > { %v6854_v15 = vcombine.low %v6846_v2, %v6853_v40 }
 0x7ad   : > { %6905 = vst [vmem:[%s10079_s29] sm:$0xff] %v6854_v15 }
 0x7ae   : > { %8565 = shalt.err (!%p8562_p6)
}
 0x7af   : > { %s8566_s16 = scalar_lea.hbm %s10582_s27, 240  ;;  %s8570_s21 = scalar_lea.hbm %s10964_s18, 480 }
 0x7b0   : > { %p8567_p7 = scmp.ne.s32.totalorder %s10582_s27, %s8566_s16  ;;  %p8571_p0 = scmp.lt.u32.totalorder %s10582_s27, %s10964_s18 }
 0x7b1   : > { %p8572_p1 = scmp.lt.u32.totalorder %s8570_s21, %s8566_s16  ;;  %p8574_p13 = scmp.lt.u32.totalorder %s8566_s16, %s10582_s27 }
 0x7b2   : > { %p8568_p9 = pnand %p8567_p7, %p10965_p8 }
 0x7b3   : > { %p8573_p4 = por %p8572_p1, %p8571_p0 }
 0x7b4   : > { %p8569_p12 = pneg %p8568_p9 }
 0x7b5   : > { %p8575_p10 = por %p8574_p13, %p8573_p4 }
 0x7b7   : > { %p8576_p11 = pnand %p8575_p10, %p8569_p12 }
 0x7b9   : > { %8579 = shalt.err (!%p8576_p11)
}
 0x7ba   : > { %8277 = dma.vmem_to_hbm [thread:$0]  (%p10965_p8), %s10584_s17, 240, %s10582_s27, %s7040_s28  }
 0x7bb PF: > { %s10966_s13 = sld [smem:[#allocation14_spill]]  ;;  %s10967_s30 = sld [smem:[#allocation11_spill]] }
 0x7bc   : > { %s10968_s19 = sld [smem:[#allocation17_spill]] }
 0x7c1   : > { %p8294_p2 = scmp.ge.s32.totalorder %s10966_s13, 2  ;;  %s7066_s22 = sand.u32 1, %s10967_s30  }
 0x7c2   : > { %p10969_p3 = scmp.ne.s32.totalorder %s10968_s19, 0  ;;  %s7067_s25 = scalar_lea.sflag [#allocation4], %s7066_s22 }
 0x7c4   : > { %p8287_p5 = pnand %p8294_p2, %p10969_p3 }
 0x7c6   : > { %8613 = dma.done.wait (!%p8287_p5), %s7067_s25, 240  }
 0x7c7   : > { %8615 = vsyncadd (!%p8287_p5), %s7067_s25, 4294967056  ;;  %s28_s30 = sadd.s32 1, %s10966_s13   ;;  %s10970_s23 = sld [smem:[#allocation12_spill]] }
 0x7c8   : > { %p25_p6 = scmp.ge.s32.totalorder %s28_s30, 4   ;;  %s10971_s27 = sld [smem:[#allocation18_spill]] }
 0x7c9   : > { %s10972_s28 = sld [smem:[#allocation13_spill]]  ;;  %s10973_s29 = sld [smem:[#allocation15_spill]] }
 0x7ca   : > { %s10974_s25 = smov %s8622_s26  ;;  %27 = sbr.rel (!%p25_p6) target bundleno = 8 (0x8), region = 124 }
 0x7cd   : > { %s10975_s26 = smov %s10970_s23 }
 0x7d1   :  { %7072 = vsyncpa [#allocation3], 1 }
 0x7d2   :  { %7074 = vsyncpa [#allocation3 + $0x1], 1 }
 0x7d3   :  { %7075 = vsyncpa [#allocation6], 1 }
 0x7d4   :  { %7076 = vsyncpa [#allocation4], 1 }
 0x7d5   :  { %7078 = vsyncpa [#allocation4 + $0x1], 1 }

</bundles_post_ra>
